<compile_context>
chip_gen: v5e
topology: v5e:2x2
jax: 0.10.0
libtpu: 0.0.40
codegen_flags: <defaults>
</compile_context>

<pallas_src>
import math
from functools import partial

import jax
import jax.numpy as jnp
import numpy as np
from jax.experimental import pallas as pl
from jax.experimental.pallas import tpu as pltpu


# ----------------------------------------------------------------------------
# Basis helpers (Chebyshev-Lobatto nodes, as in high_order_layers_torch)
# ----------------------------------------------------------------------------
def chebyshev_lobatto(n: int) -> np.ndarray:
    if n == 1:
        return np.array([0.0], dtype=np.float64)
    k = np.arange(n, dtype=np.float64)
    pts = -np.cos(k * math.pi / (n - 1))
    pts[np.abs(pts) < 1e-15] = 0.0
    return pts


# ----------------------------------------------------------------------------
# Fused kernel: expansion + in-VMEM im2col + one conv matmul, one image / step
# ----------------------------------------------------------------------------
def _make_fused_kernel(*, n, segments, length, nodes, C, V, k, H, W, OH, OW,
                       OWp, O, K, rescale, compute_dtype):
    half = 0.5 * length
    seg_over_len = float(segments) / float(length)
    len_over_seg = float(length) / float(segments)
    CV = C * V
    step = n - 1
    max_g = (segments - 1) * step

    # Reciprocals of node differences (no divides inside the kernel).
    inv_diff = [[0.0] * n for _ in range(n)]
    for j in range(n):
        for m in range(n):
            if m != j:
                inv_diff[j][m] = 1.0 / (nodes[j] - nodes[m])

    def kernel(x_ref, w_ref, o_ref, e_ref, p_ref):
        x = x_ref[0]                                       # [H, W, C] f32

        # --- piecewise Lagrange expansion (elementwise) -> e_ref [H, W, V*C]
        # NOTE: local coordinate matches the original module for length == 2.
        seg = jnp.clip(jnp.floor((x + half) * seg_over_len),
                       0.0, float(segments - 1))
        seg_i = seg.astype(jnp.int32)
        x_min = seg * len_over_seg - half
        t = (x - x_min) * float(segments) - half
        g = seg_i * step                                   # slot of local node 0

        basis = []
        for j in range(n):
            b = jnp.ones_like(t)
            for m in range(n):
                if m != j:
                    b = b * ((t - nodes[m]) * inv_diff[j][m])
            basis.append(b)

        for v in range(V):
            acc = None
            for j in range(n):
                gv = v - j
                if gv < 0 or gv > max_g:
                    continue
                if step > 0 and gv % step != 0:
                    continue
                if step == 0 and gv != 0:
                    continue
                term = jnp.where(g == gv, basis[j], 0.0)
                acc = term if acc is None else acc + term
            if acc is None:                                # defensive, unreachable
                acc = jnp.zeros_like(t)
            e_ref[:, :, v * C:(v + 1) * C] = acc           # lane order: v*C + c

        # --- zero the OW -> OWp padding rows (keeps padded matmul cols finite)
        if OWp > OW:
            p_ref[:, OW:, :] = jnp.zeros((OH, OWp - OW, K), compute_dtype)

        # --- im2col entirely in VMEM: p_ref[oh, ow, (ki*k+kj)*CV + cv]
        for ki in range(k):
            for kj in range(k):
                col = (ki * k + kj) * CV
                p_ref[:, :OW, col:col + CV] = (
                    e_ref[ki:ki + OH, kj:kj + OW, :].astype(compute_dtype))

        # --- single MXU matmul per image (f32 accumulation).
        # OWp is a sublane-tile multiple, so this reshape is a pure relabel.
        w = w_ref[...]                                     # [O, K]
        p2 = p_ref[...].reshape(OH * OWp, K)               # [OH*OWp, K]
        out = jax.lax.dot_general(
            w, p2,
            dimension_numbers=(((1,), (1,)), ((), ())),    # contract K with K
            preferred_element_type=jnp.float32)            # [O, OH*OWp]
        if rescale != 1.0:
            out = out * rescale
        o_ref[0] = out                                     # lane-dense store

    return kernel


@partial(jax.jit,
         static_argnames=("n", "segments", "length", "rescale", "use_bf16"))
def piecewise_polynomial_conv2d(x, weight, *, n, segments, length=2.0,
                                rescale=1.0, use_bf16=True):
    """x: [B, C, H, W], weight: [O, C*V, k, k] -> [B, O, OH, OW]."""
    B, C, H, W = x.shape
    O, CVw, k, k2 = weight.shape
    V = (n - 1) * segments + 1
    assert k == k2 and CVw == C * V and k <= H and k <= W
    OH, OW = H - k + 1, W - k + 1
    OWp = ((OW + 15) // 16) * 16       # sublane-tile aligned for f32 and bf16
    CV = C * V
    K = k * k * CV
    cdt = jnp.bfloat16 if use_bf16 else jnp.float32

    nodes = tuple(float(v) for v in chebyshev_lobatto(n))

    # Raw input in NHWC (tiny vs. the expanded intermediates).
    x_nhwc = jnp.transpose(x.astype(jnp.float32), (0, 2, 3, 1))

    # Reorder weight to K-order (ki, kj, v, c), matching the in-VMEM patches.
    w5 = weight.astype(jnp.float32).reshape(O, C, V, k, k)   # [o, c, v, ki, kj]
    wk = jnp.transpose(w5, (0, 3, 4, 2, 1)).reshape(O, K)    # [o, ki, kj, v, c]
    wk = wk.astype(cdt)

    kernel = _make_fused_kernel(n=n, segments=segments, length=float(length),
                                nodes=nodes, C=C, V=V, k=k, H=H, W=W, OH=OH,
                                OW=OW, OWp=OWp, O=O, K=K,
                                rescale=float(rescale), compute_dtype=cdt)

    # Explicit VMEM budget: double-buffered blocks + scratch, with headroom.
    itemsize = 2 if use_bf16 else 4
    block_bytes = H * W * C * 4 + O * K * itemsize + O * OH * OWp * 4
    scratch_bytes = H * W * CV * 4 + OH * OWp * K * itemsize
    vmem_limit = int(max(32 * 2 ** 20,
                         min(64 * 2 ** 20, 4 * block_bytes + 2 * scratch_bytes)))

    out = pl.pallas_call(
        kernel,
        out_shape=jax.ShapeDtypeStruct((B, O, OH * OWp), jnp.float32),
        grid=(B,),
        in_specs=[
            pl.BlockSpec((1, H, W, C), lambda b: (b, 0, 0, 0)),
            pl.BlockSpec((O, K), lambda b: (0, 0)),
        ],
        out_specs=pl.BlockSpec((1, O, OH * OWp), lambda b: (b, 0, 0)),
        scratch_shapes=[
            pltpu.VMEM((H, W, CV), jnp.float32),    # expanded activations
            pltpu.VMEM((OH, OWp, K), cdt),          # in-VMEM im2col patches
        ],
        compiler_params=pltpu.CompilerParams(
            dimension_semantics=("parallel",),      # batch -> both TCs on v7x
            vmem_limit_bytes=vmem_limit),
    )(x_nhwc, wk)

    # Output is already channel-major with spatial in lanes: only a cheap
    # reshape + pad-slice, no transpose.
    return out.reshape(B, O, OH, OWp)[:, :, :, :OW]


# ----------------------------------------------------------------------------
# Module-equivalent wrapper
# ----------------------------------------------------------------------------
class PiecewisePolynomialConvolution2d:
    def __init__(self, n, segments, in_channels, out_channels, kernel_size,
                 length=2.0, rescale_output=False, periodicity=None,
                 weight_magnitude=1.0, use_bf16=True, key=None):
        self.n = n
        self.segments = segments
        self.in_channels = in_channels
        self.kernel_size = kernel_size
        self.length = length
        self.periodicity = periodicity
        self.use_bf16 = use_bf16
        self._channels = ((n - 1) * segments + 1) * in_channels
        in_features = self._channels * kernel_size * kernel_size
        bound = weight_magnitude if rescale_output else weight_magnitude / in_features
        if key is None:
            key = jax.random.PRNGKey(0)
        # Conv2d weight [O, C_expanded, k, k], bias-free, uniform init as in
        # conv2d_wrapper.
        self.weight = jax.random.uniform(
            key, (out_channels, self._channels, kernel_size, kernel_size),
            minval=-bound, maxval=bound, dtype=jnp.float32)
        self._total_in = in_channels * kernel_size * kernel_size
        self._rescale = 1.0 / self._total_in if rescale_output else 1.0

    def __call__(self, x):
        # TODO(synk): make_periodic (periodicity != None) not implemented.
        return piecewise_polynomial_conv2d(
            x, self.weight, n=self.n, segments=self.segments,
            length=self.length, rescale=self._rescale, use_bf16=self.use_bf16)


# ----------------------------------------------------------------------------
# Pure-JAX reference for validation
# ----------------------------------------------------------------------------
def reference_forward(x, weight, n, segments, length, rescale):
    half = 0.5 * length
    V = (n - 1) * segments + 1
    nodes = chebyshev_lobatto(n)
    seg = jnp.clip(jnp.floor((x + half) / length * segments), 0, segments - 1)
    x_min = seg / segments * length - half
    x_max = (seg + 1.0) / segments * length - half
    t = length * (x - x_min) / (x_max - x_min) - half
    seg_i = seg.astype(jnp.int32)

    mat = jnp.zeros((V,) + x.shape, dtype=jnp.float32)
    for j in range(n):
        b = jnp.ones_like(t)
        for m in range(n):
            if m != j:
                b = b * (t - float(nodes[m])) / (float(nodes[j]) - float(nodes[m]))
        g = seg_i * (n - 1) + j
        onehot = g[None] == jnp.arange(V).reshape(V, 1, 1, 1, 1)
        mat = mat + jnp.where(onehot, b[None], 0.0)

    B, C, H, W = x.shape
    xe = jnp.transpose(mat, (1, 2, 0, 3, 4)).reshape(B, C * V, H, W)
    out = jax.lax.conv_general_dilated(
        xe, weight, window_strides=(1, 1), padding="VALID",
        dimension_numbers=("NCHW", "OIHW", "NCHW"))
    return out * rescale


if __name__ == "__main__":
    key = jax.random.PRNGKey(0)
    kx, kw = jax.random.split(key)

    B, C, H, W = 2, 4, 16, 16
    n, segments, ksz, out_channels = 3, 2, 3, 8

    x = jax.random.uniform(kx, (B, C, H, W), minval=-1.0, maxval=1.0,
                           dtype=jnp.float32)

    layer = PiecewisePolynomialConvolution2d(
        n=n, segments=segments, in_channels=C, out_channels=out_channels,
        kernel_size=ksz, length=2.0, rescale_output=False, use_bf16=True,
        key=kw)

    out = jax.block_until_ready(layer(x))
    assert out.shape == (B, out_channels, H - ksz + 1, W - ksz + 1), out.shape

    ref = jax.block_until_ready(
        reference_forward(x, layer.weight, n, segments, 2.0, layer._rescale))

    # f32 MXU path: tight structural check.
    out_f32 = jax.block_until_ready(piecewise_polynomial_conv2d(
        x, layer.weight, n=n, segments=segments, length=2.0,
        rescale=layer._rescale, use_bf16=False))
    np.testing.assert_allclose(np.asarray(out_f32), np.asarray(ref),
                               rtol=1e-3, atol=1e-4)

    # bf16 MXU path (default, f32 accumulation): looser numerical tolerance.
    np.testing.assert_allclose(np.asarray(out), np.asarray(ref),
                               rtol=2e-2, atol=3e-3)

    print("KERNEL_OK")
</pallas_src>

<mosaic_0001>
module attributes {stable_mosaic.version = 11 : i64} {
  func.func @kernel(%arg0: i32, %arg1: memref<1x16x16x4xf32, #tpu.memory_space<vmem>>, %arg2: memref<8x180xbf16, #tpu.memory_space<vmem>>, %arg3: memref<1x8x224xf32, #tpu.memory_space<vmem>>, %arg4: memref<16x16x20xf32, #tpu.memory_space<vmem>>, %arg5: memref<14x16x180xbf16, #tpu.memory_space<vmem>>) attributes {dimension_semantics = [#tpu.dimension_semantics<parallel>], iteration_bounds = array<i64: 2>, scalar_prefetch = 0 : i64, scratch_operands = 2 : i64, tpu.core_type = #tpu.core_type<tc>, window_params = [{transform_indices = @transform_0, window_bounds = array<i64: 1, 16, 16, 4>}, {pipeline_mode = #tpu.pipeline_mode<synchronous>, transform_indices = @transform_1, window_bounds = array<i64: 8, 180>}, {transform_indices = @transform_2, window_bounds = array<i64: 1, 8, 224>}]} {
    %c0 = arith.constant 0 : index
    %c0_0 = arith.constant 0 : index
    %c0_1 = arith.constant 0 : index
    %c0_2 = arith.constant 0 : index
    %0 = vector.load %arg1[%c0, %c0_0, %c0_1, %c0_2] : memref<1x16x16x4xf32, #tpu.memory_space<vmem>>, vector<1x16x16x4xf32>
    %1 = vector.shape_cast %0 : vector<1x16x16x4xf32> to vector<16x16x4xf32>
    %cst = arith.constant 1.000000e+00 : f32
    %2 = vector.broadcast %cst : f32 to vector<16x16x4xf32>
    %3 = arith.addf %1, %2 : vector<16x16x4xf32>
    %cst_3 = arith.constant 1.000000e+00 : f32
    %4 = vector.broadcast %cst_3 : f32 to vector<16x16x4xf32>
    %5 = arith.mulf %3, %4 : vector<16x16x4xf32>
    %6 = math.floor %5 : vector<16x16x4xf32>
    %cst_4 = arith.constant 0.000000e+00 : f32
    %cst_5 = arith.constant 1.000000e+00 : f32
    %7 = vector.broadcast %cst_4 : f32 to vector<16x16x4xf32>
    %8 = arith.maximumf %7, %6 : vector<16x16x4xf32>
    %9 = vector.broadcast %cst_5 : f32 to vector<16x16x4xf32>
    %10 = arith.minimumf %9, %8 : vector<16x16x4xf32>
    %11 = arith.fptosi %10 : vector<16x16x4xf32> to vector<16x16x4xi32>
    %cst_6 = arith.constant 1.000000e+00 : f32
    %12 = vector.broadcast %cst_6 : f32 to vector<16x16x4xf32>
    %13 = arith.mulf %10, %12 : vector<16x16x4xf32>
    %cst_7 = arith.constant 1.000000e+00 : f32
    %14 = vector.broadcast %cst_7 : f32 to vector<16x16x4xf32>
    %15 = arith.subf %13, %14 : vector<16x16x4xf32>
    %16 = arith.subf %1, %15 : vector<16x16x4xf32>
    %cst_8 = arith.constant 2.000000e+00 : f32
    %17 = vector.broadcast %cst_8 : f32 to vector<16x16x4xf32>
    %18 = arith.mulf %16, %17 : vector<16x16x4xf32>
    %cst_9 = arith.constant 1.000000e+00 : f32
    %19 = vector.broadcast %cst_9 : f32 to vector<16x16x4xf32>
    %20 = arith.subf %18, %19 : vector<16x16x4xf32>
    %c2_i32 = arith.constant 2 : i32
    %21 = vector.broadcast %c2_i32 : i32 to vector<16x16x4xi32>
    %22 = arith.muli %11, %21 : vector<16x16x4xi32>
    %cst_10 = arith.constant 1.000000e+00 : f32
    %23 = vector.broadcast %cst_10 : f32 to vector<16x16x4xf32>
    %cst_11 = arith.constant 0.000000e+00 : f32
    %24 = vector.broadcast %cst_11 : f32 to vector<16x16x4xf32>
    %25 = arith.subf %20, %24 : vector<16x16x4xf32>
    %cst_12 = arith.constant -1.000000e+00 : f32
    %26 = vector.broadcast %cst_12 : f32 to vector<16x16x4xf32>
    %27 = arith.mulf %25, %26 : vector<16x16x4xf32>
    %28 = arith.mulf %23, %27 : vector<16x16x4xf32>
    %cst_13 = arith.constant 1.000000e+00 : f32
    %29 = vector.broadcast %cst_13 : f32 to vector<16x16x4xf32>
    %30 = arith.subf %20, %29 : vector<16x16x4xf32>
    %cst_14 = arith.constant -5.000000e-01 : f32
    %31 = vector.broadcast %cst_14 : f32 to vector<16x16x4xf32>
    %32 = arith.mulf %30, %31 : vector<16x16x4xf32>
    %33 = arith.mulf %28, %32 : vector<16x16x4xf32>
    %cst_15 = arith.constant 1.000000e+00 : f32
    %34 = vector.broadcast %cst_15 : f32 to vector<16x16x4xf32>
    %cst_16 = arith.constant -1.000000e+00 : f32
    %35 = vector.broadcast %cst_16 : f32 to vector<16x16x4xf32>
    %36 = arith.subf %20, %35 : vector<16x16x4xf32>
    %cst_17 = arith.constant 1.000000e+00 : f32
    %37 = vector.broadcast %cst_17 : f32 to vector<16x16x4xf32>
    %38 = arith.mulf %36, %37 : vector<16x16x4xf32>
    %39 = arith.mulf %34, %38 : vector<16x16x4xf32>
    %cst_18 = arith.constant 1.000000e+00 : f32
    %40 = vector.broadcast %cst_18 : f32 to vector<16x16x4xf32>
    %41 = arith.subf %20, %40 : vector<16x16x4xf32>
    %cst_19 = arith.constant -1.000000e+00 : f32
    %42 = vector.broadcast %cst_19 : f32 to vector<16x16x4xf32>
    %43 = arith.mulf %41, %42 : vector<16x16x4xf32>
    %44 = arith.mulf %39, %43 : vector<16x16x4xf32>
    %cst_20 = arith.constant 1.000000e+00 : f32
    %45 = vector.broadcast %cst_20 : f32 to vector<16x16x4xf32>
    %cst_21 = arith.constant -1.000000e+00 : f32
    %46 = vector.broadcast %cst_21 : f32 to vector<16x16x4xf32>
    %47 = arith.subf %20, %46 : vector<16x16x4xf32>
    %cst_22 = arith.constant 5.000000e-01 : f32
    %48 = vector.broadcast %cst_22 : f32 to vector<16x16x4xf32>
    %49 = arith.mulf %47, %48 : vector<16x16x4xf32>
    %50 = arith.mulf %45, %49 : vector<16x16x4xf32>
    %cst_23 = arith.constant 0.000000e+00 : f32
    %51 = vector.broadcast %cst_23 : f32 to vector<16x16x4xf32>
    %52 = arith.subf %20, %51 : vector<16x16x4xf32>
    %cst_24 = arith.constant 1.000000e+00 : f32
    %53 = vector.broadcast %cst_24 : f32 to vector<16x16x4xf32>
    %54 = arith.mulf %52, %53 : vector<16x16x4xf32>
    %55 = arith.mulf %50, %54 : vector<16x16x4xf32>
    %c0_i32 = arith.constant 0 : i32
    %56 = vector.broadcast %c0_i32 : i32 to vector<16x16x4xi32>
    %57 = arith.cmpi eq, %22, %56 : vector<16x16x4xi32>
    %cst_25 = arith.constant 0.000000e+00 : f32
    %58 = vector.broadcast %cst_25 : f32 to vector<16x16x4xf32>
    %59 = arith.select %57, %33, %58 : vector<16x16x4xi1>, vector<16x16x4xf32>
    %c0_26 = arith.constant 0 : index
    %c0_27 = arith.constant 0 : index
    %c0_28 = arith.constant 0 : index
    %60 = vector.load %arg4[%c0_26, %c0_27, %c0_28] : memref<16x16x20xf32, #tpu.memory_space<vmem>>, vector<16x16x4xf32>
    tpu.vector_store %arg4[%c0_26, %c0_27, %c0_28], %59 {strides = array<i32>} : memref<16x16x20xf32, #tpu.memory_space<vmem>>, vector<16x16x4xf32>,
    %c0_i32_29 = arith.constant 0 : i32
    %61 = vector.broadcast %c0_i32_29 : i32 to vector<16x16x4xi32>
    %62 = arith.cmpi eq, %22, %61 : vector<16x16x4xi32>
    %cst_30 = arith.constant 0.000000e+00 : f32
    %63 = vector.broadcast %cst_30 : f32 to vector<16x16x4xf32>
    %64 = arith.select %62, %44, %63 : vector<16x16x4xi1>, vector<16x16x4xf32>
    %c0_31 = arith.constant 0 : index
    %c0_32 = arith.constant 0 : index
    %c4 = arith.constant 4 : index
    %65 = vector.load %arg4[%c0_31, %c0_32, %c4] : memref<16x16x20xf32, #tpu.memory_space<vmem>>, vector<16x16x4xf32>
    tpu.vector_store %arg4[%c0_31, %c0_32, %c4], %64 {strides = array<i32>} : memref<16x16x20xf32, #tpu.memory_space<vmem>>, vector<16x16x4xf32>,
    %c2_i32_33 = arith.constant 2 : i32
    %66 = vector.broadcast %c2_i32_33 : i32 to vector<16x16x4xi32>
    %67 = arith.cmpi eq, %22, %66 : vector<16x16x4xi32>
    %cst_34 = arith.constant 0.000000e+00 : f32
    %68 = vector.broadcast %cst_34 : f32 to vector<16x16x4xf32>
    %69 = arith.select %67, %33, %68 : vector<16x16x4xi1>, vector<16x16x4xf32>
    %c0_i32_35 = arith.constant 0 : i32
    %70 = vector.broadcast %c0_i32_35 : i32 to vector<16x16x4xi32>
    %71 = arith.cmpi eq, %22, %70 : vector<16x16x4xi32>
    %cst_36 = arith.constant 0.000000e+00 : f32
    %72 = vector.broadcast %cst_36 : f32 to vector<16x16x4xf32>
    %73 = arith.select %71, %55, %72 : vector<16x16x4xi1>, vector<16x16x4xf32>
    %74 = arith.addf %69, %73 : vector<16x16x4xf32>
    %c0_37 = arith.constant 0 : index
    %c0_38 = arith.constant 0 : index
    %c8 = arith.constant 8 : index
    %75 = vector.load %arg4[%c0_37, %c0_38, %c8] : memref<16x16x20xf32, #tpu.memory_space<vmem>>, vector<16x16x4xf32>
    tpu.vector_store %arg4[%c0_37, %c0_38, %c8], %74 {strides = array<i32>} : memref<16x16x20xf32, #tpu.memory_space<vmem>>, vector<16x16x4xf32>,
    %c2_i32_39 = arith.constant 2 : i32
    %76 = vector.broadcast %c2_i32_39 : i32 to vector<16x16x4xi32>
    %77 = arith.cmpi eq, %22, %76 : vector<16x16x4xi32>
    %cst_40 = arith.constant 0.000000e+00 : f32
    %78 = vector.broadcast %cst_40 : f32 to vector<16x16x4xf32>
    %79 = arith.select %77, %44, %78 : vector<16x16x4xi1>, vector<16x16x4xf32>
    %c0_41 = arith.constant 0 : index
    %c0_42 = arith.constant 0 : index
    %c12 = arith.constant 12 : index
    %80 = vector.load %arg4[%c0_41, %c0_42, %c12] : memref<16x16x20xf32, #tpu.memory_space<vmem>>, vector<16x16x4xf32>
    tpu.vector_store %arg4[%c0_41, %c0_42, %c12], %79 {strides = array<i32>} : memref<16x16x20xf32, #tpu.memory_space<vmem>>, vector<16x16x4xf32>,
    %c2_i32_43 = arith.constant 2 : i32
    %81 = vector.broadcast %c2_i32_43 : i32 to vector<16x16x4xi32>
    %82 = arith.cmpi eq, %22, %81 : vector<16x16x4xi32>
    %cst_44 = arith.constant 0.000000e+00 : f32
    %83 = vector.broadcast %cst_44 : f32 to vector<16x16x4xf32>
    %84 = arith.select %82, %55, %83 : vector<16x16x4xi1>, vector<16x16x4xf32>
    %c0_45 = arith.constant 0 : index
    %c0_46 = arith.constant 0 : index
    %c16 = arith.constant 16 : index
    %85 = vector.load %arg4[%c0_45, %c0_46, %c16] : memref<16x16x20xf32, #tpu.memory_space<vmem>>, vector<16x16x4xf32>
    tpu.vector_store %arg4[%c0_45, %c0_46, %c16], %84 {strides = array<i32>} : memref<16x16x20xf32, #tpu.memory_space<vmem>>, vector<16x16x4xf32>,
    %cst_47 = arith.constant 0.000000e+00 : bf16
    %86 = vector.broadcast %cst_47 : bf16 to vector<14x2x180xbf16>
    %c0_48 = arith.constant 0 : index
    %c14 = arith.constant 14 : index
    %c0_49 = arith.constant 0 : index
    %87 = vector.load %arg5[%c0_48, %c14, %c0_49] : memref<14x16x180xbf16, #tpu.memory_space<vmem>>, vector<14x2x180xbf16>
    tpu.vector_store %arg5[%c0_48, %c14, %c0_49], %86 {strides = array<i32>} : memref<14x16x180xbf16, #tpu.memory_space<vmem>>, vector<14x2x180xbf16>,
    %c0_50 = arith.constant 0 : index
    %c0_51 = arith.constant 0 : index
    %c0_52 = arith.constant 0 : index
    %88 = vector.load %arg4[%c0_50, %c0_51, %c0_52] : memref<16x16x20xf32, #tpu.memory_space<vmem>>, vector<14x14x20xf32>
    %89 = arith.truncf %88 : vector<14x14x20xf32> to vector<14x14x20xbf16>
    %c0_53 = arith.constant 0 : index
    %c0_54 = arith.constant 0 : index
    %c0_55 = arith.constant 0 : index
    %90 = vector.load %arg5[%c0_53, %c0_54, %c0_55] : memref<14x16x180xbf16, #tpu.memory_space<vmem>>, vector<14x14x20xbf16>
    tpu.vector_store %arg5[%c0_53, %c0_54, %c0_55], %89 {strides = array<i32>} : memref<14x16x180xbf16, #tpu.memory_space<vmem>>, vector<14x14x20xbf16>,
    %c0_56 = arith.constant 0 : index
    %c1 = arith.constant 1 : index
    %c0_57 = arith.constant 0 : index
    %91 = vector.load %arg4[%c0_56, %c1, %c0_57] : memref<16x16x20xf32, #tpu.memory_space<vmem>>, vector<14x14x20xf32>
    %92 = arith.truncf %91 : vector<14x14x20xf32> to vector<14x14x20xbf16>
    %c0_58 = arith.constant 0 : index
    %c0_59 = arith.constant 0 : index
    %c20 = arith.constant 20 : index
    %93 = vector.load %arg5[%c0_58, %c0_59, %c20] : memref<14x16x180xbf16, #tpu.memory_space<vmem>>, vector<14x14x20xbf16>
    tpu.vector_store %arg5[%c0_58, %c0_59, %c20], %92 {strides = array<i32>} : memref<14x16x180xbf16, #tpu.memory_space<vmem>>, vector<14x14x20xbf16>,
    %c0_60 = arith.constant 0 : index
    %c2 = arith.constant 2 : index
    %c0_61 = arith.constant 0 : index
    %94 = vector.load %arg4[%c0_60, %c2, %c0_61] : memref<16x16x20xf32, #tpu.memory_space<vmem>>, vector<14x14x20xf32>
    %95 = arith.truncf %94 : vector<14x14x20xf32> to vector<14x14x20xbf16>
    %c0_62 = arith.constant 0 : index
    %c0_63 = arith.constant 0 : index
    %c40 = arith.constant 40 : index
    %96 = vector.load %arg5[%c0_62, %c0_63, %c40] : memref<14x16x180xbf16, #tpu.memory_space<vmem>>, vector<14x14x20xbf16>
    tpu.vector_store %arg5[%c0_62, %c0_63, %c40], %95 {strides = array<i32>} : memref<14x16x180xbf16, #tpu.memory_space<vmem>>, vector<14x14x20xbf16>,
    %c1_64 = arith.constant 1 : index
    %c0_65 = arith.constant 0 : index
    %c0_66 = arith.constant 0 : index
    %97 = vector.load %arg4[%c1_64, %c0_65, %c0_66] : memref<16x16x20xf32, #tpu.memory_space<vmem>>, vector<14x14x20xf32>
    %98 = arith.truncf %97 : vector<14x14x20xf32> to vector<14x14x20xbf16>
    %c0_67 = arith.constant 0 : index
    %c0_68 = arith.constant 0 : index
    %c60 = arith.constant 60 : index
    %99 = vector.load %arg5[%c0_67, %c0_68, %c60] : memref<14x16x180xbf16, #tpu.memory_space<vmem>>, vector<14x14x20xbf16>
    tpu.vector_store %arg5[%c0_67, %c0_68, %c60], %98 {strides = array<i32>} : memref<14x16x180xbf16, #tpu.memory_space<vmem>>, vector<14x14x20xbf16>,
    %c1_69 = arith.constant 1 : index
    %c1_70 = arith.constant 1 : index
    %c0_71 = arith.constant 0 : index
    %100 = vector.load %arg4[%c1_69, %c1_70, %c0_71] : memref<16x16x20xf32, #tpu.memory_space<vmem>>, vector<14x14x20xf32>
    %101 = arith.truncf %100 : vector<14x14x20xf32> to vector<14x14x20xbf16>
    %c0_72 = arith.constant 0 : index
    %c0_73 = arith.constant 0 : index
    %c80 = arith.constant 80 : index
    %102 = vector.load %arg5[%c0_72, %c0_73, %c80] : memref<14x16x180xbf16, #tpu.memory_space<vmem>>, vector<14x14x20xbf16>
    tpu.vector_store %arg5[%c0_72, %c0_73, %c80], %101 {strides = array<i32>} : memref<14x16x180xbf16, #tpu.memory_space<vmem>>, vector<14x14x20xbf16>,
    %c1_74 = arith.constant 1 : index
    %c2_75 = arith.constant 2 : index
    %c0_76 = arith.constant 0 : index
    %103 = vector.load %arg4[%c1_74, %c2_75, %c0_76] : memref<16x16x20xf32, #tpu.memory_space<vmem>>, vector<14x14x20xf32>
    %104 = arith.truncf %103 : vector<14x14x20xf32> to vector<14x14x20xbf16>
    %c0_77 = arith.constant 0 : index
    %c0_78 = arith.constant 0 : index
    %c100 = arith.constant 100 : index
    %105 = vector.load %arg5[%c0_77, %c0_78, %c100] : memref<14x16x180xbf16, #tpu.memory_space<vmem>>, vector<14x14x20xbf16>
    tpu.vector_store %arg5[%c0_77, %c0_78, %c100], %104 {strides = array<i32>} : memref<14x16x180xbf16, #tpu.memory_space<vmem>>, vector<14x14x20xbf16>,
    %c2_79 = arith.constant 2 : index
    %c0_80 = arith.constant 0 : index
    %c0_81 = arith.constant 0 : index
    %106 = vector.load %arg4[%c2_79, %c0_80, %c0_81] : memref<16x16x20xf32, #tpu.memory_space<vmem>>, vector<14x14x20xf32>
    %107 = arith.truncf %106 : vector<14x14x20xf32> to vector<14x14x20xbf16>
    %c0_82 = arith.constant 0 : index
    %c0_83 = arith.constant 0 : index
    %c120 = arith.constant 120 : index
    %108 = vector.load %arg5[%c0_82, %c0_83, %c120] : memref<14x16x180xbf16, #tpu.memory_space<vmem>>, vector<14x14x20xbf16>
    tpu.vector_store %arg5[%c0_82, %c0_83, %c120], %107 {strides = array<i32>} : memref<14x16x180xbf16, #tpu.memory_space<vmem>>, vector<14x14x20xbf16>,
    %c2_84 = arith.constant 2 : index
    %c1_85 = arith.constant 1 : index
    %c0_86 = arith.constant 0 : index
    %109 = vector.load %arg4[%c2_84, %c1_85, %c0_86] : memref<16x16x20xf32, #tpu.memory_space<vmem>>, vector<14x14x20xf32>
    %110 = arith.truncf %109 : vector<14x14x20xf32> to vector<14x14x20xbf16>
    %c0_87 = arith.constant 0 : index
    %c0_88 = arith.constant 0 : index
    %c140 = arith.constant 140 : index
    %111 = vector.load %arg5[%c0_87, %c0_88, %c140] : memref<14x16x180xbf16, #tpu.memory_space<vmem>>, vector<14x14x20xbf16>
    tpu.vector_store %arg5[%c0_87, %c0_88, %c140], %110 {strides = array<i32>} : memref<14x16x180xbf16, #tpu.memory_space<vmem>>, vector<14x14x20xbf16>,
    %c2_89 = arith.constant 2 : index
    %c2_90 = arith.constant 2 : index
    %c0_91 = arith.constant 0 : index
    %112 = vector.load %arg4[%c2_89, %c2_90, %c0_91] : memref<16x16x20xf32, #tpu.memory_space<vmem>>, vector<14x14x20xf32>
    %113 = arith.truncf %112 : vector<14x14x20xf32> to vector<14x14x20xbf16>
    %c0_92 = arith.constant 0 : index
    %c0_93 = arith.constant 0 : index
    %c160 = arith.constant 160 : index
    %114 = vector.load %arg5[%c0_92, %c0_93, %c160] : memref<14x16x180xbf16, #tpu.memory_space<vmem>>, vector<14x14x20xbf16>
    tpu.vector_store %arg5[%c0_92, %c0_93, %c160], %113 {strides = array<i32>} : memref<14x16x180xbf16, #tpu.memory_space<vmem>>, vector<14x14x20xbf16>,
    %c0_94 = arith.constant 0 : index
    %c0_95 = arith.constant 0 : index
    %115 = vector.load %arg2[%c0_94, %c0_95] : memref<8x180xbf16, #tpu.memory_space<vmem>>, vector<8x180xbf16>
    %c0_96 = arith.constant 0 : index
    %c0_97 = arith.constant 0 : index
    %c0_98 = arith.constant 0 : index
    %116 = vector.load %arg5[%c0_96, %c0_97, %c0_98] : memref<14x16x180xbf16, #tpu.memory_space<vmem>>, vector<14x16x180xbf16>
    %117 = vector.shape_cast %116 : vector<14x16x180xbf16> to vector<224x180xbf16>
    %cst_99 = arith.constant dense<0.000000e+00> : vector<8x224xf32>
    %118 = tpu.matmul %115, %117, %cst_99 {dimension_numbers = #tpu.dot_dimension_numbers<[1], [1], [0], [0], [0, 0, 1, 0], [], []>} : vector<8x180xbf16>, vector<224x180xbf16>, vector<8x224xf32> -> vector<8x224xf32>
    %c0_100 = arith.constant 0 : index
    %c0_101 = arith.constant 0 : index
    %c0_102 = arith.constant 0 : index
    %119 = vector.load %arg3[%c0_100, %c0_101, %c0_102] : memref<1x8x224xf32, #tpu.memory_space<vmem>>, vector<1x8x224xf32>
    %120 = vector.shape_cast %119 : vector<1x8x224xf32> to vector<8x224xf32>
    %121 = vector.shape_cast %118 : vector<8x224xf32> to vector<1x8x224xf32>
    tpu.vector_store %arg3[%c0_100, %c0_101, %c0_102], %121 {strides = array<i32>} : memref<1x8x224xf32, #tpu.memory_space<vmem>>, vector<1x8x224xf32>,
    return
  }
  func.func @transform_0(%arg0: i32) -> (i32, i32, i32, i32) {
    %c0_i32 = arith.constant 0 : i32
    %c0_i32_0 = arith.constant 0 : i32
    %c0_i32_1 = arith.constant 0 : i32
    %c0_i32_2 = arith.constant 0 : i32
    return %arg0, %c0_i32, %c0_i32_0, %c0_i32_1 : i32, i32, i32, i32
  }
  func.func @transform_1(%arg0: i32) -> (i32, i32) {
    %c0_i32 = arith.constant 0 : i32
    %c0_i32_0 = arith.constant 0 : i32
    %c0_i32_1 = arith.constant 0 : i32
    return %c0_i32, %c0_i32_0 : i32, i32
  }
  func.func @transform_2(%arg0: i32) -> (i32, i32, i32) {
    %c0_i32 = arith.constant 0 : i32
    %c0_i32_0 = arith.constant 0 : i32
    %c0_i32_1 = arith.constant 0 : i32
    return %arg0, %c0_i32, %c0_i32_0 : i32, i32, i32
  }
}

</mosaic_0001>

<bundles_post_ra>
// kernel: piecewise_polynomial_conv2d.1
= control target key start
LH: loop header
LB: loop body
LE: loop exit
PB: predicated region body
PF: predicated region fallthrough
CT: control target
= control target key end

     0   :  { %s4219_s9 = smov 0   ;;  %s7124_s0 = inlined_call_operand.vmem [shape: f32[2,16,16,4], index: 0, kind: input, shape index: {}]   ;;  %s7125_s1 = inlined_call_operand.vmem [shape: bf16[8,180], index: 1, kind: input, shape index: {}]   ;;  %s7126_s2 = inlined_call_operand.vmem [shape: f32[2,8,224], index: 2, kind: output, shape index: {}]  }
   0x1 LB: > { %s3817_s10 = sadd.s32 4294967295, %s4190_s9   ;;  %p3821_p0 = scmp.ge.s32.totalorder %s4190_s9, 1  ;;  %s4190_s9 = sphi %s4219_s9, %s12_s9  }
   0x2   : > { %p112_p1 = scmp.lt.s32.totalorder %s4190_s9, 3 }
   0x4   : > { %p113_p2 = pnand %p3821_p0, %p112_p1 }
   0x6   : > { %116 = sbr.rel (%p113_p2) target bundleno = 1352 (0x548), region = 28 }
   0xb   : > { %p134_p3 = scmp.lt.s32.totalorder %s3817_s10, 1  ;;  %s4192_s15 = smov 4  }
   0xc   : > { %s4193_s16 = smov 8   ;;  %s4194_s17 = smov 12  }
   0xd   : > { %s8049_s10 = smov (!%p134_p3, %s3817_s10), 1  ;;  %s4195_s18 = smov 16  }
   0xe   : > { %s4070_s11 = sshll.u32 %s8049_s10, 8  ;;  %s4196_s19 = smov 20  }
   0xf   : > { %s4233_s14 = scalar_lea.vmem %s7124_s0, %s4070_s11  ;;  %s4197_s20 = smov 40  }
  0x10   : > { %v147_v0 = vld [vmem:[%s4233_s14 + $0x10] sm:$0xff]  ;;  %v145_v1 = vld [vmem:[%s4233_s14] sm:$0xff]  ;;  %v148_v2 = vld [vmem:[%s4233_s14 + $0x18] sm:$0xff]  ;;  %s4198_s21 = smov 60   ;;  %s4199_s22 = smov 80  }
  0x11   : > { %v179_v3 = vadd.f32 1.0, %v147_v0  ;;  %v177_v4 = vadd.f32 1.0, %v145_v1  ;;  %v180_v5 = vadd.f32 1.0, %v148_v2  ;;  %v146_v6 = vld [vmem:[%s4233_s14 + $0x8] sm:$0xff]  ;;  %v4240_v7 = vld [vmem:[%s4233_s14 + $0x38] sm:$0xff]  ;;  %v4244_v10 = vld [vmem:[%s4233_s14 + $0x30] sm:$0xff] }
  0x12   : > { %v178_v8 = vadd.f32 1.0, %v146_v6  ;;  %v184_v9 = vadd.f32 1.0, %v4240_v7  ;;  %v4247_v14 = vld [vmem:[%s4233_s14 + $0x20] sm:$0xff]  ;;  %v183_v20 = vadd.f32 1.0, %v4244_v10  ;;  %v4252_v27 = vld [vmem:[%s4233_s14 + $0x50] sm:$0xff]  ;;  %s4200_s23 = smov 100  }
  0x13   : > { %v211_v11 = vfloor.f32 %v179_v3  ;;  %v209_v12 = vfloor.f32 %v177_v4  ;;  %v212_v13 = vfloor.f32 %v180_v5  ;;  %v181_v22 = vadd.f32 1.0, %v4247_v14  ;;  %s4201_s24 = smov 120   ;;  %s4202_s25 = smov 32  }
  0x14   : > { %v210_v15 = vfloor.f32 %v178_v8  ;;  %v216_v16 = vfloor.f32 %v184_v9  ;;  %v215_v31 = vfloor.f32 %v183_v20  ;;  %v187_v35 = vadd.f32 1.0, %v4252_v27  ;;  %s4071_s28 = sshll.u32 %s8049_s10, 4 }
  0x15   : > { %v243_v17 = vmax.f32 %v211_v11, 0.0  ;;  %v241_v18 = vmax.f32 %v209_v12, 0.0  ;;  %v244_v19 = vmax.f32 %v212_v13, 0.0  ;;  %v213_v34 = vfloor.f32 %v181_v22  ;;  %s143_s3 = scalar_lea.vmem %s7126_s2, %s4071_s28 }
  0x16   : > { %v242_v21 = vmax.f32 %v210_v15, 0.0  ;;  %v248_v26 = vmax.f32 %v216_v16, 0.0  ;;  %v247_v45 = vmax.f32 %v215_v31, 0.0  ;;  %v219_v49 = vfloor.f32 %v187_v35 }
  0x17   : > { %v275_v23 = vmin.f32 %v243_v17, 1.0  ;;  %v273_v24 = vmin.f32 %v241_v18, 1.0  ;;  %v276_v25 = vmin.f32 %v244_v19, 1.0  ;;  %v4261_v48 = vmax.f32 %v213_v34, 0.0 }
  0x18   : > { %v274_v28 = vmin.f32 %v242_v21, 1.0  ;;  %v280_v38 = vmin.f32 %v248_v26, 1.0  ;;  %v279_v61 = vmin.f32 %v247_v45, 1.0  ;;  %v251_v19 = vmax.f32 %v219_v49, 0.0 }
  0x19   : > { %v3828_v29 = vadd.f32 -1.0, %v275_v23  ;;  %v3826_v30 = vadd.f32 -1.0, %v273_v24  ;;  %v3829_v32 = vadd.f32 -1.0, %v276_v25  ;;  %v4255_v39 = vcvt.f32.s32 %v275_v23 }
  0x1a   : > { %v3827_v33 = vadd.f32 -1.0, %v274_v28  ;;  %v4257_v40 = vcvt.f32.s32 %v273_v24  ;;  %v4259_v46 = vcvt.f32.s32 %v276_v25  ;;  %v4267_v52 = vcvt.f32.s32 %v274_v28  ;;  %v4335_v24 = vld [vmem:[%s4233_s14 + $0x48] sm:$0xff] }
  0x1b   : > { %v371_v36 = vsub.f32 %v147_v0, %v3828_v29  ;;  %v369_v37 = vsub.f32 %v145_v1, %v3826_v30  ;;  %v372_v41 = vsub.f32 %v148_v2, %v3829_v32  ;;  %v7133_v54 = vmul.u32 2, %v4255_v39 }
  0x1c   : > { %v370_v42 = vsub.f32 %v146_v6, %v3827_v33  ;;  %7442 = vst [vmem:[#allocation4_spill] sm:$0xff] %v4259_v46  ;;  %v7130_v55 = vmul.u32 2, %v4257_v40  ;;  %v3833_v57 = vadd.f32 -1.0, %v280_v38  ;;  %v7128_v3 = vmul.u32 2, %v4259_v46 }
  0x1d   : > { %v403_v43 = vmul.f32 2.0, %v371_v36  ;;  %v401_v44 = vmul.f32 2.0, %v369_v37  ;;  %v404_v47 = vmul.f32 2.0, %v372_v41  ;;  %v7131_v5 = vmul.u32 2, %v4267_v52 }
  0x1e   : > { %v402_v53 = vmul.f32 2.0, %v370_v42  ;;  %v376_v1 = vsub.f32 %v4240_v7, %v3833_v57  ;;  %vm4299_vm0 = vcmp.eq.s32.totalorder %v7133_v54, 0  ;;  %vm4306_vm1 = vcmp.eq.s32.totalorder %v7130_v55, 0  ;;  %v4374_v42 = vld [vmem:[%s4233_s14 + $0x28] sm:$0xff] }
  0x1f   : > { %v4263_v50 = vadd.f32 -1.0, %v403_v43  ;;  %v4265_v51 = vadd.f32 -1.0, %v401_v44  ;;  %v4271_v56 = vadd.f32 -1.0, %v404_v47  ;;  %v7447_v7 = vmov 0 }
  0x20   : > { %v4288_v0 = vadd.f32 -1.0, %v402_v53  ;;  %v7448_v7 = vsel %vm4306_vm1, 4294967295, %v7447_v7  ;;  %v408_v15 = vmul.f32 2.0, %v376_v1  ;;  %v4323_v17 = vcvt.f32.s32 %v280_v38 }
  0x21   : > { %7443 = vst [vmem:[#allocation5_spill] sm:$0xff] %v4271_v56  ;;  %v4274_v58 = vadd.f32 -1.0, %v4263_v50  ;;  %v4277_v59 = vadd.f32 1.0, %v4263_v50  ;;  %v4280_v60 = vadd.f32 -1.0, %v4265_v51  ;;  %v4283_v62 = vadd.f32 1.0, %v4265_v51 }
  0x22   : > { %v4286_v63 = vadd.f32 -1.0, %v4271_v56  ;;  %v4294_v4 = vadd.f32 1.0, %v4271_v56  ;;  %7449 = vst [vmem:[#allocation7_spill] sm:$0xff] %v7448_v7  ;;  %v4315_v12 = vadd.f32 -1.0, %v4288_v0  ;;  %v4318_v13 = vadd.f32 1.0, %v4288_v0  ;;  %v4795_v56 = vld [vmem:[%s4233_s14 + $0xc0] sm:$0xff] }
  0x23   : > { %v659_v2 = vmul.f32 -1.0, %v4274_v58  ;;  %v657_v8 = vmul.f32 -1.0, %v4280_v60  ;;  %7452 = vst [vmem:[#allocation10_spill] sm:$0xff] %v4323_v17  ;;  %v3832_v18 = vadd.f32 -1.0, %v279_v61  ;;  %v4332_v23 = vadd.f32 -1.0, %v408_v15 }
  0x24   : > { %7444 = vst [vmem:[#allocation6_spill] sm:$0xff] %v4286_v63  ;;  %v660_v9 = vmul.f32 -1.0, %v4286_v63  ;;  %v658_v22 = vmul.f32 -1.0, %v4315_v12  ;;  %vm4343_vm2 = vcmp.eq.s32.totalorder %v7128_v3, 0  ;;  %v7454_v26 = vmov 0 }
  0x25   : > { %v4312_v11 = vmul.f32 %v4277_v59, %v659_v2  ;;  %v4321_v16 = vmul.f32 %v4283_v62, %v657_v8  ;;  %v7455_v26 = vsel %vm4343_vm2, 4294967295, %v7454_v26  ;;  %v4347_v28 = vcvt.f32.s32 %v279_v61 }
  0x26   : > { %v4329_v21 = vmul.f32 %v4294_v4, %v660_v9  ;;  %7456 = vst [vmem:[#allocation12_spill] sm:$0xff] %v7455_v26  ;;  %v375_v29 = vsub.f32 %v4244_v10, %v3832_v18  ;;  %v4352_v30 = vmul.f32 %v4318_v13, %v658_v22  ;;  %vm4356_vm3 = vcmp.eq.s32.totalorder %v7131_v5, 0 }
  0x27   : > { %7450 = vst [vmem:[#allocation8_spill] sm:$0xff] %v4312_v11  ;;  %v884_v20 = vsel %vm4299_vm0, %v4312_v11, 0.0  ;;  %v882_v25 = vsel %vm4306_vm1, %v4321_v16, 0.0  ;;  %v4361_v32 = vadd.f32 -1.0, %v4332_v23  ;;  %v4364_v33 = vadd.f32 1.0, %v4332_v23 }
  0x28   : > { %7451 = vst [vmem:[#allocation9_spill] sm:$0xff] %v4321_v16  ;;  %950 = vrot.lane.b32.xlu1 %v884_v20, %s4192_s15  ;;  %946 = vrot.lane.b32.xlu0 %v882_v25, %s4192_s15  ;;  %v407_v34 = vmul.f32 2.0, %v375_v29  ;;  %v277_v10 = vmin.f32 %v4261_v48, 1.0  ;;  %v283_v35 = vmin.f32 %v251_v19, 1.0  ;;  %v186_v36 = vadd.f32 1.0, %v4335_v24 }
  0x29   : > { %7453 = vst [vmem:[#allocation11_spill] sm:$0xff] %v4329_v21  ;;  %v885_v37 = vsel %vm4343_vm2, %v4329_v21, 0.0  ;;  %v7129_v38 = vmul.u32 2, %v4323_v17  ;;  %v664_v41 = vmul.f32 -1.0, %v4361_v32  ;;  %v883_v43 = vsel %vm4356_vm3, %v4352_v30, 0.0 }
  0x2a   : > { %7457 = vst [vmem:[#allocation13_spill] sm:$0xff] %v4347_v28  ;;  %v4379_v44 = vadd.f32 -1.0, %v407_v34  ;;  %v7127_v45 = vmul.u32 2, %v4347_v28  ;;  %v3830_v47 = vadd.f32 -1.0, %v277_v10  ;;  %v4385_v49 = vcvt.f32.s32 %v277_v10 }
  0x2b   : > { %7458 = vst [vmem:[#allocation14_spill] sm:$0xff] %v4352_v30  ;;  %v4383_v48 = vmul.f32 %v4364_v33, %v664_v41  ;;  %v3836_v53 = vadd.f32 -1.0, %v283_v35  ;;  %v218_v57 = vfloor.f32 %v186_v36  ;;  %v182_v8 = vadd.f32 1.0, %v4374_v42  ;;  %v4426_v41 = vld [vmem:[%s4233_s14 + $0x60] sm:$0xff] }
  0x2c   : > { %7461 = vst [vmem:[#allocation15_spill] sm:$0xff] %v4379_v44  ;;  %v4388_v61 = vadd.f32 -1.0, %v4379_v44  ;;  %v4391_v1 = vadd.f32 1.0, %v4379_v44  ;;  %v373_v2 = vsub.f32 %v4247_v14, %v3830_v47  ;;  %vm4397_vm4 = vcmp.eq.s32.totalorder %v7129_v38, 0  ;;  %v4407_v14 = vld [vmem:[%s4233_s14 + $0x68] sm:$0xff] }
  0x2d   : > { %7462 = vst [vmem:[#allocation16_spill] sm:$0xff] %v4383_v48  ;;  %v7465_v9 = vmov 0  ;;  %v4401_v15 = vcvt.f32.s32 %v283_v35  ;;  %v379_v18 = vsub.f32 %v4252_v27, %v3836_v53  ;;  %v250_v19 = vmax.f32 %v218_v57, 0.0 }
  0x2e   : > { %7463 = vst [vmem:[#allocation17_spill] sm:$0xff] %v4388_v61  ;;  %v7466_v9 = vsel %vm4397_vm4, 4294967295, %v7465_v9  ;;  %v663_v20 = vmul.f32 -1.0, %v4388_v61  ;;  %v405_v22 = vmul.f32 2.0, %v373_v2  ;;  %vm4412_vm5 = vcmp.eq.s32.totalorder %v7127_v45, 0 }
  0x2f   : > { %7464 = vst [vmem:[#allocation18_spill] sm:$0xff] %v4391_v1  ;;  %v7469_v25 = vmov 0  ;;  %v7132_v29 = vmul.u32 2, %v4385_v49  ;;  %v411_v34 = vmul.f32 2.0, %v379_v18  ;;  %v282_v27 = vmin.f32 %v250_v19, 1.0 }
  0x30   : > { %7467 = vst [vmem:[#allocation19_spill] sm:$0xff] %v7466_v9  ;;  %952 = vrot.lane.b32.xlu1 %v885_v37, %s4192_s15  ;;  %948 = vrot.lane.b32.xlu0 %v883_v43, %s4192_s15  ;;  %v7470_v25 = vsel %vm4412_vm5, 4294967295, %v7469_v25  ;;  %v889_v10 = vsel %vm4397_vm4, %v4383_v48, 0.0  ;;  %v4421_v35 = vmul.f32 %v4391_v1, %v663_v20  ;;  %v4423_v36 = vadd.f32 -1.0, %v405_v22 }
  0x31   : > { %7468 = vst [vmem:[#allocation20_spill] sm:$0xff] %v4401_v15  ;;  %v214_v37 = vfloor.f32 %v182_v8  ;;  %v4428_v43 = vadd.f32 -1.0, %v411_v34  ;;  %v7136_v47 = vmul.u32 2, %v4401_v15  ;;  %v3835_v53 = vadd.f32 -1.0, %v282_v27  ;;  %v7750_v31 = vld [vmem:[#allocation13_spill] sm:$0xff] }
  0x32   : > { %7471 = vst [vmem:[#allocation21_spill] sm:$0xff] %v7470_v25  ;;  %v190_v57 = vadd.f32 1.0, %v4407_v14  ;;  %v4433_v2 = vadd.f32 -1.0, %v4423_v36  ;;  %v4436_v18 = vadd.f32 1.0, %v4423_v36  ;;  %v4438_v19 = vcvt.f32.s32 %v282_v27  ;;  %v4453_v27 = vld [vmem:[%s4233_s14 + $0x40] sm:$0xff] }
  0x33   : > { %7472 = vst [vmem:[#allocation22_spill] sm:$0xff] %v4421_v35  ;;  %v246_v20 = vmax.f32 %v214_v37, 0.0  ;;  %v4441_v8 = vadd.f32 -1.0, %v4428_v43  ;;  %v4444_v22 = vadd.f32 1.0, %v4428_v43  ;;  %v378_v34 = vsub.f32 %v4335_v24, %v3835_v53 }
  0x34   : > { %7473 = vst [vmem:[#allocation23_spill] sm:$0xff] %v4428_v43  ;;  %v189_v45 = vadd.f32 1.0, %v4426_v41  ;;  %v888_v3 = vsel %vm4412_vm5, %v4421_v35, 0.0  ;;  %v661_v38 = vmul.f32 -1.0, %v4433_v2  ;;  %vm4457_vm6 = vcmp.eq.s32.totalorder %v7132_v29, 0 }
  0x35   : > { %7474 = vst [vmem:[#allocation24_spill] sm:$0xff] %v4438_v19  ;;  %v278_v55 = vmin.f32 %v246_v20, 1.0  ;;  %v667_v5 = vmul.f32 -1.0, %v4441_v8  ;;  %vm4464_vm7 = vcmp.eq.s32.totalorder %v7136_v47, 0  ;;  %v7478_v24 = vmov 0 }
  0x36   : > { %7475 = vst [vmem:[#allocation25_spill] sm:$0xff] %v4441_v8  ;;  %v7479_v24 = vsel %vm4464_vm7, 4294967295, %v7478_v24  ;;  %v410_v53 = vmul.f32 2.0, %v378_v34  ;;  %v4470_v20 = vmul.f32 %v4436_v18, %v661_v38  ;;  %v222_v48 = vfloor.f32 %v190_v57  ;;  %v4487_v57 = vld [vmem:[%s4233_s14 + $0x80] sm:$0xff] }
  0x37   : > { %7480 = vst [vmem:[#allocation26_spill] sm:$0xff] %v7479_v24  ;;  %v3831_v54 = vadd.f32 -1.0, %v278_v55  ;;  %v4475_v30 = vmul.f32 %v4444_v22, %v667_v5  ;;  %v221_v35 = vfloor.f32 %v189_v45  ;;  %v185_v11 = vadd.f32 1.0, %v4453_v27 }
  0x38   : > { %960 = vrot.lane.b32.xlu1 %v889_v10, %s4192_s15  ;;  %7481 = vst [vmem:[#allocation27_spill] sm:$0xff] %v4470_v20  ;;  %958 = vrot.lane.b32.xlu0 %v888_v3, %s4192_s15  ;;  %v4477_v47 = vadd.f32 -1.0, %v410_v53  ;;  %v886_v10 = vsel %vm4457_vm6, %v4470_v20, 0.0  ;;  %v4483_v38 = vcvt.f32.s32 %v278_v55  ;;  %v254_v29 = vmax.f32 %v222_v48, 0.0  ;;  %v7722_v6 = vld [vmem:[#allocation20_spill] sm:$0xff] }
  0x39   : > { %7482 = vst [vmem:[#allocation28_spill] sm:$0xff] %v4475_v30  ;;  %v374_v34 = vsub.f32 %v4374_v42, %v3831_v54  ;;  %954 = vrot.lane.b32.xlu2 %v886_v10, %s4192_s15  ;;  %v253_v45 = vmax.f32 %v221_v35, 0.0  ;;  %v7486_v53 = vmul.u32 2, %v4438_v19  ;;  %v7487_v20 = vmov 0 }
  0x3a   : > { %7483 = vst [vmem:[#allocation29_spill] sm:$0xff] %v4477_v47  ;;  %v4491_v3 = vadd.f32 -1.0, %v4477_v47  ;;  %v4494_v5 = vadd.f32 1.0, %v4477_v47  ;;  %v286_v54 = vmin.f32 %v254_v29, 1.0  ;;  %v217_v42 = vfloor.f32 %v185_v11 }
  0x3b   : > { %vm4498_vm8 = vcmp.eq.s32.totalorder %v7486_v53, 0  ;;  %v406_v55 = vmul.f32 2.0, %v374_v34  ;;  %v892_v48 = vsel %vm4464_vm7, %v4475_v30, 0.0  ;;  %v285_v21 = vmin.f32 %v253_v45, 1.0 }
  0x3c   : > { %7484 = vst [vmem:[#allocation30_spill] sm:$0xff] %v4491_v3  ;;  %v7488_v20 = vsel %vm4498_vm8, 4294967295, %v7487_v20  ;;  %v666_v10 = vmul.f32 -1.0, %v4491_v3  ;;  %v193_v16 = vadd.f32 1.0, %v4487_v57  ;;  %v3839_v53 = vadd.f32 -1.0, %v286_v54 }
  0x3d   : > { %7485 = vst [vmem:[#allocation31_spill] sm:$0xff] %v4494_v5  ;;  %v4507_v47 = vadd.f32 -1.0, %v406_v55  ;;  %v249_v19 = vmax.f32 %v217_v42, 0.0  ;;  %v4513_v11 = vcvt.f32.s32 %v286_v54  ;;  %v4515_v29 = vcvt.f32.s32 %v285_v21 }
  0x3e   : > { %7489 = vst [vmem:[#allocation32_spill] sm:$0xff] %v7488_v20  ;;  %v4511_v25 = vmul.f32 %v4494_v5, %v666_v10  ;;  %v3838_v34 = vadd.f32 -1.0, %v285_v21  ;;  %v382_v42 = vsub.f32 %v4407_v14, %v3839_v53  ;;  %v225_v35 = vfloor.f32 %v193_v16  ;;  %v4538_v14 = vld [vmem:[%s4233_s14 + $0x78] sm:$0xff] }
  0x3f   : > { %7491 = vst [vmem:[#allocation34_spill] sm:$0xff] %v4513_v11  ;;  %v4519_v45 = vadd.f32 -1.0, %v4507_v47  ;;  %v4522_v55 = vadd.f32 1.0, %v4507_v47  ;;  %v281_v30 = vmin.f32 %v249_v19, 1.0  ;;  %v4541_v16 = vld [vmem:[%s4233_s14 + $0x58] sm:$0xff]  ;;  %v192_v44 = vadd.f32 1.0, %v4538_v14 }
  0x40   : > { %7490 = vst [vmem:[#allocation33_spill] sm:$0xff] %v4511_v25  ;;  %966 = vrot.lane.b32.xlu1 %v892_v48, %s4192_s15  ;;  %v891_v54 = vsel %vm4498_vm8, %v4511_v25, 0.0  ;;  %v381_v10 = vsub.f32 %v4426_v41, %v3838_v34  ;;  %v7493_v48 = vmul.u32 2, %v4483_v38  ;;  %v414_v28 = vmul.f32 2.0, %v382_v42 }
  0x41   : > { %7492 = vst [vmem:[#allocation35_spill] sm:$0xff] %v4515_v29  ;;  %964 = vrot.lane.b32.xlu0 %v891_v54, %s4192_s15  ;;  %v662_v21 = vmul.f32 -1.0, %v4519_v45  ;;  %v3834_v19 = vadd.f32 -1.0, %v281_v30  ;;  %v257_v20 = vmax.f32 %v225_v35, 0.0  ;;  %v188_v53 = vadd.f32 1.0, %v4541_v16 }
  0x42   : > { %vm4533_vm9 = vcmp.eq.s32.totalorder %v7493_v48, 0  ;;  %v413_v25 = vmul.f32 2.0, %v381_v10  ;;  %v4548_v54 = vadd.f32 -1.0, %v414_v28  ;;  %v4550_v48 = vcvt.f32.s32 %v281_v30 }
  0x43   : > { %v4546_v34 = vmul.f32 %v4522_v55, %v662_v21  ;;  %v377_v42 = vsub.f32 %v4453_v27, %v3834_v19  ;;  %v289_v30 = vmin.f32 %v257_v20, 1.0  ;;  %v7503_v41 = vmul.u32 2, %v4513_v11 }
  0x44   : > { %7497 = vst [vmem:[#allocation37_spill] sm:$0xff] %v4548_v54  ;;  %v4552_v61 = vadd.f32 -1.0, %v413_v25  ;;  %v4561_v21 = vadd.f32 -1.0, %v4548_v54  ;;  %v4564_v28 = vadd.f32 1.0, %v4548_v54  ;;  %v7507_v20 = vmul.u32 2, %v4515_v29 }
  0x45   : > { %7496 = vst [vmem:[#allocation36_spill] sm:$0xff] %v4546_v34  ;;  %v887_v10 = vsel %vm4533_vm9, %v4546_v34, 0.0  ;;  %v409_v35 = vmul.f32 2.0, %v377_v42  ;;  %vm4576_vm10 = vcmp.eq.s32.totalorder %v7503_v41, 0  ;;  %v7504_v34 = vmov 0 }
  0x46   : > { %7498 = vst [vmem:[#allocation38_spill] sm:$0xff] %v4552_v61  ;;  %956 = vrot.lane.b32.xlu2 %v887_v10, %s4192_s15  ;;  %v4568_v25 = vadd.f32 -1.0, %v4552_v61  ;;  %v4571_v27 = vadd.f32 1.0, %v4552_v61  ;;  %v670_v19 = vmul.f32 -1.0, %v4561_v21  ;;  %v7505_v34 = vsel %vm4576_vm10, 4294967295, %v7504_v34 }
  0x47   : > { %7499 = vst [vmem:[#allocation39_spill] sm:$0xff] %v4561_v21  ;;  %vm4582_vm11 = vcmp.eq.s32.totalorder %v7507_v20, 0  ;;  %v7508_v10 = vmov 0  ;;  %v3842_v54 = vadd.f32 -1.0, %v289_v30  ;;  %v4587_v42 = vadd.f32 -1.0, %v409_v35 }
  0x48   : > { %7500 = vst [vmem:[#allocation40_spill] sm:$0xff] %v4564_v28  ;;  %v7509_v10 = vsel %vm4582_vm11, 4294967295, %v7508_v10  ;;  %v669_v61 = vmul.f32 -1.0, %v4568_v25  ;;  %v224_v11 = vfloor.f32 %v192_v44  ;;  %v4591_v41 = vmul.f32 %v4564_v28, %v670_v19  ;;  %v4606_v44 = vld [vmem:[%s4233_s14 + $0x98] sm:$0xff] }
  0x49   : > { %7501 = vst [vmem:[#allocation41_spill] sm:$0xff] %v4568_v25  ;;  %v4593_v24 = vcvt.f32.s32 %v289_v30  ;;  %v385_v20 = vsub.f32 %v4487_v57, %v3842_v54  ;;  %v220_v29 = vfloor.f32 %v188_v53  ;;  %v4600_v25 = vadd.f32 -1.0, %v4587_v42  ;;  %v4612_v57 = vld [vmem:[%s4233_s14 + $0x90] sm:$0xff] }
  0x4a   : > { %7502 = vst [vmem:[#allocation42_spill] sm:$0xff] %v4571_v27  ;;  %v4597_v26 = vmul.f32 %v4571_v27, %v669_v61  ;;  %v4603_v35 = vadd.f32 1.0, %v4587_v42  ;;  %v256_v21 = vmax.f32 %v224_v11, 0.0  ;;  %v895_v30 = vsel %vm4576_vm10, %v4591_v41, 0.0  ;;  %v4620_v11 = vld [vmem:[%s4233_s14 + $0x70] sm:$0xff] }
  0x4b   : > { %7506 = vst [vmem:[#allocation43_spill] sm:$0xff] %v7505_v34  ;;  %v417_v19 = vmul.f32 2.0, %v385_v20  ;;  %v252_v28 = vmax.f32 %v220_v29, 0.0  ;;  %972 = vrot.lane.b32.xlu1 %v895_v30, %s4192_s15  ;;  %v665_v53 = vmul.f32 -1.0, %v4600_v25  ;;  %v7514_v27 = vmul.u32 2, %v4550_v48 }
  0x4c   : > { %7510 = vst [vmem:[#allocation44_spill] sm:$0xff] %v7509_v10  ;;  %v894_v61 = vsel %vm4582_vm11, %v4597_v26, 0.0  ;;  %v288_v54 = vmin.f32 %v256_v21, 1.0  ;;  %v195_v34 = vadd.f32 1.0, %v4612_v57  ;;  %v7523_v9 = vmul.u32 2, %v4593_v24 }
  0x4d   : > { %7511 = vst [vmem:[#allocation45_spill] sm:$0xff] %v4591_v41  ;;  %970 = vrot.lane.b32.xlu0 %v894_v61, %s4192_s15  ;;  %vm4625_vm12 = vcmp.eq.s32.totalorder %v7514_v27, 0  ;;  %v4629_v29 = vadd.f32 -1.0, %v417_v19  ;;  %v284_v30 = vmin.f32 %v252_v28, 1.0  ;;  %v196_v41 = vadd.f32 1.0, %v4606_v44 }
  0x4e   : > { %7512 = vst [vmem:[#allocation46_spill] sm:$0xff] %v4593_v24  ;;  %v3841_v10 = vadd.f32 -1.0, %v288_v54  ;;  %v191_v19 = vadd.f32 1.0, %v4620_v11  ;;  %vm4657_vm13 = vcmp.eq.s32.totalorder %v7523_v9, 0  ;;  %v7524_v8 = vmov 0 }
  0x4f   : > { %7513 = vst [vmem:[#allocation47_spill] sm:$0xff] %v4597_v26  ;;  %v4633_v26 = vmul.f32 %v4603_v35, %v665_v53  ;;  %v4638_v61 = vadd.f32 -1.0, %v4629_v29  ;;  %v4641_v27 = vadd.f32 1.0, %v4629_v29  ;;  %v3837_v5 = vadd.f32 -1.0, %v284_v30 }
  0x50   : > { %7517 = vst [vmem:[#allocation48_spill] sm:$0xff] %v4629_v29  ;;  %v4647_v53 = vcvt.f32.s32 %v288_v54  ;;  %v384_v21 = vsub.f32 %v4538_v14, %v3841_v10  ;;  %v228_v1 = vfloor.f32 %v196_v41  ;;  %v4652_v46 = vcvt.f32.s32 %v284_v30 }
  0x51   : > { %7518 = vst [vmem:[#allocation49_spill] sm:$0xff] %v4633_v26  ;;  %v890_v28 = vsel %vm4625_vm12, %v4633_v26, 0.0  ;;  %v673_v15 = vmul.f32 -1.0, %v4638_v61  ;;  %v380_v29 = vsub.f32 %v4541_v16, %v3837_v5  ;;  %v7525_v8 = vsel %vm4657_vm13, 4294967295, %v7524_v8 }
  0x52   : > { %7519 = vst [vmem:[#allocation50_spill] sm:$0xff] %v4638_v61  ;;  %962 = vrot.lane.b32.xlu2 %v890_v28, %s4192_s15  ;;  %v416_v54 = vmul.f32 2.0, %v384_v21  ;;  %v260_v26 = vmax.f32 %v228_v1, 0.0  ;;  %v227_v43 = vfloor.f32 %v195_v34  ;;  %v223_v41 = vfloor.f32 %v191_v19  ;;  %v4692_v1 = vld [vmem:[%s4233_s14 + $0xa8] sm:$0xff] }
  0x53   : > { %7520 = vst [vmem:[#allocation51_spill] sm:$0xff] %v4641_v27  ;;  %v4662_v14 = vmul.f32 %v4641_v27, %v673_v15  ;;  %v412_v10 = vmul.f32 2.0, %v380_v29  ;;  %v4674_v15 = vld [vmem:[%s4233_s14 + $0xb0] sm:$0xff] }
  0x54   : > { %7521 = vst [vmem:[#allocation52_spill] sm:$0xff] %v4647_v53  ;;  %v4664_v28 = vadd.f32 -1.0, %v416_v54  ;;  %v292_v5 = vmin.f32 %v260_v26, 1.0  ;;  %v259_v16 = vmax.f32 %v227_v43, 0.0  ;;  %v255_v34 = vmax.f32 %v223_v41, 0.0 }
  0x55   : > { %7522 = vst [vmem:[#allocation53_spill] sm:$0xff] %v4652_v46  ;;  %v898_v9 = vsel %vm4657_vm13, %v4662_v14, 0.0  ;;  %v4670_v24 = vadd.f32 -1.0, %v412_v10 }
  0x56   : > { %7526 = vst [vmem:[#allocation54_spill] sm:$0xff] %v7525_v8  ;;  %978 = vrot.lane.b32.xlu1 %v898_v9, %s4192_s15  ;;  %v4678_v29 = vadd.f32 -1.0, %v4664_v28  ;;  %v4681_v26 = vadd.f32 1.0, %v4664_v28  ;;  %v4683_v43 = vcvt.f32.s32 %v292_v5  ;;  %v3845_v21 = vadd.f32 -1.0, %v292_v5 }
  0x57   : > { %7527 = vst [vmem:[#allocation55_spill] sm:$0xff] %v4662_v14  ;;  %v4686_v19 = vadd.f32 -1.0, %v4670_v24  ;;  %v4689_v54 = vadd.f32 1.0, %v4670_v24  ;;  %v291_v10 = vmin.f32 %v259_v16, 1.0  ;;  %v287_v41 = vmin.f32 %v255_v34, 1.0 }
  0x58   : > { %7528 = vst [vmem:[#allocation56_spill] sm:$0xff] %v4664_v28  ;;  %v672_v9 = vmul.f32 -1.0, %v4678_v29  ;;  %v388_v30 = vsub.f32 %v4606_v44, %v3845_v21  ;;  %v199_v14 = vadd.f32 1.0, %v4674_v15  ;;  %v7532_v28 = vmul.u32 2, %v4647_v53  ;;  %v4729_v53 = vld [vmem:[%s4233_s14 + $0x88] sm:$0xff] }
  0x59   : > { %7529 = vst [vmem:[#allocation57_spill] sm:$0xff] %v4678_v29  ;;  %v7533_v5 = vmov 0  ;;  %v668_v8 = vmul.f32 -1.0, %v4686_v19  ;;  %v7536_v16 = vmul.u32 2, %v4652_v46  ;;  %v7537_v34 = vmov 0 }
  0x5a   : > { %7530 = vst [vmem:[#allocation58_spill] sm:$0xff] %v4681_v26  ;;  %vm4699_vm14 = vcmp.eq.s32.totalorder %v7532_v28, 0  ;;  %v3844_v29 = vadd.f32 -1.0, %v291_v10  ;;  %v4711_v44 = vmul.f32 %v4681_v26, %v672_v9  ;;  %v420_v21 = vmul.f32 2.0, %v388_v30 }
  0x5b   : > { %7531 = vst [vmem:[#allocation59_spill] sm:$0xff] %v4683_v43  ;;  %v7534_v5 = vsel %vm4699_vm14, 4294967295, %v7533_v5  ;;  %vm4706_vm15 = vcmp.eq.s32.totalorder %v7536_v16, 0  ;;  %v198_v28 = vadd.f32 1.0, %v4692_v1  ;;  %v4716_v61 = vmul.f32 %v4689_v54, %v668_v8 }
  0x5c   : > { %7535 = vst [vmem:[#allocation60_spill] sm:$0xff] %v7534_v5  ;;  %v7538_v34 = vsel %vm4706_vm15, 4294967295, %v7537_v34  ;;  %v4718_v27 = vcvt.f32.s32 %v291_v10  ;;  %v387_v46 = vsub.f32 %v4612_v57, %v3844_v29  ;;  %v3840_v16 = vadd.f32 -1.0, %v287_v41 }
  0x5d   : > { %7539 = vst [vmem:[#allocation61_spill] sm:$0xff] %v7538_v34  ;;  %v897_v7 = vsel %vm4699_vm14, %v4711_v44, 0.0  ;;  %v4724_v63 = vadd.f32 -1.0, %v420_v21  ;;  %v4726_v9 = vcvt.f32.s32 %v287_v41  ;;  %v231_v30 = vfloor.f32 %v199_v14 }
  0x5e   : > { %7540 = vst [vmem:[#allocation62_spill] sm:$0xff] %v4711_v44  ;;  %976 = vrot.lane.b32.xlu0 %v897_v7, %s4192_s15  ;;  %v893_v8 = vsel %vm4706_vm15, %v4716_v61, 0.0  ;;  %v419_v57 = vmul.f32 2.0, %v387_v46  ;;  %v383_v29 = vsub.f32 %v4620_v11, %v3840_v16  ;;  %v7547_v14 = vmul.u32 2, %v4683_v43 }
  0x5f   : > { %7541 = vst [vmem:[#allocation63_spill] sm:$0xff] %v4716_v61  ;;  %968 = vrot.lane.b32.xlu2 %v893_v8, %s4192_s15  ;;  %v4738_v10 = vadd.f32 -1.0, %v4724_v63  ;;  %v4741_v41 = vadd.f32 1.0, %v4724_v63  ;;  %v7548_v7 = vmov 0  ;;  %v263_v21 = vmax.f32 %v231_v30, 0.0 }
  0x60   : > { %7542 = vst [vmem:[#allocation64_spill] sm:$0xff] %v4718_v27  ;;  %vm4745_vm14 = vcmp.eq.s32.totalorder %v7547_v14, 0  ;;  %v4749_v44 = vadd.f32 -1.0, %v419_v57  ;;  %v415_v46 = vmul.f32 2.0, %v383_v29  ;;  %v230_v61 = vfloor.f32 %v198_v28 }
  0x61   : > { %7543 = vst [vmem:[#allocation65_spill] sm:$0xff] %v4724_v63  ;;  %v7549_v7 = vsel %vm4745_vm14, 4294967295, %v7548_v7  ;;  %v194_v11 = vadd.f32 1.0, %v4729_v53  ;;  %v676_v16 = vmul.f32 -1.0, %v4738_v10  ;;  %v295_v26 = vmin.f32 %v263_v21, 1.0  ;;  %v4756_v63 = vld [vmem:[%s4233_s14 + $0xc8] sm:$0xff] }
  0x62   : > { %7544 = vst [vmem:[#allocation66_spill] sm:$0xff] %v4726_v9  ;;  %v4759_v14 = vadd.f32 -1.0, %v4749_v44  ;;  %v4762_v30 = vadd.f32 1.0, %v4749_v44  ;;  %v4764_v57 = vadd.f32 -1.0, %v415_v46  ;;  %v262_v28 = vmax.f32 %v230_v61, 0.0 }
  0x63   : > { %7545 = vst [vmem:[#allocation67_spill] sm:$0xff] %v4738_v10  ;;  %v4767_v29 = vmul.f32 %v4741_v41, %v676_v16  ;;  %v4769_v43 = vcvt.f32.s32 %v295_v26  ;;  %v3848_v8 = vadd.f32 -1.0, %v295_v26  ;;  %v226_v5 = vfloor.f32 %v194_v11 }
  0x64   : > { %7546 = vst [vmem:[#allocation68_spill] sm:$0xff] %v4741_v41  ;;  %v675_v21 = vmul.f32 -1.0, %v4759_v14  ;;  %v4773_v10 = vadd.f32 -1.0, %v4764_v57  ;;  %v4776_v34 = vadd.f32 1.0, %v4764_v57  ;;  %v202_v46 = vadd.f32 1.0, %v4756_v63 }
  0x65   : > { %7550 = vst [vmem:[#allocation69_spill] sm:$0xff] %v7549_v7  ;;  %v901_v61 = vsel %vm4745_vm14, %v4767_v29, 0.0  ;;  %v7558_v16 = vmul.u32 2, %v4718_v27  ;;  %v391_v26 = vsub.f32 %v4674_v15, %v3848_v8  ;;  %v294_v11 = vmin.f32 %v262_v28, 1.0 }
  0x66   : > { %7551 = vst [vmem:[#allocation70_spill] sm:$0xff] %v4749_v44  ;;  %v7559_v44 = vmov 0  ;;  %984 = vrot.lane.b32.xlu1 %v901_v61, %s4192_s15  ;;  %v671_v41 = vmul.f32 -1.0, %v4773_v10  ;;  %v234_v61 = vfloor.f32 %v202_v46  ;;  %v7572_v46 = vmul.u32 2, %v4769_v43 }
  0x67   : > { %7552 = vst [vmem:[#allocation71_spill] sm:$0xff] %v4759_v14  ;;  %vm4784_vm11 = vcmp.eq.s32.totalorder %v7558_v16, 0  ;;  %v4791_v14 = vmul.f32 %v4762_v30, %v675_v21  ;;  %v7564_v16 = vmov 0  ;;  %v423_v27 = vmul.f32 2.0, %v391_v26 }
  0x68   : > { %7553 = vst [vmem:[#allocation72_spill] sm:$0xff] %v4762_v30  ;;  %v7560_v44 = vsel %vm4784_vm11, 4294967295, %v7559_v44  ;;  %v3847_v8 = vadd.f32 -1.0, %v294_v11  ;;  %v4808_v21 = vmul.f32 %v4776_v34, %v671_v41  ;;  %v201_v26 = vadd.f32 1.0, %v4795_v56  ;;  %v4821_v41 = vld [vmem:[%s4233_s14 + $0xa0] sm:$0xff] }
  0x69   : > { %7554 = vst [vmem:[#allocation73_spill] sm:$0xff] %v4764_v57  ;;  %v258_v57 = vmax.f32 %v226_v5, 0.0  ;;  %v900_v28 = vsel %vm4784_vm11, %v4791_v14, 0.0  ;;  %v4818_v7 = vcvt.f32.s32 %v294_v11  ;;  %vm4832_vm11 = vcmp.eq.s32.totalorder %v7572_v46, 0 }
  0x6a   : > { %7555 = vst [vmem:[#allocation74_spill] sm:$0xff] %v4767_v29  ;;  %v7563_v29 = vmul.u32 2, %v4726_v9  ;;  %982 = vrot.lane.b32.xlu0 %v900_v28, %s4192_s15  ;;  %v390_v30 = vsub.f32 %v4692_v1, %v3847_v8  ;;  %v7573_v8 = vmov 0 }
  0x6b   : > { %7556 = vst [vmem:[#allocation75_spill] sm:$0xff] %v4769_v43  ;;  %v290_v5 = vmin.f32 %v258_v57, 1.0  ;;  %v7574_v8 = vsel %vm4832_vm11, 4294967295, %v7573_v8 }
  0x6c   : > { %7557 = vst [vmem:[#allocation76_spill] sm:$0xff] %v4773_v10  ;;  %vm4799_vm14 = vcmp.eq.s32.totalorder %v7563_v29, 0  ;;  %v4811_v29 = vadd.f32 -1.0, %v423_v27  ;;  %v422_v1 = vmul.f32 2.0, %v390_v30 }
  0x6d   : > { %7561 = vst [vmem:[#allocation77_spill] sm:$0xff] %v7560_v44  ;;  %v7565_v16 = vsel %vm4799_vm14, 4294967295, %v7564_v16  ;;  %v896_v15 = vsel %vm4799_vm14, %v4808_v21, 0.0  ;;  %v266_v44 = vmax.f32 %v234_v61, 0.0  ;;  %v233_v61 = vfloor.f32 %v201_v26 }
  0x6e   : > { %7562 = vst [vmem:[#allocation78_spill] sm:$0xff] %v4791_v14  ;;  %v3843_v14 = vadd.f32 -1.0, %v290_v5  ;;  %974 = vrot.lane.b32.xlu2 %v896_v15, %s4192_s15  ;;  %v4825_v57 = vadd.f32 -1.0, %v4811_v29  ;;  %v4828_v27 = vadd.f32 1.0, %v4811_v29  ;;  %v4838_v15 = vadd.f32 -1.0, %v422_v1 }
  0x6f   : > { %7566 = vst [vmem:[#allocation79_spill] sm:$0xff] %v7565_v16  ;;  %v298_v28 = vmin.f32 %v266_v44, 1.0  ;;  %v4840_v16 = vcvt.f32.s32 %v290_v5 }
  0x70   : > { %7567 = vst [vmem:[#allocation80_spill] sm:$0xff] %v4808_v21  ;;  %v386_v11 = vsub.f32 %v4729_v53, %v3843_v14  ;;  %v679_v21 = vmul.f32 -1.0, %v4825_v57  ;;  %v4850_v53 = vadd.f32 -1.0, %v4838_v15  ;;  %v4853_v44 = vadd.f32 1.0, %v4838_v15 }
  0x71   : > { %7568 = vst [vmem:[#allocation81_spill] sm:$0xff] %v4811_v29  ;;  %v197_v29 = vadd.f32 1.0, %v4821_v41  ;;  %v4844_v46 = vcvt.f32.s32 %v298_v28  ;;  %v3851_v9 = vadd.f32 -1.0, %v298_v28  ;;  %v265_v14 = vmax.f32 %v233_v61, 0.0 }
  0x72   : > { %7569 = vst [vmem:[#allocation82_spill] sm:$0xff] %v4818_v7  ;;  %v418_v43 = vmul.f32 2.0, %v386_v11  ;;  %v4847_v10 = vmul.f32 %v4828_v27, %v679_v21  ;;  %v678_v28 = vmul.f32 -1.0, %v4850_v53 }
  0x73   : > { %7570 = vst [vmem:[#allocation83_spill] sm:$0xff] %v4825_v57  ;;  %v394_v26 = vsub.f32 %v4756_v63, %v3851_v9  ;;  %v229_v1 = vfloor.f32 %v197_v29  ;;  %v297_v30 = vmin.f32 %v265_v14, 1.0  ;;  %v173_v57 = vld [vmem:[%s4233_s14 + $0xe0] sm:$0xff]  ;;  %v7593_v14 = vmov 0 }
  0x74   : > { %7571 = vst [vmem:[#allocation84_spill] sm:$0xff] %v4828_v27  ;;  %v4855_v5 = vadd.f32 -1.0, %v418_v43  ;;  %v904_v11 = vsel %vm4832_vm11, %v4847_v10, 0.0  ;;  %v7584_v43 = vmov 0  ;;  %v4878_v61 = vmul.f32 %v4853_v44, %v678_v28 }
  0x75   : > { %7575 = vst [vmem:[#allocation85_spill] sm:$0xff] %v7574_v8  ;;  %990 = vrot.lane.b32.xlu1 %v904_v11, %s4192_s15  ;;  %v426_v29 = vmul.f32 2.0, %v394_v26  ;;  %v3850_v11 = vadd.f32 -1.0, %v297_v30  ;;  %v261_v21 = vmax.f32 %v229_v1, 0.0  ;;  %v7592_v28 = vmul.u32 2, %v4840_v16  ;;  %v4907_v8 = vld [vmem:[%s4233_s14 + $0xd8] sm:$0xff] }
  0x76   : > { %7576 = vst [vmem:[#allocation86_spill] sm:$0xff] %v4838_v15  ;;  %v7583_v15 = vmul.u32 2, %v4818_v7  ;;  %v4872_v63 = vadd.f32 -1.0, %v4855_v5  ;;  %v4875_v9 = vadd.f32 1.0, %v4855_v5  ;;  %v4884_v7 = vcvt.f32.s32 %v297_v30 }
  0x77   : > { %7577 = vst [vmem:[#allocation87_spill] sm:$0xff] %v4840_v16  ;;  %vm4891_vm11 = vcmp.eq.s32.totalorder %v7592_v28, 0  ;;  %v393_v1 = vsub.f32 %v4795_v56, %v3850_v11  ;;  %v7599_v28 = vmul.u32 2, %v4844_v46  ;;  %v7600_v27 = vmov 0  ;;  %v4916_v11 = vld [vmem:[%s4233_s14 + $0xb8] sm:$0xff] }
  0x78   : > { %7578 = vst [vmem:[#allocation88_spill] sm:$0xff] %v4844_v46  ;;  %vm4867_vm13 = vcmp.eq.s32.totalorder %v7583_v15, 0  ;;  %v674_v15 = vmul.f32 -1.0, %v4872_v63  ;;  %v7594_v14 = vsel %vm4891_vm11, 4294967295, %v7593_v14 }
  0x79   : > { %7579 = vst [vmem:[#allocation89_spill] sm:$0xff] %v4847_v10  ;;  %v7585_v43 = vsel %vm4867_vm13, 4294967295, %v7584_v43  ;;  %v4882_v10 = vadd.f32 -1.0, %v426_v29  ;;  %v903_v26 = vsel %vm4867_vm13, %v4878_v61, 0.0  ;;  %vm4911_vm13 = vcmp.eq.s32.totalorder %v7599_v28, 0 }
  0x7a   : > { %7580 = vst [vmem:[#allocation90_spill] sm:$0xff] %v4850_v53  ;;  %v205_v53 = vadd.f32 1.0, %v173_v57  ;;  %988 = vrot.lane.b32.xlu0 %v903_v26, %s4192_s15  ;;  %v4898_v30 = vmul.f32 %v4875_v9, %v674_v15  ;;  %v7601_v27 = vsel %vm4911_vm13, 4294967295, %v7600_v27  ;;  %v425_v56 = vmul.f32 2.0, %v393_v1  ;;  %v4919_v15 = vld [vmem:[%s4233_s14 + $0xf8] sm:$0xff] }
  0x7b   : > { %7581 = vst [vmem:[#allocation91_spill] sm:$0xff] %v4853_v44  ;;  %v293_v44 = vmin.f32 %v261_v21, 1.0  ;;  %v4901_v29 = vadd.f32 -1.0, %v4882_v10 }
  0x7c   : > { %7582 = vst [vmem:[#allocation92_spill] sm:$0xff] %v4855_v5  ;;  %v899_v26 = vsel %vm4891_vm11, %v4898_v30, 0.0  ;;  %v4927_v28 = vadd.f32 -1.0, %v425_v56 }
  0x7d   : > { %7586 = vst [vmem:[#allocation93_spill] sm:$0xff] %v7585_v43  ;;  %v4904_v43 = vadd.f32 1.0, %v4882_v10  ;;  %v3846_v21 = vadd.f32 -1.0, %v293_v44  ;;  %980 = vrot.lane.b32.xlu2 %v899_v26, %s4192_s15  ;;  %v4929_v46 = vcvt.f32.s32 %v293_v44 }
  0x7e   : > { %7587 = vst [vmem:[#allocation94_spill] sm:$0xff] %v4872_v63  ;;  %v204_v63 = vadd.f32 1.0, %v4907_v8  ;;  %v4942_v56 = vadd.f32 1.0, %v4927_v28 }
  0x7f   : > { %7588 = vst [vmem:[#allocation95_spill] sm:$0xff] %v4875_v9  ;;  %v389_v1 = vsub.f32 %v4821_v41, %v3846_v21  ;;  %v7608_v21 = vmov 0 }
  0x80   : > { %7589 = vst [vmem:[#allocation96_spill] sm:$0xff] %v4878_v61  ;;  %v237_v61 = vfloor.f32 %v205_v53  ;;  %v682_v53 = vmul.f32 -1.0, %v4901_v29  ;;  %v236_v26 = vfloor.f32 %v204_v63 }
  0x81   : > { %7590 = vst [vmem:[#allocation97_spill] sm:$0xff] %v4882_v10  ;;  %v7285_v10 = vmul.u32 2, %v4884_v7  ;;  %v421_v44 = vmul.f32 2.0, %v389_v1 }
  0x82   : > { %7591 = vst [vmem:[#allocation98_spill] sm:$0xff] %v4884_v7  ;;  %v269_v16 = vmax.f32 %v237_v61, 0.0  ;;  %v4934_v5 = vmul.f32 %v4904_v43, %v682_v53  ;;  %v4939_v61 = vadd.f32 -1.0, %v4927_v28  ;;  %v268_v7 = vmax.f32 %v236_v26, 0.0 }
  0x83   : > { %7595 = vst [vmem:[#allocation99_spill] sm:$0xff] %v7594_v14  ;;  %vm4949_vm8 = vcmp.eq.s32.totalorder %v7285_v10, 0  ;;  %v7614_v26 = vmov 0 }
  0x84   : > { %7596 = vst [vmem:[#allocation100_spill] sm:$0xff] %v4898_v30  ;;  %v301_v14 = vmin.f32 %v269_v16, 1.0  ;;  %v200_v30 = vadd.f32 1.0, %v4916_v11  ;;  %v907_v41 = vsel %vm4911_vm13, %v4934_v5, 0.0  ;;  %v7609_v21 = vsel %vm4949_vm8, 4294967295, %v7608_v21 }
  0x85   : > { %7597 = vst [vmem:[#allocation101_spill] sm:$0xff] %v4901_v29  ;;  %v208_v29 = vadd.f32 1.0, %v4919_v15  ;;  %996 = vrot.lane.b32.xlu1 %v907_v41, %s4192_s15  ;;  %v681_v53 = vmul.f32 -1.0, %v4939_v61  ;;  %v300_v17 = vmin.f32 %v268_v7, 1.0 }
  0x86   : > { %7598 = vst [vmem:[#allocation102_spill] sm:$0xff] %v4904_v43  ;;  %v3854_v16 = vadd.f32 -1.0, %v301_v14  ;;  %v4955_v43 = vadd.f32 -1.0, %v421_v44 }
  0x87   : > { %7602 = vst [vmem:[#allocation103_spill] sm:$0xff] %v7601_v27  ;;  %v4958_v27 = vcvt.f32.s32 %v301_v14  ;;  %v240_v10 = vfloor.f32 %v208_v29  ;;  %v4961_v9 = vmul.f32 %v4942_v56, %v681_v53  ;;  %v4974_v29 = vld [vmem:[%s4233_s14 + $0xf0] sm:$0xff]  ;;  %v4989_v53 = vcvt.f32.s32 %v300_v17 }
  0x88   : > { %7603 = vst [vmem:[#allocation104_spill] sm:$0xff] %v4927_v28  ;;  %v232_v28 = vfloor.f32 %v200_v30  ;;  %v4964_v63 = vadd.f32 -1.0, %v4955_v43  ;;  %v4967_v41 = vadd.f32 1.0, %v4955_v43 }
  0x89   : > { %7604 = vst [vmem:[#allocation105_spill] sm:$0xff] %v4929_v46  ;;  %v272_v1 = vmax.f32 %v240_v10, 0.0  ;;  %v906_v14 = vsel %vm4949_vm8, %v4961_v9, 0.0 }
  0x8a   : > { %7605 = vst [vmem:[#allocation106_spill] sm:$0xff] %v4934_v5  ;;  %v397_v5 = vsub.f32 %v173_v57, %v3854_v16  ;;  %v264_v44 = vmax.f32 %v232_v28, 0.0  ;;  %v677_v57 = vmul.f32 -1.0, %v4964_v63  ;;  %994 = vrot.lane.b32.xlu0 %v906_v14, %s4192_s15  ;;  %v7613_v16 = vmul.u32 2, %v4929_v46 }
  0x8b   : > { %7606 = vst [vmem:[#allocation107_spill] sm:$0xff] %v4939_v61  ;;  %v723_v46 = vmul.f32 0.5, %v4277_v59  ;;  %v741_v3 = vmul.f32 0.5, %v4967_v41 }
  0x8c   : > { %7607 = vst [vmem:[#allocation108_spill] sm:$0xff] %v4942_v56  ;;  %v429_v61 = vmul.f32 2.0, %v397_v5  ;;  %v296_v30 = vmin.f32 %v264_v44, 1.0  ;;  %vm4979_vm13 = vcmp.eq.s32.totalorder %v7613_v16, 0  ;;  %v3853_v5 = vadd.f32 -1.0, %v300_v17 }
  0x8d   : > { %7610 = vst [vmem:[#allocation109_spill] sm:$0xff] %v7609_v21  ;;  %v7615_v26 = vsel %vm4979_vm13, 4294967295, %v7614_v26  ;;  %v4987_v28 = vmul.f32 %v4967_v41, %v677_v57  ;;  %v5006_v21 = vld [vmem:[%s4233_s14 + $0xd0] sm:$0xff] }
  0x8e   : > { %7611 = vst [vmem:[#allocation110_spill] sm:$0xff] %v4958_v27  ;;  %v4983_v7 = vadd.f32 -1.0, %v429_v61  ;;  %v3849_v44 = vadd.f32 -1.0, %v296_v30  ;;  %v396_v56 = vsub.f32 %v4907_v8, %v3853_v5  ;;  %v207_v61 = vadd.f32 1.0, %v4974_v29 }
  0x8f   : > { %7612 = vst [vmem:[#allocation111_spill] sm:$0xff] %v4961_v9  ;;  %v304_v9 = vmin.f32 %v272_v1, 1.0  ;;  %v902_v10 = vsel %vm4979_vm13, %v4987_v28, 0.0  ;;  %v5002_v57 = vcvt.f32.s32 %v296_v30  ;;  %v563_v1 = vmul.f32 -0.5, %v4274_v58 }
  0x90   : > { %7616 = vst [vmem:[#allocation112_spill] sm:$0xff] %v7615_v26  ;;  %v4992_v14 = vadd.f32 -1.0, %v4983_v7  ;;  %v4995_v16 = vadd.f32 1.0, %v4983_v7  ;;  %v392_v17 = vsub.f32 %v4916_v11, %v3849_v44  ;;  %986 = vrot.lane.b32.xlu2 %v902_v10, %s4192_s15  ;;  %v428_v5 = vmul.f32 2.0, %v396_v56 }
  0x91   : > { %7617 = vst [vmem:[#allocation113_spill] sm:$0xff] %v4983_v7  ;;  %v7623_v7 = vmul.u32 2, %v4958_v27  ;;  %v7624_v26 = vmov 0  ;;  %v3857_v44 = vadd.f32 -1.0, %v304_v9  ;;  %v239_v59 = vfloor.f32 %v207_v61 }
  0x92   : > { %7618 = vst [vmem:[#allocation114_spill] sm:$0xff] %v4987_v28  ;;  %v685_v8 = vmul.f32 -1.0, %v4992_v14  ;;  %v424_v11 = vmul.f32 2.0, %v392_v17  ;;  %v5022_v58 = vadd.f32 -1.0, %v428_v5  ;;  %v203_v10 = vadd.f32 1.0, %v5006_v21 }
  0x93   : > { %7619 = vst [vmem:[#allocation115_spill] sm:$0xff] %v4989_v53  ;;  %vm5014_vm8 = vcmp.eq.s32.totalorder %v7623_v7, 0  ;;  %v7629_v56 = vmul.u32 2, %v4255_v39  ;;  %v7630_v27 = vmov 0  ;;  %v5034_v17 = vcvt.f32.s32 %v304_v9 }
  0x94   : > { %7620 = vst [vmem:[#allocation116_spill] sm:$0xff] %v4992_v14  ;;  %v7625_v26 = vsel %vm5014_vm8, 4294967295, %v7624_v26  ;;  %v5020_v28 = vmul.f32 %v4995_v16, %v685_v8  ;;  %v5031_v7 = vadd.f32 -1.0, %v424_v11  ;;  %v400_v8 = vsub.f32 %v4919_v15, %v3857_v44 }
  0x95   : > { %7621 = vst [vmem:[#allocation117_spill] sm:$0xff] %v4995_v16  ;;  %vm5027_vm13 = vcmp.eq.s32.totalorder %v7629_v56, 2  ;;  %v5041_v5 = vadd.f32 -1.0, %v5022_v58  ;;  %v5044_v39 = vadd.f32 1.0, %v5022_v58  ;;  %v271_v56 = vmax.f32 %v239_v59, 0.0 }
  0x96   : > { %7622 = vst [vmem:[#allocation118_spill] sm:$0xff] %v5002_v57  ;;  %v7631_v27 = vsel %vm5027_vm13, 4294967295, %v7630_v27  ;;  %v910_v61 = vsel %vm5014_vm8, %v5020_v28, 0.0  ;;  %v5048_v11 = vadd.f32 -1.0, %v5031_v7  ;;  %v5051_v9 = vadd.f32 1.0, %v5031_v7 }
  0x97   : > { %7626 = vst [vmem:[#allocation119_spill] sm:$0xff] %v7625_v26  ;;  %1002 = vrot.lane.b32.xlu1 %v910_v61, %s4192_s15  ;;  %v432_v15 = vmul.f32 2.0, %v400_v8  ;;  %v235_v44 = vfloor.f32 %v203_v10  ;;  %v684_v30 = vmul.f32 -1.0, %v5041_v5  ;;  %v7638_v26 = vmov 0 }
  0x98   : > { %7627 = vst [vmem:[#allocation120_spill] sm:$0xff] %v5020_v28  ;;  %v7637_v28 = vmul.u32 2, %v4989_v53  ;;  %v499_v59 = vmul.f32 -1.0, %v4263_v50  ;;  %v680_v61 = vmul.f32 -1.0, %v5048_v11  ;;  %v7641_v14 = vmul.u32 2, %v5002_v57 }
  0x99   : > { %7628 = vst [vmem:[#allocation121_spill] sm:$0xff] %v5022_v58  ;;  %v303_v58 = vmin.f32 %v271_v56, 1.0  ;;  %v7642_v16 = vmov 0  ;;  %v5068_v10 = vadd.f32 -1.0, %v432_v15  ;;  %v267_v8 = vmax.f32 %v235_v44, 0.0 }
  0x9a   : > { %7632 = vst [vmem:[#allocation122_spill] sm:$0xff] %v7631_v27  ;;  %vm5056_vm8 = vcmp.eq.s32.totalorder %v7637_v28, 0  ;;  %vm5064_vm11 = vcmp.eq.s32.totalorder %v7641_v14, 0  ;;  %v5071_v53 = vmul.f32 %v5044_v39, %v684_v30  ;;  %v5086_v44 = vmul.f32 -0.5, %v4280_v60 }
  0x9b   : > { %7633 = vst [vmem:[#allocation123_spill] sm:$0xff] %v5031_v7  ;;  %v7639_v26 = vsel %vm5056_vm8, 4294967295, %v7638_v26  ;;  %v7643_v16 = vsel %vm5064_vm11, 4294967295, %v7642_v16  ;;  %v3856_v56 = vadd.f32 -1.0, %v303_v58  ;;  %v5077_v7 = vmul.f32 %v5051_v9, %v680_v61 }
  0x9c   : > { %7634 = vst [vmem:[#allocation124_spill] sm:$0xff] %v5034_v17  ;;  %v5080_v57 = vadd.f32 -1.0, %v5068_v10  ;;  %v5083_v14 = vadd.f32 1.0, %v5068_v10  ;;  %v299_v15 = vmin.f32 %v267_v8, 1.0  ;;  %v909_v30 = vsel %vm5056_vm8, %v5071_v53, 0.0 }
  0x9d   : > { %7635 = vst [vmem:[#allocation125_spill] sm:$0xff] %v5041_v5  ;;  %v5074_v5 = vcvt.f32.s32 %v303_v58  ;;  %v399_v58 = vsub.f32 %v4974_v29, %v3856_v56  ;;  %v5092_v28 = vmul.f32 %v563_v1, %v499_v59  ;;  %v5095_v61 = vmul.f32 0.5, %v4283_v62  ;;  %1000 = vrot.lane.b32.xlu0 %v909_v30, %s4192_s15  ;;  %v5116_v56 = vld [vmem:[%s4233_s14 + $0xe8] sm:$0xff] }
  0x9e   : > { %7636 = vst [vmem:[#allocation126_spill] sm:$0xff] %v5044_v39  ;;  %v905_v8 = vsel %vm5064_vm11, %v5077_v7, 0.0  ;;  %v688_v60 = vmul.f32 -1.0, %v5080_v57  ;;  %v5103_v39 = vmul.f32 %v4263_v50, %v723_v46  ;;  %v7650_v29 = vmul.u32 2, %v5034_v17 }
  0x9f   : > { %7640 = vst [vmem:[#allocation127_spill] sm:$0xff] %v7639_v26  ;;  %992 = vrot.lane.b32.xlu2 %v905_v8, %s4192_s15  ;;  %v7651_v62 = vmov 0  ;;  %v431_v1 = vmul.f32 2.0, %v399_v58  ;;  %v3852_v59 = vadd.f32 -1.0, %v299_v15  ;;  %v722_v30 = vmul.f32 0.5, %v4318_v13 }
  0xa0   : > { %7644 = vst [vmem:[#allocation128_spill] sm:$0xff] %v5068_v10  ;;  %vm5111_vm8 = vcmp.eq.s32.totalorder %v7650_v29, 0  ;;  %v565_v50 = vmul.f32 -0.5, %v4433_v2  ;;  %v5121_v46 = vmul.f32 %v5083_v14, %v688_v60  ;;  %v1109_v58 = vsel %vm5027_vm13, %v5092_v28, 0.0 }
  0xa1   : > { %7645 = vst [vmem:[#allocation129_spill] sm:$0xff] %v5071_v53  ;;  %v5106_v53 = vmul.f32 0.5, %v4294_v4  ;;  %v7652_v62 = vsel %vm5111_vm8, 4294967295, %v7651_v62  ;;  %v5124_v8 = vadd.f32 -1.0, %v431_v1  ;;  %v395_v29 = vsub.f32 %v5006_v21, %v3852_v59 }
  0xa2   : > { %7646 = vst [vmem:[#allocation130_spill] sm:$0xff] %v5074_v5  ;;  %v913_v13 = vsel %vm5111_vm8, %v5121_v46, 0.0  ;;  %v1141_v2 = vsel %vm4299_vm0, %v5103_v39, 0.0  ;;  %v498_v60 = vmul.f32 -1.0, %v4288_v0  ;;  %v206_v1 = vadd.f32 1.0, %v5116_v56 }
  0xa3   : > { %7647 = vst [vmem:[#allocation131_spill] sm:$0xff] %v5077_v7  ;;  %v5126_v7 = vcvt.f32.s32 %v299_v15  ;;  %1008 = vrot.lane.b32.xlu1 %v913_v13, %s4192_s15  ;;  %v5142_v21 = vadd.f32 -1.0, %v5124_v8  ;;  %v5145_v15 = vadd.f32 1.0, %v5124_v8  ;;  %v427_v59 = vmul.f32 2.0, %v395_v29 }
  0xa4   : > { %7648 = vst [vmem:[#allocation132_spill] sm:$0xff] %v5080_v57  ;;  %v562_v4 = vmul.f32 -0.5, %v4315_v12  ;;  %v238_v27 = vfloor.f32 %v206_v1  ;;  %v725_v17 = vmul.f32 0.5, %v4436_v18  ;;  %v7658_v26 = vmul.u32 2, %v5074_v5 }
  0xa5   : > { %7649 = vst [vmem:[#allocation133_spill] sm:$0xff] %v5103_v39  ;;  %v502_v39 = vmul.f32 -1.0, %v4507_v47  ;;  %v687_v13 = vmul.f32 -1.0, %v5142_v21  ;;  %v7659_v57 = vmov 0  ;;  %v5159_v29 = vadd.f32 -1.0, %v427_v59 }
  0xa6   : > { %7653 = vst [vmem:[#allocation134_spill] sm:$0xff] %v7652_v62  ;;  %v566_v62 = vmul.f32 -0.5, %v4519_v45  ;;  %vm5155_vm13 = vcmp.eq.s32.totalorder %v7658_v26, 0  ;;  %v5163_v1 = vmul.f32 %v4288_v0, %v722_v30  ;;  %v5174_v5 = vmul.f32 %v562_v4, %v498_v60 }
  0xa7   : > { %7654 = vst [vmem:[#allocation135_spill] sm:$0xff] %v5121_v46  ;;  %v726_v46 = vmul.f32 0.5, %v4522_v55  ;;  %v7660_v57 = vsel %vm5155_vm13, 4294967295, %v7659_v57  ;;  %v1173_v55 = vadd.f32 %v1141_v2, %v1109_v58  ;;  %v5166_v45 = vmul.f32 %v5145_v15, %v687_v13 }
  0xa8   : > { %7655 = vst [vmem:[#allocation136_spill] sm:$0xff] %v5124_v8  ;;  %v270_v8 = vmax.f32 %v238_v27, 0.0  ;;  %v5169_v18 = vadd.f32 -1.0, %v5159_v29  ;;  %v5172_v26 = vadd.f32 1.0, %v5159_v29  ;;  %v7664_v59 = vmul.u32 2, %v4267_v52 }
  0xa9   : > { %7656 = vst [vmem:[#allocation137_spill] sm:$0xff] %v5142_v21  ;;  %v7665_v12 = vmov 0  ;;  %v5182_v30 = vmul.f32 %v566_v62, %v502_v39  ;;  %v5185_v27 = vmul.f32 %v4507_v47, %v726_v46  ;;  %v912_v58 = vsel %vm5155_vm13, %v5166_v45, 0.0 }
  0xaa   : > { %7657 = vst [vmem:[#allocation138_spill] sm:$0xff] %v5145_v15  ;;  %vm5178_vm8 = vcmp.eq.s32.totalorder %v7664_v59, 2  ;;  %v302_v0 = vmin.f32 %v270_v8, 1.0  ;;  %v683_v2 = vmul.f32 -1.0, %v5169_v18  ;;  %v7669_v4 = vmul.u32 2, %v4483_v38  ;;  %1006 = vrot.lane.b32.xlu0 %v912_v58, %s4192_s15  ;;  %v5209_v8 = vpop.permute.xlu1 %950 }
  0xab   : > { %7661 = vst [vmem:[#allocation139_spill] sm:$0xff] %v7660_v57  ;;  %v7666_v12 = vsel %vm5178_vm8, 4294967295, %v7665_v12  ;;  %v7670_v52 = vmov 0  ;;  %v501_v60 = vmul.f32 -1.0, %v4423_v36  ;;  %v729_v39 = vmul.f32 0.5, %v4603_v35  ;;  %1239 = vrot.lane.b32.xlu1 %v1173_v55, %s4193_s16 }
  0xac   : > { %7662 = vst [vmem:[#allocation140_spill] sm:$0xff] %v5163_v1  ;;  %vm5193_vm11 = vcmp.eq.s32.totalorder %v7669_v4, 2  ;;  %v7673_v47 = vmul.u32 2, %v5126_v7  ;;  %v7674_v62 = vmov 0  ;;  %v1140_v38 = vsel %vm4356_vm3, %v5163_v1, 0.0  ;;  %v5220_v4 = vpop.permute.xlu2 %954 }
  0xad   : > { %7663 = vst [vmem:[#allocation141_spill] sm:$0xff] %v5166_v45  ;;  %v7671_v52 = vsel %vm5193_vm11, 4294967295, %v7670_v52  ;;  %v3855_v46 = vadd.f32 -1.0, %v302_v0  ;;  %v5212_v13 = vmul.f32 %v5172_v26, %v683_v2  ;;  %v1108_v35 = vsel %vm5178_vm8, %v5174_v5, 0.0 }
  0xae   : > { %7667 = vst [vmem:[#allocation142_spill] sm:$0xff] %v7666_v12  ;;  %vm5202_vm10 = vcmp.eq.s32.totalorder %v7673_v47, 0  ;;  %v505_v59 = vmul.f32 -1.0, %v4587_v42  ;;  %v569_v58 = vmul.f32 -0.5, %v4600_v25  ;;  %v5222_v47 = vpop.permute.xlu0 %946  ;;  %v5224_v1 = vcvt.f32.s32 %v302_v0 }
  0xaf   : > { %7668 = vst [vmem:[#allocation143_spill] sm:$0xff] %v5185_v27  ;;  %v7675_v62 = vsel %vm5202_vm10, 4294967295, %v7674_v62  ;;  %v398_v2 = vsub.f32 %v5116_v56, %v3855_v46  ;;  %v1112_v55 = vsel %vm5193_vm11, %v5182_v30, 0.0  ;;  %v1144_v45 = vsel %vm4533_vm9, %v5185_v27, 0.0 }
  0xb0   : > { %7672 = vst [vmem:[#allocation144_spill] sm:$0xff] %v7671_v52  ;;  %v7677_v12 = vmul.u32 2, %v4257_v40  ;;  %v7678_v25 = vmov 0  ;;  %v7681_v15 = vmul.u32 2, %v4385_v49  ;;  %v7682_v0 = vmov 0 }
  0xb1   : > { %7676 = vst [vmem:[#allocation145_spill] sm:$0xff] %v5212_v13  ;;  %v908_v56 = vsel %vm5202_vm10, %v5212_v13, 0.0  ;;  %v5248_v46 = vmul.f32 %v565_v50, %v501_v60  ;;  %v5251_v27 = vmul.f32 %v4423_v36, %v725_v17  ;;  %v1172_v40 = vadd.f32 %v1140_v38, %v1108_v35 }
  0xb2   : > { %vm5235_vm8 = vcmp.eq.s32.totalorder %v7677_v12, 2  ;;  %vm5241_vm13 = vcmp.eq.s32.totalorder %v7681_v15, 2  ;;  %998 = vrot.lane.b32.xlu2 %v908_v56, %s4192_s15  ;;  %v430_v12 = vmul.f32 2.0, %v398_v2  ;;  %v5254_v52 = vmul.f32 %v569_v58, %v505_v59  ;;  %v5303_v56 = vpop.permute.xlu1 %952 }
  0xb3   : > { %v7679_v25 = vsel %vm5235_vm8, 4294967295, %v7678_v25  ;;  %v7683_v0 = vsel %vm5241_vm13, 4294967295, %v7682_v0  ;;  %7685 = vst [vmem:[#allocation148_spill] sm:$0xff] %v5251_v27  ;;  %v5257_v49 = vmul.f32 %v4587_v42, %v729_v39  ;;  %v728_v15 = vmul.f32 0.5, %v4364_v33  ;;  %1237 = vrot.lane.b32.xlu0 %v1172_v40, %s4193_s16 }
  0xb4   : > { %7680 = vst [vmem:[#allocation146_spill] sm:$0xff] %v7679_v25  ;;  %v731_v57 = vmul.f32 0.5, %v4444_v22  ;;  %v1176_v21 = vadd.f32 %v1144_v45, %v1112_v55  ;;  %v7687_v50 = vmul.u32 2, %v4550_v48  ;;  %v7688_v60 = vmov 0 }
  0xb5   : > { %7684 = vst [vmem:[#allocation147_spill] sm:$0xff] %v7683_v0  ;;  %v732_v36 = vmul.f32 0.5, %v4689_v54  ;;  %v5268_v17 = vadd.f32 -1.0, %v430_v12  ;;  %v7370_v38 = vmul.u32 2, %v5224_v1  ;;  %v497_v42 = vmul.f32 -1.0, %v4265_v51 }
  0xb6   : > { %7686 = vst [vmem:[#allocation149_spill] sm:$0xff] %v5257_v49  ;;  %vm5263_vm11 = vcmp.eq.s32.totalorder %v7687_v50, 2  ;;  %v1111_v33 = vsel %vm5241_vm13, %v5248_v46, 0.0  ;;  %v1143_v22 = vsel %vm4457_vm6, %v5251_v27, 0.0  ;;  %v504_v48 = vmul.f32 -1.0, %v4332_v23  ;;  %1245 = vrot.lane.b32.xlu1 %v1176_v21, %s4193_s16 }
  0xb7   : > { %v7689_v60 = vsel %vm5263_vm11, 4294967295, %v7688_v60  ;;  %v568_v45 = vmul.f32 -0.5, %v4361_v32  ;;  %v5282_v54 = vadd.f32 -1.0, %v5268_v17  ;;  %v5285_v39 = vadd.f32 1.0, %v5268_v17 }
  0xb8   : > { %7690 = vst [vmem:[#allocation150_spill] sm:$0xff] %v7689_v60  ;;  %v1115_v35 = vsel %vm5263_vm11, %v5254_v52, 0.0  ;;  %v1147_v59 = vsel %vm4625_vm12, %v5257_v49, 0.0  ;;  %v5294_v58 = vmul.f32 0.5, %v4776_v34  ;;  %v5299_v32 = vmul.f32 %v4265_v51, %v5095_v61  ;;  %v5321_v49 = vpop.permute.xlu2 %956  ;;  %v7708_v60 = vld [vmem:[#allocation53_spill] sm:$0xff] }
  0xb9   : > { %v508_v2 = vmul.f32 -1.0, %v4670_v24  ;;  %v572_v55 = vmul.f32 -0.5, %v4686_v19  ;;  %v686_v40 = vmul.f32 -1.0, %v5282_v54  ;;  %v1175_v12 = vadd.f32 %v1143_v22, %v1111_v33  ;;  %v5323_v33 = vpop.permute.xlu0 %948  ;;  %v7702_v22 = vld [vmem:[#allocation5_spill] sm:$0xff] }
  0xba   : > { %7691 = vst [vmem:[#allocation151_spill] sm:$0xff] %v5299_v32  ;;  %v593_v50 = vmul.f32 %v5086_v44, %v497_v42  ;;  %v5308_v34 = vmul.f32 %v4332_v23, %v728_v15  ;;  %vm5312_vm13 = vcmp.eq.s32.totalorder %v7370_v38, 0  ;;  %v7693_v21 = vmov 0  ;;  %v7697_v23 = vld [vmem:[#allocation10_spill] sm:$0xff]  ;;  %v7705_v38 = vld [vmem:[#allocation23_spill] sm:$0xff] }
  0xbb   : > { %v7694_v21 = vsel %vm5312_vm13, 4294967295, %v7693_v21  ;;  %v1179_v51 = vadd.f32 %v1147_v59, %v1115_v35  ;;  %v5316_v61 = vmul.f32 %v568_v45, %v504_v48  ;;  %v5319_v19 = vmul.f32 %v4670_v24, %v732_v36  ;;  %v7703_v48 = vld [vmem:[#allocation6_spill] sm:$0xff]  ;;  %1243 = vrot.lane.b32.xlu0 %v1175_v12, %s4193_s16 }
  0xbc   : > { %7692 = vst [vmem:[#allocation152_spill] sm:$0xff] %v5308_v34  ;;  %v5326_v44 = vmul.f32 %v5285_v39, %v686_v40  ;;  %v7698_v15 = vmul.u32 2, %v7697_v23  ;;  %v7699_v42 = vmov 0  ;;  %v500_v35 = vmul.f32 -1.0, %v7702_v22  ;;  %v7706_v40 = vld [vmem:[#allocation25_spill] sm:$0xff]  ;;  %v7748_v24 = vld [vmem:[#allocation94_spill] sm:$0xff] }
  0xbd   : > { %7695 = vst [vmem:[#allocation153_spill] sm:$0xff] %v5319_v19  ;;  %v564_v45 = vmul.f32 -0.5, %v7703_v48  ;;  %v1139_v36 = vsel %vm4306_vm1, %v5299_v32, 0.0  ;;  %v5339_v59 = vmul.f32 %v572_v55, %v508_v2  ;;  %v507_v27 = vmul.f32 -1.0, %v7705_v38 }
  0xbe   : > { %7696 = vst [vmem:[#allocation154_spill] sm:$0xff] %v5326_v44  ;;  %vm5330_vm11 = vcmp.eq.s32.totalorder %v7698_v15, 2  ;;  %v571_v13 = vmul.f32 -0.5, %v7706_v40  ;;  %v911_v23 = vsel %vm5312_vm13, %v5326_v44, 0.0  ;;  %v1107_v15 = vsel %vm5235_vm8, %v593_v50, 0.0  ;;  %1251 = vrot.lane.b32.xlu1 %v1179_v51, %s4193_s16 }
  0xbf   : > { %v7700_v42 = vsel %vm5330_vm11, 4294967295, %v7699_v42  ;;  %v1146_v48 = vsel %vm4397_vm4, %v5308_v34, 0.0  ;;  %v7709_v10 = vmul.u32 2, %v7708_v60  ;;  %v7710_v2 = vmov 0  ;;  %1004 = vrot.lane.b32.xlu2 %v911_v23, %s4192_s15 }
  0xc0   : > { %7701 = vst [vmem:[#allocation10_spill] sm:$0xff] %v7700_v42  ;;  %v1114_v55 = vsel %vm5330_vm11, %v5316_v61, 0.0  ;;  %v1150_v32 = vsel %vm4706_vm15, %v5319_v19, 0.0  ;;  %v5366_v44 = vmul.f32 %v7702_v22, %v5106_v53  ;;  %vm7403_vm13 = vcmask 64544   ;;  %v7715_v22 = vld [vmem:[#allocation4_spill] sm:$0xff]  ;;  %v5409_v42 = vpop.permute.xlu1 %960 }
  0xc1   : > { %vm5353_vm10 = vcmp.eq.s32.totalorder %v7709_v10, 2  ;;  %v596_v10 = vmul.f32 %v564_v45, %v500_v35  ;;  %v821_v60 = vsel %vm4457_vm6, %v5248_v46, 0.0  ;;  %v819_v23 = vsel %vm4299_vm0, %v5092_v28, 0.0 }
  0xc2   : > { %v7711_v2 = vsel %vm5353_vm10, 4294967295, %v7710_v2  ;;  %7714 = vst [vmem:[#allocation6_spill] sm:$0xff] %v5366_v44  ;;  %v1118_v53 = vsel %vm5353_vm10, %v5339_v59, 0.0  ;;  %v7716_v19 = vmul.u32 2, %v7715_v22  ;;  %v7717_v12 = vmov 0  ;;  %v7730_v22 = vld [vmem:[#allocation31_spill] sm:$0xff] }
  0xc3   : > { %7712 = vst [vmem:[#allocation5_spill] sm:$0xff] %v7711_v2  ;;  %v5385_v35 = vmul.f32 %v571_v13, %v507_v27  ;;  %v5388_v37 = vmul.f32 %v7705_v38, %v731_v57  ;;  %vm7721_vm6 = vcmask 31744   ;;  %v7723_v28 = vmul.u32 2, %v7722_v6  ;;  %v7728_v13 = vld [vmem:[#allocation76_spill] sm:$0xff]  ;;  %v7729_v57 = vld [vmem:[#allocation18_spill] sm:$0xff] }
  0xc4   : > { %vm5381_vm8 = vcmp.eq.s32.totalorder %v7716_v19, 2  ;;  %854 = vst.msk [vmem:[#allocation2 + $0x20] sm:$0xff] %vm7721_vm6, %v821_v60  ;;  %v7724_v46 = vmov 0  ;;  %v817_v51 = vsel %vm4306_vm1, %v593_v50, 0.0  ;;  %v7727_v19 = vld [vmem:[#allocation73_spill] sm:$0xff]  ;;  %v575_v45 = vmul.f32 -0.5, %v7728_v13  ;;  %vm7734_vm1 = vmmov %vm7721_vm6 }
  0xc5   : > { %v7718_v12 = vsel %vm5381_vm8, 4294967295, %v7717_v12  ;;  %7720 = vst [vmem:[#allocation23_spill] sm:$0xff] %v5388_v37  ;;  %vm5393_vm0 = vcmp.eq.s32.totalorder %v7723_v28, 2  ;;  %v511_v27 = vmul.f32 -1.0, %v7727_v19  ;;  %v727_v38 = vmul.f32 0.5, %v7729_v57  ;;  %v7731_v6 = vld [vmem:[#allocation40_spill] sm:$0xff]  ;;  %v5435_v57 = vpop.permute.xlu0 %958 }
  0xc6   : > { %7719 = vst [vmem:[#allocation7_spill] sm:$0xff] %v7718_v12  ;;  %v7725_v46 = vsel %vm5393_vm0, 4294967295, %v7724_v46  ;;  %v5405_v60 = vmul.f32 0.5, %v7730_v22  ;;  %v734_v28 = vmul.f32 0.5, %v7731_v6  ;;  %v1171_v34 = vadd.f32 %v1139_v36, %v1107_v15  ;;  %v7740_v6 = vld [vmem:[#allocation15_spill] sm:$0xff] }
  0xc7   : > { %7726 = vst [vmem:[#allocation25_spill] sm:$0xff] %v7725_v46  ;;  %v1182_v2 = vadd.f32 %v1150_v32, %v1118_v53  ;;  %v1110_v50 = vsel %vm5381_vm8, %v596_v10, 0.0  ;;  %v1142_v13 = vsel %vm4343_vm2, %v5366_v44, 0.0  ;;  %v1117_v36 = vsel %vm5393_vm0, %v5385_v35, 0.0  ;;  %v7743_v46 = vld [vmem:[#allocation39_spill] sm:$0xff] }
  0xc8   : > { %1047 = vst.msk [vmem:[#allocation2 + $0x20] sm:$0xff] %vm7403_vm13, %v5220_v4  ;;  %v1178_v4 = vadd.f32 %v1146_v48, %v1114_v55  ;;  %v5427_v32 = vmul.f32 %v7727_v19, %v5294_v58  ;;  %v7736_v48 = vld [vmem:[#allocation66_spill] sm:$0xff]  ;;  %v7738_v53 = vmov 0  ;;  %v5439_v22 = vmul.f32 %v575_v45, %v511_v27  ;;  %1235 = vrot.lane.b32.xlu2 %v1171_v34, %s4193_s16  ;;  %v7744_v27 = vld [vmem:[#allocation51_spill] sm:$0xff] }
  0xc9   : > { %852 = vst.msk [vmem:[#allocation2 + $0x10] sm:$0xff] %vm7721_vm6, %v819_v23  ;;  %v1149_v23 = vsel %vm4464_vm7, %v5388_v37, 0.0  ;;  %v7737_v55 = vmul.u32 2, %v7736_v48  ;;  %v7741_v37 = vld [vmem:[#allocation17_spill] sm:$0xff]  ;;  %v822_v58 = vsel %vm4533_vm9, %v5182_v30, 0.0  ;;  %v5448_v19 = vmul.f32 %v7740_v6, %v727_v38  ;;  %v7745_v45 = vld [vmem:[#allocation95_spill] sm:$0xff]  ;;  %1257 = vrot.lane.b32.xlu1 %v1182_v2, %s4193_s16 }
  0xca   : > { %1045 = vst.msk [vmem:[#allocation2 + $0x10] sm:$0xff] %vm7403_vm13, %v5209_v8  ;;  %v963_v8 = vpop.permute.xlu2 %962  ;;  %v567_v44 = vmul.f32 -0.5, %v7741_v37  ;;  %v7742_v48 = vld [vmem:[#allocation37_spill] sm:$0xff]  ;;  %v574_v12 = vmul.f32 -0.5, %v7743_v46  ;;  %v737_v37 = vmul.f32 0.5, %v7744_v27  ;;  %v738_v25 = vmul.f32 0.5, %v7745_v45  ;;  %1249 = vrot.lane.b32.xlu0 %v1178_v4, %s4193_s16 }
  0xcb   : > { %850 = vst.msk [vmem:[#allocation2] sm:$0xff] %vm7734_vm1, %v817_v51  ;;  %vm5431_vm6 = vcmp.eq.s32.totalorder %v7737_v55, 2  ;;  %v503_v51 = vmul.f32 -1.0, %v7740_v6  ;;  %v510_v55 = vmul.f32 -1.0, %v7742_v48  ;;  %v818_v30 = vsel %vm4356_vm3, %v5174_v5, 0.0  ;;  %v8020_v2 = vld [vmem:[#allocation133_spill] sm:$0xff] }
  0xcc   : > { %7735 = vst [vmem:[#allocation19_spill] sm:$0xff] %v5427_v32  ;;  %v7739_v53 = vsel %vm5431_vm6, 4294967295, %v7738_v53  ;;  %v1174_v34 = vadd.f32 %v1142_v13, %v1110_v50  ;;  %v1181_v46 = vadd.f32 %v1149_v23, %v1117_v36  ;;  %v578_v6 = vmul.f32 -0.5, %v7748_v24 }
  0xcd   : > { %1043 = vst.msk [vmem:[#allocation2] sm:$0xff] %vm7403_vm13, %v5222_v47  ;;  %v820_v47 = vsel %vm4343_vm2, %v596_v10, 0.0  ;;  %vm7746_vm2 = vmmov %vm7734_vm1  ;;  %v7747_v10 = vld [vmem:[#allocation92_spill] sm:$0xff]  ;;  %v1121_v41 = vsel %vm5431_vm6, %v5439_v22, 0.0  ;;  %v1153_v4 = vsel %vm4799_vm14, %v5427_v32, 0.0  ;;  %v7751_v5 = vmul.u32 2, %v7750_v31  ;;  %v965_v36 = vpop.permute.xlu0 %964 }
  0xce   : > { %855 = vst.msk [vmem:[#allocation2 + $0x28] sm:$0xff] %vm7734_vm1, %v822_v58  ;;  %v514_v38 = vmul.f32 -1.0, %v7747_v10  ;;  %v5481_v50 = vmul.f32 %v7742_v48, %v734_v28  ;;  %v599_v13 = vmul.f32 %v567_v44, %v503_v51  ;;  %v1145_v23 = vsel %vm4412_vm5, %v5448_v19, 0.0  ;;  %v7760_v44 = vld [vmem:[#allocation29_spill] sm:$0xff]  ;;  %v7761_v51 = vld [vmem:[#allocation30_spill] sm:$0xff]  ;;  %v7762_v31 = vld [vmem:[#allocation87_spill] sm:$0xff] }
  0xcf   : > { %1048 = vst.msk [vmem:[#allocation2 + $0x28] sm:$0xff] %vm7403_vm13, %v5321_v49  ;;  %vm5476_vm3 = vcmp.eq.s32.totalorder %v7751_v5, 2  ;;  %v5488_v58 = vmul.f32 %v574_v12, %v510_v55  ;;  %v7757_v45 = vmov 0  ;;  %v506_v28 = vmul.f32 -1.0, %v7760_v44  ;;  %v7845_v32 = vld [vmem:[#allocation75_spill] sm:$0xff] }
  0xd0   : > { %853 = vst.msk [vmem:[#allocation2 + $0x18] sm:$0xff] %vm7746_vm2, %v820_v47  ;;  %v7755_v47 = vld [vmem:[#allocation34_spill] sm:$0xff]  ;;  %v570_v48 = vmul.f32 -0.5, %v7761_v51  ;;  %v825_v12 = vsel %vm4625_vm12, %v5254_v52, 0.0  ;;  %v1185_v55 = vadd.f32 %v1153_v4, %v1121_v41  ;;  %v5507_v24 = vmul.f32 %v578_v6, %v514_v38  ;;  %1241 = vrot.lane.b32.xlu2 %v1174_v34, %s4193_s16  ;;  %v7768_v41 = vld [vmem:[#allocation43_spill] sm:$0xff] }
  0xd1   : > { %1046 = vst.msk [vmem:[#allocation2 + $0x18] sm:$0xff] %vm7403_vm13, %v5303_v56  ;;  %v7756_v27 = vmul.u32 2, %v7755_v47  ;;  %v5500_v56 = vmul.f32 %v7747_v10, %v738_v25  ;;  %v7763_v5 = vmul.u32 2, %v7762_v31  ;;  %v967_v10 = vpop.permute.xlu1 %966  ;;  %v7767_v47 = vld [vmem:[#allocation50_spill] sm:$0xff]  ;;  %v824_v20 = vsel %vm4397_vm4, %v5316_v61, 0.0 }
  0xd2   : > { %851 = vst.msk [vmem:[#allocation2 + $0x8] sm:$0xff] %vm7734_vm1, %v818_v30  ;;  %v7764_v30 = vmov 0  ;;  %v823_v52 = vsel %vm4412_vm5, %v599_v13, 0.0  ;;  %v517_v38 = vmul.f32 -1.0, %v4955_v43  ;;  %v1113_v6 = vsel %vm5476_vm3, %v599_v13, 0.0  ;;  %v969_v61 = vpop.permute.xlu2 %968  ;;  %1255 = vrot.lane.b32.xlu0 %v1181_v46, %s4193_s16  ;;  %v7771_v13 = vld [vmem:[#allocation99_spill] sm:$0xff]  ;;  %1263 = vrot.lane.b32.xlu1 %v1185_v55, %s4193_s16 }
  0xd3   : > { %vm5492_vm9 = vcmp.eq.s32.totalorder %v7756_v27, 2  ;;  %1044 = vst.msk [vmem:[#allocation2 + $0x8] sm:$0xff] %vm7403_vm13, %v5323_v33  ;;  %vm5511_vm2 = vcmp.eq.s32.totalorder %v7763_v5, 2  ;;  %v7766_v33 = vld [vmem:[#allocation48_spill] sm:$0xff]  ;;  %v577_v27 = vmul.f32 -0.5, %v7767_v47  ;;  %vm7769_vm12 = vnez %v7768_v41  ;;  %v7777_v55 = vld [vmem:[#allocation46_spill] sm:$0xff] }
  0xd4   : > { %v7758_v45 = vsel %vm5492_vm9, 4294967295, %v7757_v45  ;;  %7759 = vst [vmem:[#allocation53_spill] sm:$0xff] %v5500_v56  ;;  %v7765_v30 = vsel %vm5511_vm2, 4294967295, %v7764_v30  ;;  %v513_v25 = vmul.f32 -1.0, %v7766_v33  ;;  %v1152_v4 = vsel %vm7769_vm12, %v5481_v50, 0.0 }
  0xd5   : > { %858 = vst.msk [vmem:[#allocation2 + $0x40] sm:$0xff] %vm7734_vm1, %v825_v12  ;;  %v5534_v0 = vmul.f32 %v4955_v43, %v741_v3  ;;  %v1120_v34 = vsel %vm5492_vm9, %v5488_v58, 0.0  ;;  %vm7772_vm4 = vnez %v7771_v13  ;;  %v602_v12 = vmul.f32 %v570_v48, %v506_v28 }
  0xd6   : > { %1051 = vst.msk [vmem:[#allocation2 + $0x40] sm:$0xff] %vm7403_vm13, %v963_v8  ;;  %v581_v8 = vmul.f32 -0.5, %v4964_v63  ;;  %v1156_v51 = vsel %vm7772_vm4, %v5500_v56, 0.0  ;;  %v5545_v31 = vmul.f32 %v7760_v44, %v5405_v60  ;;  %v1124_v43 = vsel %vm5511_vm2, %v5507_v24, 0.0  ;;  %v7773_v63 = vld [vmem:[#allocation24_spill] sm:$0xff] }
  0xd7   : > { %857 = vst.msk [vmem:[#allocation2 + $0x38] sm:$0xff] %vm7734_vm1, %v824_v20  ;;  %v7774_v3 = vmul.u32 2, %v7773_v63  ;;  %v7775_v46 = vmov 0  ;;  %v5560_v28 = vmul.f32 %v7766_v33, %v737_v37  ;;  %v5566_v44 = vmul.f32 %v577_v27, %v513_v25  ;;  %v7784_v20 = vld [vmem:[#allocation54_spill] sm:$0xff] }
  0xd8   : > { %7770 = vst [vmem:[#allocation61_spill] sm:$0xff] %v5534_v0  ;;  %v5563_v60 = vmul.f32 %v581_v8, %v517_v38  ;;  %v1177_v48 = vadd.f32 %v1145_v23, %v1113_v6  ;;  %v7778_v5 = vmul.u32 2, %v7777_v55  ;;  %v7779_v47 = vmov 0  ;;  %v7781_v23 = vld [vmem:[#allocation32_spill] sm:$0xff]  ;;  %v7788_v6 = vld [vmem:[#allocation38_spill] sm:$0xff]  ;;  %v7789_v8 = vld [vmem:[#allocation41_spill] sm:$0xff] }
  0xd9   : > { %1050 = vst.msk [vmem:[#allocation2 + $0x38] sm:$0xff] %vm7403_vm13, %v5409_v42  ;;  %vm5555_vm5 = vcmp.eq.s32.totalorder %v7774_v3, 2  ;;  %v744_v42 = vmul.f32 0.5, %v5051_v9  ;;  %v828_v37 = vsel %vm4706_vm15, %v5339_v59, 0.0  ;;  %v827_v9 = vsel %vm4464_vm7, %v5385_v35, 0.0  ;;  %v7787_v35 = vld [vmem:[#allocation123_spill] sm:$0xff] }
  0xda   : > { %v7776_v46 = vsel %vm5555_vm5, 4294967295, %v7775_v46  ;;  %856 = vst.msk [vmem:[#allocation2 + $0x30] sm:$0xff] %vm7734_vm1, %v823_v52  ;;  %vm5572_vm9 = vcmp.eq.s32.totalorder %v7778_v5, 2  ;;  %v1184_v33 = vadd.f32 %v1152_v4, %v1120_v34  ;;  %v1188_v25 = vadd.f32 %v1156_v51, %v1124_v43  ;;  %1247 = vrot.lane.b32.xlu2 %v1177_v48, %s4193_s16 }
  0xdb   : > { %1049 = vst.msk [vmem:[#allocation2 + $0x30] sm:$0xff] %vm7403_vm13, %v5435_v57  ;;  %v7780_v47 = vsel %vm5572_vm9, 4294967295, %v7779_v47  ;;  %v1116_v57 = vsel %vm5555_vm5, %v602_v12, 0.0  ;;  %vm7782_vm1 = vnez %v7781_v23  ;;  %vm7783_vm13 = vcmask 31744   ;;  %v7800_v23 = vld [vmem:[#allocation67_spill] sm:$0xff] }
  0xdc   : > { %v1148_v27 = vsel %vm7782_vm1, %v5545_v31, 0.0  ;;  %861 = vst.msk [vmem:[#allocation2 + $0x58] sm:$0xff] %vm7783_vm13, %v828_v37  ;;  %vm7785_vm2 = vnez %v7784_v20  ;;  %vm7786_vm15 = vcmask 64544   ;;  %v826_v59 = vsel %vm7782_vm1, %v602_v12, 0.0  ;;  %vm7790_vm7 = vmmov %vm7783_vm13  ;;  %v7793_v12 = vld [vmem:[#allocation68_spill] sm:$0xff]  ;;  %v973_v37 = vpop.permute.xlu1 %972  ;;  %1261 = vrot.lane.b32.xlu0 %v1184_v33, %s4193_s16  ;;  %1269 = vrot.lane.b32.xlu1 %v1188_v25, %s4193_s16 }
  0xdd   : > { %v1155_v40 = vsel %vm7785_vm2, %v5560_v28, 0.0  ;;  %1054 = vst.msk [vmem:[#allocation2 + $0x58] sm:$0xff] %vm7786_vm15, %v969_v61  ;;  %v520_v15 = vmul.f32 -1.0, %v7787_v35  ;;  %v584_v52 = vmul.f32 -0.5, %v5048_v11  ;;  %v1123_v38 = vsel %vm5572_vm9, %v5566_v44, 0.0  ;;  %v7792_v61 = vld [vmem:[#allocation42_spill] sm:$0xff]  ;;  %vm7798_vm1 = vmmov %vm7786_vm15 }
  0xde   : > { %v509_v4 = vmul.f32 -1.0, %v7788_v6  ;;  %v573_v34 = vmul.f32 -0.5, %v7789_v8  ;;  %860 = vst.msk [vmem:[#allocation2 + $0x50] sm:$0xff] %vm7790_vm7, %v827_v9  ;;  %v5603_v51 = vmul.f32 %v7787_v35, %v744_v42  ;;  %v733_v43 = vmul.f32 0.5, %v7792_v61  ;;  %v7794_v11 = vld [vmem:[#allocation105_spill] sm:$0xff]  ;;  %vm7801_vm15 = vmmov %vm7790_vm7  ;;  %v975_v61 = vpop.permute.xlu2 %974  ;;  %v7803_v33 = vld [vmem:[#allocation112_spill] sm:$0xff] }
  0xdf   : > { %v740_v63 = vmul.f32 0.5, %v7793_v12  ;;  %v7795_v3 = vmul.u32 2, %v7794_v11  ;;  %v7796_v55 = vmov 0  ;;  %1053 = vst.msk [vmem:[#allocation2 + $0x50] sm:$0xff] %vm7798_vm1, %v967_v10  ;;  %v5615_v5 = vmul.f32 %v584_v52, %v520_v15  ;;  %v7799_v42 = vld [vmem:[#allocation65_spill] sm:$0xff]  ;;  %vm7802_vm7 = vmmov %vm7798_vm1  ;;  %v971_v12 = vpop.permute.xlu0 %970 }
  0xe0   : > { %7791 = vst [vmem:[#allocation4_spill] sm:$0xff] %v5603_v51  ;;  %v516_v9 = vmul.f32 -1.0, %v7799_v42  ;;  %v580_v35 = vmul.f32 -0.5, %v7800_v23  ;;  %v1180_v48 = vadd.f32 %v1148_v27, %v1116_v57  ;;  %v1187_v8 = vadd.f32 %v1155_v40, %v1123_v38  ;;  %v7805_v57 = vld [vmem:[#allocation35_spill] sm:$0xff] }
  0xe1   : > { %vm5610_vm13 = vcmp.eq.s32.totalorder %v7795_v3, 2  ;;  %859 = vst.msk [vmem:[#allocation2 + $0x48] sm:$0xff] %vm7801_vm15, %v826_v59  ;;  %vm7804_vm1 = vnez %v7803_v33  ;;  %v605_v52 = vmul.f32 %v573_v34, %v509_v4  ;;  %v831_v59 = vsel %vm4799_vm14, %v5439_v22, 0.0  ;;  %v7810_v22 = vld [vmem:[#allocation56_spill] sm:$0xff]  ;;  %v7811_v4 = vld [vmem:[#allocation57_spill] sm:$0xff]  ;;  %v7815_v3 = vld [vmem:[#allocation58_spill] sm:$0xff] }
  0xe2   : > { %v7797_v55 = vsel %vm5610_vm13, 4294967295, %v7796_v55  ;;  %1052 = vst.msk [vmem:[#allocation2 + $0x48] sm:$0xff] %vm7802_vm7, %v965_v36  ;;  %v1127_v10 = vsel %vm5610_vm13, %v5563_v60, 0.0  ;;  %v1159_v15 = vsel %vm7804_vm1, %v5534_v0, 0.0  ;;  %v5633_v25 = vmul.f32 %v7788_v6, %v733_v43  ;;  %v7813_v43 = vld [vmem:[#allocation44_spill] sm:$0xff]  ;;  %v7816_v23 = vld [vmem:[#allocation59_spill] sm:$0xff]  ;;  %1253 = vrot.lane.b32.xlu2 %v1180_v48, %s4193_s16 }
  0xe3   : > { %v7806_v36 = vmul.u32 2, %v7805_v57  ;;  %v5642_v40 = vmul.f32 %v7799_v42, %v740_v63  ;;  %vm7809_vm7 = vcmask 31744   ;;  %v830_v38 = vsel %vm7769_vm12, %v5488_v58, 0.0  ;;  %v7821_v58 = vld [vmem:[#allocation84_spill] sm:$0xff]  ;;  %v7829_v48 = vld [vmem:[#allocation81_spill] sm:$0xff] }
  0xe4   : > { %864 = vst.msk [vmem:[#allocation2 + $0x70] sm:$0xff] %vm7809_vm7, %v831_v59  ;;  %v5648_v49 = vmul.f32 %v580_v35, %v516_v9  ;;  %v512_v6 = vmul.f32 -1.0, %v7810_v22  ;;  %v576_v34 = vmul.f32 -0.5, %v7811_v4  ;;  %vm7812_vm14 = vcmask 64544   ;;  %v7822_v9 = vld [vmem:[#allocation118_spill] sm:$0xff]  ;;  %1267 = vrot.lane.b32.xlu0 %v1187_v8, %s4193_s16  ;;  %v7838_v0 = vld [vmem:[#allocation52_spill] sm:$0xff] }
  0xe5   : > { %vm5637_vm15 = vcmp.eq.s32.totalorder %v7806_v36, 2  ;;  %1057 = vst.msk [vmem:[#allocation2 + $0x70] sm:$0xff] %vm7812_vm14, %v975_v61  ;;  %vm7814_vm9 = vnez %v7813_v43  ;;  %v736_v63 = vmul.f32 0.5, %v7815_v3  ;;  %v1191_v42 = vadd.f32 %v1159_v15, %v1127_v10  ;;  %v7858_v33 = vld [vmem:[#allocation97_spill] sm:$0xff] }
  0xe6   : > { %v829_v11 = vsel %vm7814_vm9, %v605_v52, 0.0  ;;  %v7817_v59 = vmul.u32 2, %v7816_v23  ;;  %v7818_v57 = vmov 0  ;;  %vm7820_vm12 = vcmask 31744  }
  0xe7   : > { %863 = vst.msk [vmem:[#allocation2 + $0x68] sm:$0xff] %vm7820_vm12, %v830_v38  ;;  %v743_v41 = vmul.f32 0.5, %v7821_v58  ;;  %v7823_v35 = vmul.u32 2, %v7822_v9  ;;  %v7824_v61 = vmov 0  ;;  %v747_v10 = vmul.f32 0.5, %v5172_v26  ;;  %v7826_v38 = vld [vmem:[#allocation69_spill] sm:$0xff]  ;;  %1275 = vrot.lane.b32.xlu1 %v1191_v42, %s4193_s16 }
  0xe8   : > { %vm5658_vm7 = vcmp.eq.s32.totalorder %v7817_v59, 2  ;;  %1056 = vst.msk [vmem:[#allocation2 + $0x68] sm:$0xff] %vm7812_vm14, %v973_v37  ;;  %v1119_v15 = vsel %vm5637_vm15, %v605_v52, 0.0  ;;  %v1151_v36 = vsel %vm7814_vm9, %v5633_v25, 0.0  ;;  %vm7827_vm12 = vnez %v7826_v38  ;;  %v7830_v52 = vld [vmem:[#allocation83_spill] sm:$0xff]  ;;  %v7833_v58 = vld [vmem:[#allocation60_spill] sm:$0xff] }
  0xe9   : > { %v7819_v57 = vsel %vm5658_vm7, 4294967295, %v7818_v57  ;;  %vm5666_vm13 = vcmp.eq.s32.totalorder %v7823_v35, 2  ;;  %v1158_v4 = vsel %vm7827_vm12, %v5642_v40, 0.0  ;;  %vm7828_vm0 = vcmask 31744  }
  0xea   : > { %v7825_v61 = vsel %vm5666_vm13, 4294967295, %v7824_v61  ;;  %862 = vst.msk [vmem:[#allocation2 + $0x60] sm:$0xff] %vm7828_vm0, %v829_v11  ;;  %v1126_v26 = vsel %vm5658_vm7, %v5648_v49, 0.0  ;;  %v608_v37 = vmul.f32 %v576_v34, %v512_v6  ;;  %v519_v3 = vmul.f32 -1.0, %v7829_v48  ;;  %v979_v34 = vpop.permute.xlu1 %978 }
  0xeb   : > { %v583_v23 = vmul.f32 -0.5, %v7830_v52  ;;  %1055 = vst.msk [vmem:[#allocation2 + $0x60] sm:$0xff] %vm7812_vm14, %v971_v12  ;;  %v1130_v43 = vsel %vm5666_vm13, %v5615_v5, 0.0  ;;  %vm7831_vm0 = vnez %v7643_v16  ;;  %v5697_v11 = vmul.f32 %v7810_v22, %v736_v63  ;;  %v7835_v63 = vld [vmem:[#allocation70_spill] sm:$0xff]  ;;  %v7836_v52 = vld [vmem:[#allocation71_spill] sm:$0xff]  ;;  %v7877_v16 = vld [vmem:[#allocation93_spill] sm:$0xff] }
  0xec   : > { %v1162_v8 = vsel %vm7831_vm0, %v5603_v51, 0.0  ;;  %v834_v6 = vsel %vm7772_vm4, %v5507_v24, 0.0  ;;  %v523_v12 = vmul.f32 -1.0, %v5159_v29  ;;  %v587_v42 = vmul.f32 -0.5, %v5169_v18  ;;  %v977_v24 = vpop.permute.xlu0 %976 }
  0xed   : > { %vm7832_vm9 = vcmask 31744   ;;  %v833_v59 = vsel %vm7785_vm2, %v5566_v44, 0.0  ;;  %vm7834_vm14 = vnez %v7833_v58  ;;  %v1183_v22 = vadd.f32 %v1151_v36, %v1119_v15  ;;  %v7843_v15 = vld [vmem:[#allocation72_spill] sm:$0xff] }
  0xee   : > { %867 = vst.msk [vmem:[#allocation2 + $0x88] sm:$0xff] %vm7832_vm9, %v834_v6  ;;  %v832_v9 = vsel %vm7834_vm14, %v608_v37, 0.0  ;;  %v515_v35 = vmul.f32 -1.0, %v7835_v63  ;;  %v579_v13 = vmul.f32 -0.5, %v7836_v52  ;;  %vm7837_vm4 = vmmov %vm7832_vm9  ;;  %v1190_v51 = vadd.f32 %v1158_v4, %v1126_v26  ;;  %v7844_v52 = vld [vmem:[#allocation102_spill] sm:$0xff] }
  0xef   : > { %866 = vst.msk [vmem:[#allocation2 + $0x80] sm:$0xff] %vm7837_vm4, %v833_v59  ;;  %v7839_v18 = vmul.u32 2, %v7838_v0  ;;  %v5719_v20 = vmul.f32 %v583_v23, %v519_v3  ;;  %v5722_v44 = vmul.f32 %v7829_v48, %v743_v41  ;;  %vm7842_vm2 = vcmask 64544   ;;  %v981_v23 = vpop.permute.xlu2 %980  ;;  %1259 = vrot.lane.b32.xlu2 %v1183_v22, %s4193_s16 }
  0xf0   : > { %1059 = vst.msk [vmem:[#allocation2 + $0x80] sm:$0xff] %vm7842_vm2, %v979_v34  ;;  %v739_v36 = vmul.f32 0.5, %v7843_v15  ;;  %v746_v56 = vmul.f32 0.5, %v7844_v52  ;;  %v1194_v59 = vadd.f32 %v1162_v8, %v1130_v43  ;;  %v7846_v4 = vmul.u32 2, %v7845_v32  ;;  %1273 = vrot.lane.b32.xlu0 %v1190_v51, %s4193_s16  ;;  %v7855_v34 = vld [vmem:[#allocation86_spill] sm:$0xff] }
  0xf1   : > { %vm5715_vm7 = vcmp.eq.s32.totalorder %v7839_v18, 2  ;;  %v7847_v0 = vmov 0  ;;  %865 = vst.msk [vmem:[#allocation2 + $0x78] sm:$0xff] %vm7837_vm4, %v832_v9  ;;  %v750_v26 = vmul.f32 0.5, %v5285_v39  ;;  %v1154_v41 = vsel %vm7834_vm14, %v5697_v11, 0.0  ;;  %vm7852_vm14 = vmmov %vm7842_vm2  ;;  %v7859_v9 = vld [vmem:[#allocation101_spill] sm:$0xff] }
  0xf2   : > { %vm5729_vm9 = vcmp.eq.s32.totalorder %v7846_v4, 2  ;;  %v5738_v48 = vmul.f32 %v587_v42, %v523_v12  ;;  %v5741_v3 = vmul.f32 %v5159_v29, %v747_v10  ;;  %1058 = vst.msk [vmem:[#allocation2 + $0x78] sm:$0xff] %vm7842_vm2, %v977_v24  ;;  %v1122_v32 = vsel %vm5715_vm7, %v608_v37, 0.0  ;;  %v7856_v42 = vld [vmem:[#allocation90_spill] sm:$0xff]  ;;  %1281 = vrot.lane.b32.xlu1 %v1194_v59, %s4193_s16  ;;  %v7864_v4 = vld [vmem:[#allocation64_spill] sm:$0xff] }
  0xf3   : > { %v7848_v0 = vsel %vm5729_vm9, 4294967295, %v7847_v0  ;;  %v7849_v43 = vmul.u32 2, %v5126_v7  ;;  %v7850_v39 = vmov 0  ;;  %v5753_v8 = vmul.f32 %v579_v13, %v515_v35  ;;  %1060 = vst.msk [vmem:[#allocation2 + $0x88] sm:$0xff] %vm7852_vm14, %v981_v23  ;;  %v7853_v7 = vld [vmem:[#allocation85_spill] sm:$0xff] }
  0xf4   : > { %v837_v29 = vsel %vm7804_vm1, %v5563_v60, 0.0  ;;  %v1129_v10 = vsel %vm5729_vm9, %v5719_v20, 0.0  ;;  %vm7854_vm2 = vnez %v7853_v7  ;;  %v518_v12 = vmul.f32 -1.0, %v7855_v34  ;;  %v7860_v35 = vld [vmem:[#allocation77_spill] sm:$0xff] }
  0xf5   : > { %vm5749_vm4 = vcmp.eq.s32.totalorder %v7849_v43, 2  ;;  %v1161_v37 = vsel %vm7854_vm2, %v5722_v44, 0.0  ;;  %v582_v58 = vmul.f32 -0.5, %v7856_v42  ;;  %vm7857_vm13 = vcmask 31744  }
  0xf6   : > { %v7851_v39 = vsel %vm5749_vm4, 4294967295, %v7850_v39  ;;  %870 = vst.msk [vmem:[#allocation2 + $0xa0] sm:$0xff] %vm7857_vm13, %v837_v29  ;;  %v522_v60 = vmul.f32 -1.0, %v7858_v33  ;;  %v586_v51 = vmul.f32 -0.5, %v7859_v9  ;;  %v836_v22 = vsel %vm7827_vm12, %v5648_v49, 0.0  ;;  %v985_v29 = vpop.permute.xlu1 %984 }
  0xf7   : > { %vm7861_vm1 = vnez %v7860_v35  ;;  %v1133_v24 = vsel %vm5749_vm4, %v5738_v48, 0.0  ;;  %vm7862_vm13 = vnez %v7675_v62  ;;  %v526_v15 = vmul.f32 -1.0, %v5268_v17 }
  0xf8   : > { %v835_v13 = vsel %vm7861_vm1, %v5753_v8, 0.0  ;;  %v1165_v18 = vsel %vm7862_vm13, %v5741_v3, 0.0  ;;  %v590_v52 = vmul.f32 -0.5, %v5282_v54  ;;  %vm7863_vm14 = vcmask 31744  }
  0xf9   : > { %869 = vst.msk [vmem:[#allocation2 + $0x98] sm:$0xff] %vm7863_vm14, %v836_v22  ;;  %v1186_v38 = vadd.f32 %v1154_v41, %v1122_v32  ;;  %v1193_v49 = vadd.f32 %v1161_v37, %v1129_v10  ;;  %v5788_v59 = vmul.f32 %v7835_v63, %v739_v36  ;;  %v7865_v23 = vmul.u32 2, %v7864_v4  ;;  %vm7868_vm9 = vmmov %vm7863_vm14  ;;  %v7870_v41 = vld [vmem:[#allocation104_spill] sm:$0xff]  ;;  %v7871_v63 = vld [vmem:[#allocation107_spill] sm:$0xff] }
  0xfa   : > { %v7866_v43 = vmov 0  ;;  %868 = vst.msk [vmem:[#allocation2 + $0x90] sm:$0xff] %vm7868_vm9, %v835_v13  ;;  %v5798_v42 = vmul.f32 %v7858_v33, %v746_v56  ;;  %v5800_v54 = vmul.f32 %v582_v58, %v518_v12  ;;  %vm7869_vm14 = vcmask 64544   ;;  %v7872_v56 = vld [vmem:[#allocation88_spill] sm:$0xff]  ;;  %v7888_v4 = vld [vmem:[#allocation113_spill] sm:$0xff] }
  0xfb   : > { %vm5792_vm12 = vcmp.eq.s32.totalorder %v7865_v23, 2  ;;  %1062 = vst.msk [vmem:[#allocation2 + $0x98] sm:$0xff] %vm7869_vm14, %v985_v29  ;;  %v521_v32 = vmul.f32 -1.0, %v7870_v41  ;;  %v585_v36 = vmul.f32 -0.5, %v7871_v63  ;;  %v1197_v10 = vadd.f32 %v1165_v18, %v1133_v24  ;;  %v983_v24 = vpop.permute.xlu0 %982  ;;  %1265 = vrot.lane.b32.xlu2 %v1186_v38, %s4193_s16  ;;  %1279 = vrot.lane.b32.xlu0 %v1193_v49, %s4193_s16 }
  0xfc   : > { %v7867_v43 = vsel %vm5792_vm12, 4294967295, %v7866_v43  ;;  %v618_v37 = vmul.f32 %v586_v51, %v522_v60  ;;  %v840_v9 = vsel %vm7831_vm0, %v5615_v5, 0.0  ;;  %v839_v22 = vsel %vm7854_vm2, %v5719_v20, 0.0  ;;  %v7879_v60 = vld [vmem:[#allocation91_spill] sm:$0xff]  ;;  %v7880_v20 = vld [vmem:[#allocation117_spill] sm:$0xff] }
  0xfd   : > { %v7873_v33 = vmul.u32 2, %v7872_v56  ;;  %v7874_v12 = vmov 0  ;;  %v622_v58 = vmul.f32 %v590_v52, %v526_v15  ;;  %v5818_v13 = vmul.f32 %v5268_v17, %v750_v26  ;;  %v7885_v52 = vld [vmem:[#allocation103_spill] sm:$0xff]  ;;  %1287 = vrot.lane.b32.xlu1 %v1197_v10, %s4193_s16 }
  0xfe   : > { %vm7876_vm14 = vcmask 31744   ;;  %vm7878_vm0 = vnez %v7877_v16  ;;  %v742_v7 = vmul.f32 0.5, %v7879_v60  ;;  %v749_v51 = vmul.f32 0.5, %v7880_v20  ;;  %v7913_v16 = vld [vmem:[#allocation127_spill] sm:$0xff] }
  0xff   : > { %vm5813_vm9 = vcmp.eq.s32.totalorder %v7873_v33, 2  ;;  %873 = vst.msk [vmem:[#allocation2 + $0xb8] sm:$0xff] %vm7876_vm14, %v840_v9  ;;  %v838_v5 = vsel %vm7878_vm0, %v5800_v54, 0.0  ;;  %v1157_v18 = vsel %vm7861_vm1, %v5788_v59, 0.0  ;;  %v7881_v17 = vmul.u32 2, %v5224_v1  ;;  %v987_v9 = vpop.permute.xlu2 %986  ;;  %v7895_v33 = vld [vmem:[#allocation125_spill] sm:$0xff] }
 0x100   : > { %v7875_v12 = vsel %vm5813_vm9, 4294967295, %v7874_v12  ;;  %v7882_v26 = vmov 0  ;;  %vm7884_vm14 = vcmask 64544   ;;  %v1125_v15 = vsel %vm5792_vm12, %v5753_v8, 0.0  ;;  %v7889_v8 = vld [vmem:[#allocation116_spill] sm:$0xff] }
 0x101   : > { %vm5832_vm2 = vcmp.eq.s32.totalorder %v7881_v17, 2  ;;  %1061 = vst.msk [vmem:[#allocation2 + $0x90] sm:$0xff] %vm7884_vm14, %v983_v24  ;;  %vm7886_vm4 = vnez %v7885_v52  ;;  %v5844_v35 = vmul.f32 %v585_v36, %v521_v32  ;;  %vm7887_vm1 = vcmask 31744   ;;  %v7898_v17 = vld [vmem:[#allocation82_spill] sm:$0xff] }
 0x102   : > { %v7883_v26 = vsel %vm5832_vm2, 4294967295, %v7882_v26  ;;  %v1164_v38 = vsel %vm7886_vm4, %v5798_v42, 0.0  ;;  %872 = vst.msk [vmem:[#allocation2 + $0xb0] sm:$0xff] %vm7887_vm1, %v839_v22  ;;  %v843_v1 = vsel %vm7862_vm13, %v5738_v48, 0.0  ;;  %v1132_v49 = vsel %vm5813_vm9, %v618_v37, 0.0  ;;  %vm7890_vm14 = vmmov %vm7887_vm1  ;;  %v7892_v48 = vld [vmem:[#allocation109_spill] sm:$0xff] }
 0x103   : > { %v525_v23 = vmul.f32 -1.0, %v7888_v4  ;;  %v589_v29 = vmul.f32 -0.5, %v7889_v8  ;;  %871 = vst.msk [vmem:[#allocation2 + $0xa8] sm:$0xff] %vm7890_vm14, %v838_v5  ;;  %v842_v32 = vsel %vm7886_vm4, %v618_v37, 0.0  ;;  %v1136_v63 = vsel %vm5832_vm2, %v622_v58, 0.0  ;;  %v7894_v22 = vld [vmem:[#allocation121_spill] sm:$0xff]  ;;  %vm7896_vm4 = vmmov %vm7887_vm1 }
 0x104   : > { %vm7891_vm13 = vnez %v7694_v21  ;;  %876 = vst.msk [vmem:[#allocation2 + $0xd0] sm:$0xff] %vm7887_vm1, %v843_v1  ;;  %vm7893_vm9 = vnez %v7892_v48  ;;  %v1189_v10 = vadd.f32 %v1157_v18, %v1125_v15  ;;  %v524_v56 = vmul.f32 -1.0, %v7894_v22  ;;  %vm7902_vm2 = vmmov %vm7896_vm4  ;;  %v7903_v1 = vld [vmem:[#allocation110_spill] sm:$0xff] }
 0x105   : > { %v1168_v62 = vsel %vm7891_vm13, %v5818_v13, 0.0  ;;  %v841_v36 = vsel %vm7893_vm9, %v5844_v35, 0.0  ;;  %v588_v24 = vmul.f32 -0.5, %v7895_v33  ;;  %875 = vst.msk [vmem:[#allocation2 + $0xc8] sm:$0xff] %vm7896_vm4, %v842_v32  ;;  %v1196_v37 = vadd.f32 %v1164_v38, %v1132_v49  ;;  %v7908_v32 = vld [vmem:[#allocation119_spill] sm:$0xff] }
 0x106   : > { %v5871_v5 = vmul.f32 %v7855_v34, %v742_v7  ;;  %v5874_v60 = vmul.f32 %v7888_v4, %v749_v51  ;;  %vm7897_vm14 = vcmask 64544   ;;  %v1200_v20 = vadd.f32 %v1168_v62, %v1136_v63  ;;  %874 = vst.msk [vmem:[#allocation2 + $0xc0] sm:$0xff] %vm7902_vm2, %v841_v36  ;;  %v7907_v7 = vld [vmem:[#allocation108_spill] sm:$0xff]  ;;  %1271 = vrot.lane.b32.xlu2 %v1189_v10, %s4193_s16  ;;  %v991_v4 = vpop.permute.xlu1 %990 }
 0x107   : > { %1063 = vst.msk [vmem:[#allocation2 + $0xa0] sm:$0xff] %vm7897_vm14, %v987_v9  ;;  %v7899_v52 = vmul.u32 2, %v7898_v17  ;;  %v7900_v18 = vmov 0  ;;  %v621_v15 = vmul.f32 %v589_v29, %v525_v23  ;;  %v7904_v38 = vmul.u32 2, %v7903_v1  ;;  %1285 = vrot.lane.b32.xlu0 %v1196_v37, %s4193_s16  ;;  %v7910_v36 = vld [vmem:[#allocation128_spill] sm:$0xff] }
 0x108   : > { %v7905_v34 = vmov 0  ;;  %v745_v51 = vmul.f32 0.5, %v7907_v7  ;;  %v752_v49 = vmul.f32 0.5, %v5083_v14  ;;  %v620_v8 = vmul.f32 %v588_v24, %v524_v56  ;;  %1065 = vst.msk [vmem:[#allocation2 + $0xb0] sm:$0xff] %vm7897_vm14, %v991_v4  ;;  %1293 = vrot.lane.b32.xlu1 %v1200_v20, %s4193_s16  ;;  %v7911_v10 = vld [vmem:[#allocation132_spill] sm:$0xff]  ;;  %v7917_v20 = vld [vmem:[#allocation137_spill] sm:$0xff] }
 0x109   : > { %vm5879_vm1 = vcmp.eq.s32.totalorder %v7899_v52, 2  ;;  %vm5886_vm4 = vcmp.eq.s32.totalorder %v7904_v38, 2  ;;  %v1160_v29 = vsel %vm7878_vm0, %v5871_v5, 0.0  ;;  %vm7909_vm2 = vnez %v7908_v32  ;;  %v7916_v24 = vld [vmem:[#allocation136_spill] sm:$0xff]  ;;  %v7920_v38 = vld [vmem:[#allocation98_spill] sm:$0xff] }
 0x10a   : > { %v7901_v18 = vsel %vm5879_vm1, 4294967295, %v7900_v18  ;;  %v7906_v34 = vsel %vm5886_vm4, 4294967295, %v7905_v34  ;;  %v1128_v23 = vsel %vm5879_vm1, %v5800_v54, 0.0  ;;  %v1167_v63 = vsel %vm7909_vm2, %v5874_v60, 0.0  ;;  %v7925_v32 = vld [vmem:[#allocation146_spill] sm:$0xff] }
 0x10b   : > { %v846_v14 = vsel %vm7891_vm13, %v622_v58, 0.0  ;;  %v1135_v62 = vsel %vm5886_vm4, %v621_v15, 0.0  ;;  %v528_v54 = vmul.f32 -1.0, %v7910_v36  ;;  %v592_v9 = vmul.f32 -0.5, %v7911_v10  ;;  %v989_v58 = vpop.permute.xlu0 %988 }
 0x10c   : > { %vm7912_vm1 = vcmask 31744   ;;  %vm7914_vm0 = vnez %v7913_v16  ;;  %v845_v33 = vsel %vm7909_vm2, %v621_v15, 0.0  ;;  %v1192_v21 = vadd.f32 %v1160_v29, %v1128_v23  ;;  %v7924_v29 = vld [vmem:[#allocation9_spill] sm:$0xff] }
 0x10d   : > { %879 = vst.msk [vmem:[#allocation2 + $0xe8] sm:$0xff] %vm7912_vm1, %v846_v14  ;;  %v844_v56 = vsel %vm7914_vm0, %v620_v8, 0.0  ;;  %vm7915_vm14 = vmmov %vm7912_vm1  ;;  %v527_v37 = vmul.f32 -1.0, %v7916_v24  ;;  %v591_v17 = vmul.f32 -0.5, %v7917_v20  ;;  %v1199_v52 = vadd.f32 %v1167_v63, %v1135_v62  ;;  %v7927_v63 = vld [vmem:[#allocation124_spill] sm:$0xff] }
 0x10e   : > { %877 = vst.msk [vmem:[#allocation2 + $0xd8] sm:$0xff] %vm7915_vm14, %v844_v56  ;;  %vm7918_vm13 = vmmov %vm7912_vm1  ;;  %v5921_v1 = vmul.f32 %v7870_v41, %v745_v51  ;;  %vm7919_vm1 = vcmask 64544   ;;  %v7921_v7 = vmul.u32 2, %v7920_v38  ;;  %v7922_v15 = vmov 0  ;;  %1277 = vrot.lane.b32.xlu2 %v1192_v21, %s4193_s16  ;;  %v993_v51 = vpop.permute.xlu2 %992  ;;  %v7931_v56 = vld [vmem:[#allocation126_spill] sm:$0xff]  ;;  %v7939_v38 = vld [vmem:[#allocation115_spill] sm:$0xff] }
 0x10f   : > { %878 = vst.msk [vmem:[#allocation2 + $0xe0] sm:$0xff] %vm7918_vm13, %v845_v33  ;;  %v624_v4 = vmul.f32 %v592_v9, %v528_v54  ;;  %v5931_v23 = vmul.f32 %v7910_v36, %v752_v49  ;;  %vm7926_vm2 = vnez %v7925_v32  ;;  %v7928_v62 = vmul.u32 2, %v7927_v63  ;;  %1291 = vrot.lane.b32.xlu0 %v1199_v52, %s4193_s16  ;;  %vm7932_vm13 = vmmov %vm7919_vm1  ;;  %v7933_v54 = vld [vmem:[#allocation134_spill] sm:$0xff] }
 0x110   : > { %1064 = vst.msk [vmem:[#allocation2 + $0xa8] sm:$0xff] %vm7919_vm1, %v989_v58  ;;  %vm5926_vm4 = vcmp.eq.s32.totalorder %v7921_v7, 2  ;;  %v1364_v14 = vsel %vm7926_vm2, %v7924_v29, 0.0  ;;  %v7929_v41 = vmov 0  ;;  %v623_v10 = vmul.f32 %v591_v17, %v527_v37  ;;  %v997_v37 = vpop.permute.xlu1 %996  ;;  %v7943_v29 = vld [vmem:[#allocation11_spill] sm:$0xff] }
 0x111   : > { %v7923_v15 = vsel %vm5926_vm4, 4294967295, %v7922_v15  ;;  %vm5938_vm14 = vcmp.eq.s32.totalorder %v7928_v62, 2  ;;  %v748_v33 = vmul.f32 0.5, %v7931_v56  ;;  %v1131_v49 = vsel %vm5926_vm4, %v5844_v35, 0.0  ;;  %1066 = vst.msk [vmem:[#allocation2 + $0xb8] sm:$0xff] %vm7932_vm13, %v993_v51  ;;  %1428 = vrot.lane.b32.xlu1 %v1364_v14, %s4194_s17  ;;  %v7936_v35 = vld [vmem:[#allocation139_spill] sm:$0xff] }
 0x112   : > { %v7930_v41 = vsel %vm5938_vm14, 4294967295, %v7929_v41  ;;  %v1163_v36 = vsel %vm7893_vm9, %v5921_v1, 0.0  ;;  %vm7934_vm1 = vnez %v7933_v54  ;;  %v1138_v21 = vsel %vm5938_vm14, %v624_v4, 0.0  ;;  %1068 = vst.msk [vmem:[#allocation2 + $0xc8] sm:$0xff] %vm7932_vm13, %v997_v37  ;;  %v7945_v51 = vld [vmem:[#allocation138_spill] sm:$0xff]  ;;  %v7947_v54 = vld [vmem:[#allocation8_spill] sm:$0xff] }
 0x113   : > { %v848_v9 = vsel %vm7934_vm1, %v624_v4, 0.0  ;;  %v1170_v58 = vsel %vm7934_vm1, %v5931_v23, 0.0  ;;  %vm7935_vm2 = vcmask 31744   ;;  %vm7937_vm4 = vnez %v7936_v35  ;;  %v995_v62 = vpop.permute.xlu0 %994  ;;  %v7954_v37 = vld [vmem:[#allocation22_spill] sm:$0xff] }
 0x114   : > { %881 = vst.msk [vmem:[#allocation2 + $0xf8] sm:$0xff] %vm7935_vm2, %v848_v9  ;;  %v847_v48 = vsel %vm7937_vm4, %v623_v10, 0.0  ;;  %vm7938_vm9 = vmmov %vm7935_vm2  ;;  %v1195_v20 = vadd.f32 %v1163_v36, %v1131_v49  ;;  %v1202_v17 = vadd.f32 %v1170_v58, %v1138_v21  ;;  %v5966_v52 = vmul.f32 %v7894_v22, %v748_v33  ;;  %v7948_v9 = vld [vmem:[#allocation122_spill] sm:$0xff] }
 0x115   : > { %880 = vst.msk [vmem:[#allocation2 + $0xf0] sm:$0xff] %vm7938_vm9, %v847_v48  ;;  %v7940_v7 = vmul.u32 2, %v7939_v38  ;;  %v7941_v4 = vmov 0  ;;  %v1367_v63 = vsel %vm5381_vm8, %v7943_v29, 0.0  ;;  %v751_v56 = vmul.f32 0.5, %v7945_v51  ;;  %vm7946_vm2 = vmmov %vm7932_vm13  ;;  %v7950_v58 = vld [vmem:[#allocation130_spill] sm:$0xff] }
 0x116   : > { %1283 = vrot.lane.b32.xlu2 %v1195_v20, %s4193_s16  ;;  %v1166_v33 = vsel %vm7914_vm0, %v5966_v52, 0.0  ;;  %1067 = vst.msk [vmem:[#allocation2 + $0xc0] sm:$0xff] %vm7946_vm2, %v995_v62  ;;  %vm7949_vm1 = vnez %v7948_v9  ;;  %v7951_v48 = vmul.u32 2, %v7950_v58  ;;  %v999_v16 = vpop.permute.xlu2 %998  ;;  %v1370_v20 = vsel %vm5476_vm3, %v7954_v37, 0.0  ;;  %vm7955_vm0 = vmmov %vm7946_vm2  ;;  %v7957_v29 = vld [vmem:[#allocation36_spill] sm:$0xff]  ;;  %v7967_v58 = vld [vmem:[#allocation150_spill] sm:$0xff] }
 0x117   : > { %vm5970_vm14 = vcmp.eq.s32.totalorder %v7940_v7, 2  ;;  %1297 = vrot.lane.b32.xlu0 %v1202_v17, %s4193_s16  ;;  %v5988_v36 = vmul.f32 %v7916_v24, %v751_v56  ;;  %v1366_v21 = vsel %vm7949_vm1, %v7947_v54, 0.0  ;;  %1069 = vst.msk [vmem:[#allocation2 + $0xd0] sm:$0xff] %vm7955_vm0, %v999_v16  ;;  %vm7956_vm13 = vmmov %vm7955_vm0  ;;  %v7960_v56 = vld [vmem:[#allocation33_spill] sm:$0xff]  ;;  %v7969_v16 = vld [vmem:[#allocation47_spill] sm:$0xff] }
 0x118   : > { %v7942_v4 = vsel %vm5970_vm14, 4294967295, %v7941_v4  ;;  %v1134_v22 = vsel %vm5970_vm14, %v620_v8, 0.0  ;;  %vm5995_vm9 = vcmp.eq.s32.totalorder %v7951_v48, 2  ;;  %v7952_v8 = vmov 0  ;;  %v1003_v38 = vpop.permute.xlu1 %1002 }
 0x119   : > { %1434 = vrot.lane.b32.xlu1 %v1367_v63, %s4194_s17  ;;  %v1198_v49 = vadd.f32 %v1166_v33, %v1134_v22  ;;  %v7953_v8 = vsel %vm5995_vm9, 4294967295, %v7952_v8  ;;  %v1137_v24 = vsel %vm5995_vm9, %v623_v10, 0.0  ;;  %v1169_v17 = vsel %vm7937_vm4, %v5988_v36, 0.0  ;;  %1071 = vst.msk [vmem:[#allocation2 + $0xe0] sm:$0xff] %vm7956_vm13, %v1003_v38  ;;  %v7958_v63 = vld [vmem:[#allocation144_spill] sm:$0xff]  ;;  %vm7961_vm4 = vmmov %vm7955_vm0  ;;  %v7962_v33 = vld [vmem:[#allocation14_spill] sm:$0xff] }
 0x11a   : > { %v1201_v7 = vadd.f32 %v1169_v17, %v1137_v24  ;;  %vm7959_vm2 = vnez %v7958_v63  ;;  %v1373_v22 = vsel %vm5555_vm5, %v7960_v56, 0.0  ;;  %vm7968_vm5 = vnez %v7967_v58  ;;  %v7970_v38 = vld [vmem:[#allocation27_spill] sm:$0xff] }
 0x11b   : > { %v1369_v62 = vsel %vm7959_vm2, %v7957_v29, 0.0  ;;  %v1001_v51 = vpop.permute.xlu0 %1000  ;;  %vm7965_vm2 = vmmov %vm7955_vm0  ;;  %v1376_v37 = vsel %vm5637_vm15, %v7969_v16, 0.0 }
 0x11c   : > { %1070 = vst.msk [vmem:[#allocation2 + $0xd8] sm:$0xff] %vm7955_vm0, %v1001_v51  ;;  %vm1331_vm0 = vcmask 97344   ;;  %v7974_v51 = vld [vmem:[#allocation5_spill] sm:$0xff] }
 0x11e   : > { %1289 = vrot.lane.b32.xlu2 %v1198_v49, %s4193_s16  ;;  %v1005_v10 = vpop.permute.xlu2 %1004  ;;  %v7963_v49 = vld [vmem:[#allocation142_spill] sm:$0xff] }
 0x11f   : > { %1432 = vrot.lane.b32.xlu0 %v1366_v21, %s4194_s17  ;;  %1072 = vst.msk [vmem:[#allocation2 + $0xe8] sm:$0xff] %vm7961_vm4, %v1005_v10  ;;  %vm7964_vm13 = vnez %v7963_v49  ;;  %v7966_v21 = vld [vmem:[#allocation49_spill] sm:$0xff]  ;;  %v8010_v49 = vld [vmem:[#allocation151_spill] sm:$0xff] }
 0x120   : > { %v1009_v35 = vpop.permute.xlu1 %1008  ;;  %v1365_v54 = vsel %vm7964_vm13, %v7962_v33, 0.0  ;;  %v1372_v48 = vsel %vm7968_vm5, %v7966_v21, 0.0  ;;  %v7976_v21 = vld [vmem:[#allocation16_spill] sm:$0xff] }
 0x121   : > { %1440 = vrot.lane.b32.xlu1 %v1370_v20, %s4194_s17  ;;  %1074 = vst.msk [vmem:[#allocation2 + $0xf8] sm:$0xff] %vm7965_vm2, %v1009_v35  ;;  %v1371_v16 = vsel %vm5330_vm11, %v7976_v21, 0.0 }
 0x123   : > { %v1007_v24 = vpop.permute.xlu0 %1006 }
 0x124   : > { %1073 = vst.msk [vmem:[#allocation2 + $0xf0] sm:$0xff] %vm7965_vm2, %v1007_v24  ;;  %v7979_v24 = vld [vmem:[#allocation78_spill] sm:$0xff] }
 0x126   : > { %1295 = vrot.lane.b32.xlu2 %v1201_v7, %s4193_s16  ;;  %v1236_v20 = vpop.permute.xlu2 %1235  ;;  %v7971_v7 = vld [vmem:[#allocation147_spill] sm:$0xff] }
 0x127   : > { %1438 = vrot.lane.b32.xlu0 %v1369_v62, %s4194_s17  ;;  %1332 = vst.msk [vmem:[#allocation2] sm:$0xff] %vm1331_vm0, %v1236_v20  ;;  %vm7972_vm4 = vnez %v7971_v7  ;;  %v7973_v62 = vld [vmem:[#allocation63_spill] sm:$0xff]  ;;  %v8015_v7 = vld [vmem:[#allocation6_spill] sm:$0xff] }
 0x128   : > { %v1240_v17 = vpop.permute.xlu1 %1239  ;;  %v1368_v29 = vsel %vm7972_vm4, %v7970_v38, 0.0  ;;  %v1375_v56 = vsel %vm5353_vm10, %v7973_v62, 0.0  ;;  %vm7992_vm10 = vnez %v7923_v15 }
 0x129   : > { %1446 = vrot.lane.b32.xlu1 %v1373_v22, %s4194_s17  ;;  %1334 = vst.msk [vmem:[#allocation2 + $0x10] sm:$0xff] %vm1331_vm0, %v1240_v17  ;;  %v7975_v22 = vld [vmem:[#allocation62_spill] sm:$0xff]  ;;  %v1382_v17 = vsel %vm5792_vm12, %v7979_v24, 0.0  ;;  %vm7986_vm12 = vnez %v7901_v18  ;;  %v7987_v24 = vld [vmem:[#allocation45_spill] sm:$0xff] }
 0x12a   : > { %v1379_v10 = vsel %vm5715_vm7, %v7975_v22, 0.0  ;;  %v7981_v22 = vld [vmem:[#allocation25_spill] sm:$0xff] }
 0x12b   : > { %v1238_v33 = vpop.permute.xlu0 %1237  ;;  %vm7982_vm2 = vnez %v7981_v22 }
 0x12c   : > { %1333 = vst.msk [vmem:[#allocation2 + $0x8] sm:$0xff] %vm1331_vm0, %v1238_v33 }
 0x12e   : > { %1430 = vrot.lane.b32.xlu2 %v1365_v54, %s4194_s17  ;;  %v1242_v35 = vpop.permute.xlu2 %1241 }
 0x12f   : > { %1444 = vrot.lane.b32.xlu0 %v1372_v48, %s4194_s17  ;;  %1335 = vst.msk [vmem:[#allocation2 + $0x18] sm:$0xff] %vm1331_vm0, %v1242_v35  ;;  %v7983_v35 = vld [vmem:[#allocation100_spill] sm:$0xff]  ;;  %v1563_v48 = vsel %vm5476_vm3, %v5448_v19, 0.0  ;;  %v1559_v19 = vsel %vm7949_vm1, %v8020_v2, 0.0  ;;  %vm8021_vm3 = vnez %v7776_v46  ;;  %vm8023_vm1 = vnez %v7958_v63 }
 0x130   : > { %v1246_v54 = vpop.permute.xlu1 %1245  ;;  %v1566_v22 = vsel %vm8021_vm3, %v5545_v31, 0.0  ;;  %vm1825_vm3 = vcmask 157696  }
 0x131   : > { %1452 = vrot.lane.b32.xlu1 %v1376_v37, %s4194_s17  ;;  %1337 = vst.msk [vmem:[#allocation2 + $0x28] sm:$0xff] %vm1331_vm0, %v1246_v54  ;;  %v7978_v37 = vld [vmem:[#allocation80_spill] sm:$0xff] }
 0x132   : > { %v1378_v20 = vsel %vm5431_vm6, %v7978_v37, 0.0  ;;  %vm7984_vm6 = vnez %v7765_v30  ;;  %v7985_v54 = vld [vmem:[#allocation96_spill] sm:$0xff] }
 0x133   : > { %v1381_v33 = vsel %vm7984_vm6, %v7983_v35, 0.0  ;;  %v1385_v21 = vsel %vm7986_vm12, %v7985_v54, 0.0  ;;  %vm7988_vm6 = vnez %v7758_v45  ;;  %vm7990_vm12 = vnez %v7797_v55  ;;  %v7993_v54 = vld [vmem:[#allocation55_spill] sm:$0xff] }
 0x136   : > { %1436 = vrot.lane.b32.xlu2 %v1368_v29, %s4194_s17  ;;  %v1248_v38 = vpop.permute.xlu2 %1247  ;;  %v1244_v29 = vpop.permute.xlu0 %1243 }
 0x137   : > { %1450 = vrot.lane.b32.xlu0 %v1375_v56, %s4194_s17  ;;  %1338 = vst.msk [vmem:[#allocation2 + $0x30] sm:$0xff] %vm1331_vm0, %v1248_v38  ;;  %v7980_v56 = vld [vmem:[#allocation28_spill] sm:$0xff]  ;;  %v7989_v38 = vld [vmem:[#allocation114_spill] sm:$0xff] }
 0x138   : > { %1336 = vst.msk [vmem:[#allocation2 + $0x20] sm:$0xff] %vm1331_vm0, %v1244_v29  ;;  %v1252_v62 = vpop.permute.xlu1 %1251  ;;  %v1384_v29 = vsel %vm7990_vm12, %v7989_v38, 0.0  ;;  %vm7994_vm12 = vnez %v7780_v47 }
 0x139   : > { %1458 = vrot.lane.b32.xlu1 %v1379_v10, %s4194_s17  ;;  %v1374_v10 = vsel %vm7982_vm2, %v7980_v56, 0.0  ;;  %1340 = vst.msk [vmem:[#allocation2 + $0x40] sm:$0xff] %vm1331_vm0, %v1252_v62  ;;  %v7991_v62 = vld [vmem:[#allocation111_spill] sm:$0xff]  ;;  %v1573_v45 = vsel %vm7994_vm12, %v5560_v28, 0.0  ;;  %v1572_v28 = vsel %vm5715_vm7, %v5697_v11, 0.0  ;;  %vm8032_vm7 = vnez %v7765_v30 }
 0x13a   : > { %v1388_v56 = vsel %vm7992_vm10, %v7991_v62, 0.0  ;;  %vm7996_vm10 = vnez %v7825_v61  ;;  %v7998_v62 = vld [vmem:[#allocation74_spill] sm:$0xff] }
 0x13e   : > { %1442 = vrot.lane.b32.xlu2 %v1371_v16, %s4194_s17  ;;  %v1254_v16 = vpop.permute.xlu2 %1253  ;;  %v1250_v37 = vpop.permute.xlu0 %1249 }
 0x13f   : > { %1456 = vrot.lane.b32.xlu0 %v1378_v20, %s4194_s17  ;;  %1341 = vst.msk [vmem:[#allocation2 + $0x48] sm:$0xff] %vm1331_vm0, %v1254_v16  ;;  %v7995_v16 = vld [vmem:[#allocation131_spill] sm:$0xff] }
 0x140   : > { %1339 = vst.msk [vmem:[#allocation2 + $0x38] sm:$0xff] %vm1331_vm0, %v1250_v37  ;;  %v1258_v20 = vpop.permute.xlu1 %1257  ;;  %v1387_v37 = vsel %vm7996_vm10, %v7995_v16, 0.0  ;;  %vm7999_vm10 = vnez %v7819_v57 }
 0x141   : > { %1464 = vrot.lane.b32.xlu1 %v1382_v17, %s4194_s17  ;;  %v1377_v17 = vsel %vm7988_vm6, %v7987_v24, 0.0  ;;  %1343 = vst.msk [vmem:[#allocation2 + $0x58] sm:$0xff] %vm1331_vm0, %v1258_v20  ;;  %v7997_v20 = vld [vmem:[#allocation129_spill] sm:$0xff]  ;;  %v1576_v47 = vsel %vm7999_vm10, %v5642_v40, 0.0 }
 0x142   : > { %v1391_v24 = vsel %vm5970_vm14, %v7997_v20, 0.0  ;;  %vm8001_vm14 = vnez %v7851_v39  ;;  %v8003_v20 = vld [vmem:[#allocation89_spill] sm:$0xff] }
 0x146   : > { %1448 = vrot.lane.b32.xlu2 %v1374_v10, %s4194_s17  ;;  %v1256_v35 = vpop.permute.xlu0 %1255 }
 0x147   : > { %1462 = vrot.lane.b32.xlu0 %v1381_v33, %s4194_s17  ;;  %1342 = vst.msk [vmem:[#allocation2 + $0x50] sm:$0xff] %vm1331_vm0, %v1256_v35 }
 0x148   : > { %v1264_v33 = vpop.permute.xlu1 %1263 }
 0x149   : > { %1470 = vrot.lane.b32.xlu1 %v1385_v21, %s4194_s17  ;;  %v1260_v10 = vpop.permute.xlu2 %1259  ;;  %v1380_v21 = vsel %vm7994_vm12, %v7993_v54, 0.0  ;;  %1346 = vst.msk [vmem:[#allocation2 + $0x70] sm:$0xff] %vm1331_vm0, %v1264_v33  ;;  %v8002_v33 = vld [vmem:[#allocation141_spill] sm:$0xff]  ;;  %vm8033_vm12 = vnez %v7923_v15 }
 0x14a   : > { %1344 = vst.msk [vmem:[#allocation2 + $0x60] sm:$0xff] %vm1331_vm0, %v1260_v10  ;;  %v8000_v10 = vld [vmem:[#allocation145_spill] sm:$0xff]  ;;  %v1394_v54 = vsel %vm5995_vm9, %v8002_v33, 0.0  ;;  %vm8006_vm9 = vnez %v7883_v26  ;;  %v8008_v33 = vld [vmem:[#allocation106_spill] sm:$0xff] }
 0x14b   : > { %v1390_v35 = vsel %vm8001_vm14, %v8000_v10, 0.0  ;;  %vm8004_vm14 = vnez %v7848_v0 }
 0x14c   : > { %v1579_v57 = vsel %vm8004_vm14, %v5722_v44, 0.0 }
 0x14e   : > { %1454 = vrot.lane.b32.xlu2 %v1377_v17, %s4194_s17  ;;  %v1262_v38 = vpop.permute.xlu0 %1261 }
 0x14f   : > { %1468 = vrot.lane.b32.xlu0 %v1384_v29, %s4194_s17  ;;  %1345 = vst.msk [vmem:[#allocation2 + $0x68] sm:$0xff] %vm1331_vm0, %v1262_v38 }
 0x150   : > { %v1270_v29 = vpop.permute.xlu1 %1269 }
 0x151   : > { %1476 = vrot.lane.b32.xlu1 %v1388_v56, %s4194_s17  ;;  %v1383_v56 = vsel %vm7999_vm10, %v7998_v62, 0.0  ;;  %1349 = vst.msk [vmem:[#allocation2 + $0x88] sm:$0xff] %vm1331_vm0, %v1270_v29  ;;  %v8007_v29 = vld [vmem:[#allocation140_spill] sm:$0xff]  ;;  %vm8027_vm10 = vnez %v7867_v43 }
 0x152   : > { %v1558_v62 = vsel %vm7964_vm13, %v8007_v29, 0.0  ;;  %vm8011_vm13 = vnez %v7925_v32  ;;  %v1560_v29 = vsel %vm5381_vm8, %v8015_v7, 0.0  ;;  %vm8018_vm8 = vnez %v7930_v41 }
 0x153   : > { %v1575_v40 = vsel %vm8027_vm10, %v5788_v59, 0.0  ;;  %vm2219_vm10 = vcmask 486720  }
 0x155   : > { %v1266_v17 = vpop.permute.xlu2 %1265 }
 0x156   : > { %1460 = vrot.lane.b32.xlu2 %v1380_v21, %s4194_s17  ;;  %1347 = vst.msk [vmem:[#allocation2 + $0x78] sm:$0xff] %vm1331_vm0, %v1266_v17  ;;  %v1268_v16 = vpop.permute.xlu0 %1267  ;;  %v8005_v17 = vld [vmem:[#allocation154_spill] sm:$0xff] }
 0x157   : > { %1474 = vrot.lane.b32.xlu0 %v1387_v37, %s4194_s17  ;;  %1348 = vst.msk [vmem:[#allocation2 + $0x80] sm:$0xff] %vm1331_vm0, %v1268_v16  ;;  %v1393_v38 = vsel %vm8006_vm9, %v8005_v17, 0.0  ;;  %vm8009_vm9 = vnez %v7875_v12  ;;  %v8012_v16 = vld [vmem:[#allocation148_spill] sm:$0xff] }
 0x158   : > { %v1582_v0 = vsel %vm8009_vm9, %v5798_v42, 0.0  ;;  %v1581_v42 = vsel %vm8033_vm12, %v5921_v1, 0.0  ;;  %vm2616_vm12 = vcmask 814720  }
 0x159   : > { %1482 = vrot.lane.b32.xlu1 %v1391_v24, %s4194_s17  ;;  %v1276_v37 = vpop.permute.xlu1 %1275  ;;  %v1386_v24 = vsel %vm8004_vm14, %v8003_v20, 0.0  ;;  %vm8035_vm14 = vnez %v7797_v55 }
 0x15a   : > { %1352 = vst.msk [vmem:[#allocation2 + $0xa0] sm:$0xff] %vm1331_vm0, %v1276_v37  ;;  %v1561_v37 = vsel %vm7972_vm4, %v8012_v16, 0.0  ;;  %vm8039_vm4 = vnez %v7953_v8 }
 0x15e   : > { %1466 = vrot.lane.b32.xlu2 %v1383_v56, %s4194_s17 }
 0x15f   : > { %1480 = vrot.lane.b32.xlu0 %v1390_v35, %s4194_s17 }
 0x160   : > { %v1272_v21 = vpop.permute.xlu2 %1271 }
 0x161   : > { %1488 = vrot.lane.b32.xlu1 %v1394_v54, %s4194_s17  ;;  %1350 = vst.msk [vmem:[#allocation2 + $0x90] sm:$0xff] %vm1331_vm0, %v1272_v21  ;;  %v1389_v54 = vsel %vm8009_vm9, %v8008_v33, 0.0  ;;  %v1557_v21 = vsel %vm8011_vm13, %v8010_v49, 0.0  ;;  %vm8014_vm13 = vnez %v7906_v34  ;;  %v8019_v49 = vld [vmem:[#allocation23_spill] sm:$0xff]  ;;  %vm8036_vm9 = vnez %v7942_v4 }
 0x162   : > { %v1274_v10 = vpop.permute.xlu0 %1273  ;;  %v1584_v1 = vsel %vm8036_vm9, %v5966_v52, 0.0  ;;  %v1585_v55 = vsel %vm8014_vm13, %v5874_v60, 0.0  ;;  %v1587_v60 = vsel %vm8039_vm4, %v5988_v36, 0.0  ;;  %vm2814_vm9 = vcmask 978720  }
 0x163   : > { %1351 = vst.msk [vmem:[#allocation2 + $0x98] sm:$0xff] %vm1331_vm0, %v1274_v10  ;;  %vm3070_vm4 = vcmask 1044416  }
 0x164   : > { %v1282_v35 = vpop.permute.xlu1 %1281 }
 0x165   : > { %1355 = vst.msk [vmem:[#allocation2 + $0xb8] sm:$0xff] %vm1331_vm0, %v1282_v35 }
 0x166   : > { %1472 = vrot.lane.b32.xlu2 %v1386_v24, %s4194_s17 }
 0x167   : > { %1486 = vrot.lane.b32.xlu0 %v1393_v38, %s4194_s17  ;;  %v8013_v38 = vld [vmem:[#allocation120_spill] sm:$0xff] }
 0x168   : > { %v1278_v56 = vpop.permute.xlu2 %1277  ;;  %v1392_v32 = vsel %vm8014_vm13, %v8013_v38, 0.0  ;;  %vm8041_vm13 = vnez %v7883_v26 }
 0x169   : > { %1623 = vrot.lane.b32.xlu1 %v1558_v62, %s4195_s18  ;;  %1353 = vst.msk [vmem:[#allocation2 + $0xa8] sm:$0xff] %vm1331_vm0, %v1278_v56  ;;  %v8016_v62 = vld [vmem:[#allocation152_spill] sm:$0xff] }
 0x16a   : > { %v1564_v56 = vsel %vm5330_vm11, %v8016_v62, 0.0  ;;  %vm1524_vm11 = vcmask 130144  }
 0x16d   : > { %v1280_v24 = vpop.permute.xlu0 %1279 }
 0x16e   : > { %1478 = vrot.lane.b32.xlu2 %v1389_v54, %s4194_s17  ;;  %1354 = vst.msk [vmem:[#allocation2 + $0xb0] sm:$0xff] %vm1331_vm0, %v1280_v24  ;;  %v8017_v54 = vld [vmem:[#allocation135_spill] sm:$0xff]  ;;  %v1570_v24 = vsel %vm7988_vm6, %v5481_v50, 0.0  ;;  %v1569_v50 = vsel %vm5637_vm15, %v5633_v25, 0.0  ;;  %vm8026_vm6 = vnez %v7974_v51  ;;  %vm8030_vm15 = vnez %v7901_v18 }
 0x16f   : > { %1621 = vrot.lane.b32.xlu0 %v1557_v21, %s4195_s18  ;;  %v1288_v17 = vpop.permute.xlu1 %1287  ;;  %v1395_v14 = vsel %vm8018_vm8, %v8017_v54, 0.0  ;;  %v1567_v21 = vsel %vm7982_vm2, %v8019_v49, 0.0  ;;  %v1578_v44 = vsel %vm8030_vm15, %v5871_v5, 0.0  ;;  %v8031_v54 = vld [vmem:[#allocation53_spill] sm:$0xff]  ;;  %vm8040_vm2 = vnez %v7851_v39 }
 0x170   : > { %v1284_v20 = vpop.permute.xlu2 %1283  ;;  %1358 = vst.msk [vmem:[#allocation2 + $0xd0] sm:$0xff] %vm1331_vm0, %v1288_v17  ;;  %v1574_v5 = vsel %vm8032_vm7, %v8031_v54, 0.0  ;;  %v1583_v34 = vsel %vm8040_vm2, %v5741_v3, 0.0  ;;  %v1586_v39 = vsel %vm8041_vm13, %v5818_v13, 0.0  ;;  %vm2420_vm15 = vcmask 649696  }
 0x171   : > { %1629 = vrot.lane.b32.xlu1 %v1561_v37, %s4195_s18  ;;  %1356 = vst.msk [vmem:[#allocation2 + $0xc0] sm:$0xff] %vm1331_vm0, %v1284_v20  ;;  %vm2418_vm7 = vcmask 650720   ;;  %vm3071_vm2 = vcmask 97284   ;;  %vm3013_vm13 = vcmask 982016  }
 0x176   : > { %1484 = vrot.lane.b32.xlu2 %v1392_v32, %s4194_s17  ;;  %v8022_v32 = vld [vmem:[#allocation143_spill] sm:$0xff] }
 0x177   : > { %1627 = vrot.lane.b32.xlu0 %v1560_v29, %s4195_s18  ;;  %v1562_v31 = vsel %vm8023_vm1, %v8022_v32, 0.0  ;;  %v8024_v29 = vld [vmem:[#allocation149_spill] sm:$0xff]  ;;  %vm2021_vm1 = vcmask 322720  }
 0x178   : > { %v1290_v10 = vpop.permute.xlu2 %1289  ;;  %v1565_v25 = vsel %vm7968_vm5, %v8024_v29, 0.0  ;;  %vm8029_vm5 = vnez %v7739_v53 }
 0x179   : > { %1635 = vrot.lane.b32.xlu1 %v1564_v56, %s4195_s18  ;;  %1359 = vst.msk [vmem:[#allocation2 + $0xd8] sm:$0xff] %vm1331_vm0, %v1290_v10  ;;  %v1286_v35 = vpop.permute.xlu0 %1285  ;;  %v8025_v56 = vld [vmem:[#allocation153_spill] sm:$0xff] }
 0x17a   : > { %1357 = vst.msk [vmem:[#allocation2 + $0xc8] sm:$0xff] %vm1331_vm0, %v1286_v35  ;;  %v1294_v33 = vpop.permute.xlu1 %1293  ;;  %v1568_v11 = vsel %vm8026_vm6, %v8025_v56, 0.0  ;;  %v8028_v35 = vld [vmem:[#allocation19_spill] sm:$0xff]  ;;  %vm2023_vm6 = vcmask 321696  }
 0x17b   : > { %1361 = vst.msk [vmem:[#allocation2 + $0xe8] sm:$0xff] %vm1331_vm0, %v1294_v33  ;;  %v1571_v59 = vsel %vm8029_vm5, %v8028_v35, 0.0  ;;  %vm2221_vm5 = vcmask 485696  }
 0x17e   : > { %1490 = vrot.lane.b32.xlu2 %v1395_v14, %s4194_s17 }
 0x17f   : > { %1633 = vrot.lane.b32.xlu0 %v1563_v48, %s4195_s18  ;;  %v8034_v48 = vld [vmem:[#allocation61_spill] sm:$0xff] }
 0x180   : > { %v1296_v16 = vpop.permute.xlu2 %1295  ;;  %v1577_v30 = vsel %vm8035_vm14, %v8034_v48, 0.0  ;;  %vm2618_vm14 = vcmask 813696  }
 0x181   : > { %1641 = vrot.lane.b32.xlu1 %v1567_v21, %s4195_s18  ;;  %1362 = vst.msk [vmem:[#allocation2 + $0xf0] sm:$0xff] %vm1331_vm0, %v1296_v16  ;;  %v1292_v37 = vpop.permute.xlu0 %1291  ;;  %v8037_v16 = vld [vmem:[#allocation4_spill] sm:$0xff] }
 0x182   : > { %1360 = vst.msk [vmem:[#allocation2 + $0xe0] sm:$0xff] %vm1331_vm0, %v1292_v37 }
 0x183   : > { %v1429_v20 = vpop.permute.xlu1 %1428 }
 0x184   : > { %1525 = vst.msk [vmem:[#allocation2] sm:$0xff] %vm1524_vm11, %v1429_v20 }
 0x186   : > { %1625 = vrot.lane.b32.xlu2 %v1559_v19, %s4195_s18 }
 0x187   : > { %1639 = vrot.lane.b32.xlu0 %v1566_v22, %s4195_s18 }
 0x188   : > { %v1431_v17 = vpop.permute.xlu2 %1430 }
 0x189   : > { %1647 = vrot.lane.b32.xlu1 %v1570_v24, %s4195_s18  ;;  %1526 = vst.msk [vmem:[#allocation2 + $0x8] sm:$0xff] %vm1524_vm11, %v1431_v17  ;;  %v1298_v9 = vpop.permute.xlu0 %1297 }
 0x18a   : > { %1363 = vst.msk [vmem:[#allocation2 + $0xf8] sm:$0xff] %vm1331_vm0, %v1298_v9  ;;  %vm8038_vm0 = vnez %v7825_v61  ;;  %v1588_v61 = vsel %vm8018_vm8, %v5931_v23, 0.0  ;;  %vm1717_vm8 = vcmask 162944  }
 0x18b   : > { %v1435_v38 = vpop.permute.xlu1 %1434  ;;  %v1580_v4 = vsel %vm8038_vm0, %v8037_v16, 0.0  ;;  %vm2816_vm0 = vcmask 977696  }
 0x18c   : > { %1528 = vst.msk [vmem:[#allocation2 + $0x18] sm:$0xff] %vm1524_vm11, %v1435_v38 }
 0x18e   : > { %1631 = vrot.lane.b32.xlu2 %v1562_v31, %s4195_s18 }
 0x18f   : > { %1645 = vrot.lane.b32.xlu0 %v1569_v50, %s4195_s18 }
 0x190   : > { %v1437_v46 = vpop.permute.xlu2 %1436 }
 0x191   : > { %1653 = vrot.lane.b32.xlu1 %v1573_v45, %s4195_s18  ;;  %1529 = vst.msk [vmem:[#allocation2 + $0x20] sm:$0xff] %vm1524_vm11, %v1437_v46  ;;  %v1433_v63 = vpop.permute.xlu0 %1432 }
 0x192   : > { %1527 = vst.msk [vmem:[#allocation2 + $0x10] sm:$0xff] %vm1524_vm11, %v1433_v63 }
 0x193   : > { %v1441_v7 = vpop.permute.xlu1 %1440 }
 0x194   : > { %1531 = vst.msk [vmem:[#allocation2 + $0x30] sm:$0xff] %vm1524_vm11, %v1441_v7 }
 0x196   : > { %1637 = vrot.lane.b32.xlu2 %v1565_v25, %s4195_s18 }
 0x197   : > { %1651 = vrot.lane.b32.xlu0 %v1572_v28, %s4195_s18 }
 0x198   : > { %v1443_v27 = vpop.permute.xlu2 %1442 }
 0x199   : > { %1659 = vrot.lane.b32.xlu1 %v1576_v47, %s4195_s18  ;;  %1532 = vst.msk [vmem:[#allocation2 + $0x38] sm:$0xff] %vm1524_vm11, %v1443_v27  ;;  %v1439_v58 = vpop.permute.xlu0 %1438 }
 0x19a   : > { %1530 = vst.msk [vmem:[#allocation2 + $0x28] sm:$0xff] %vm1524_vm11, %v1439_v58 }
 0x19b   : > { %v1447_v62 = vpop.permute.xlu1 %1446 }
 0x19c   : > { %1534 = vst.msk [vmem:[#allocation2 + $0x48] sm:$0xff] %vm1524_vm11, %v1447_v62 }
 0x19e   : > { %1643 = vrot.lane.b32.xlu2 %v1568_v11, %s4195_s18 }
 0x19f   : > { %1657 = vrot.lane.b32.xlu0 %v1575_v40, %s4195_s18 }
 0x1a0   : > { %v1449_v6 = vpop.permute.xlu2 %1448 }
 0x1a1   : > { %1665 = vrot.lane.b32.xlu1 %v1579_v57, %s4195_s18  ;;  %1535 = vst.msk [vmem:[#allocation2 + $0x50] sm:$0xff] %vm1524_vm11, %v1449_v6  ;;  %v1445_v51 = vpop.permute.xlu0 %1444 }
 0x1a2   : > { %1533 = vst.msk [vmem:[#allocation2 + $0x40] sm:$0xff] %vm1524_vm11, %v1445_v51 }
 0x1a3   : > { %v1453_v10 = vpop.permute.xlu1 %1452 }
 0x1a4   : > { %1537 = vst.msk [vmem:[#allocation2 + $0x60] sm:$0xff] %vm1524_vm11, %v1453_v10 }
 0x1a6   : > { %1649 = vrot.lane.b32.xlu2 %v1571_v59, %s4195_s18 }
 0x1a7   : > { %1663 = vrot.lane.b32.xlu0 %v1578_v44, %s4195_s18 }
 0x1a8   : > { %v1455_v43 = vpop.permute.xlu2 %1454 }
 0x1a9   : > { %1671 = vrot.lane.b32.xlu1 %v1582_v0, %s4195_s18  ;;  %1538 = vst.msk [vmem:[#allocation2 + $0x68] sm:$0xff] %vm1524_vm11, %v1455_v43  ;;  %v1451_v53 = vpop.permute.xlu0 %1450 }
 0x1aa   : > { %1536 = vst.msk [vmem:[#allocation2 + $0x58] sm:$0xff] %vm1524_vm11, %v1451_v53 }
 0x1ab   : > { %v1459_v33 = vpop.permute.xlu1 %1458 }
 0x1ac   : > { %1540 = vst.msk [vmem:[#allocation2 + $0x78] sm:$0xff] %vm1524_vm11, %v1459_v33 }
 0x1ae   : > { %1655 = vrot.lane.b32.xlu2 %v1574_v5, %s4195_s18 }
 0x1af   : > { %1669 = vrot.lane.b32.xlu0 %v1581_v42, %s4195_s18 }
 0x1b0   : > { %v1461_v12 = vpop.permute.xlu2 %1460 }
 0x1b1   : > { %1541 = vst.msk [vmem:[#allocation2 + $0x80] sm:$0xff] %vm1524_vm11, %v1461_v12  ;;  %v1457_v18 = vpop.permute.xlu0 %1456  ;;  %1677 = vrot.lane.b32.xlu1 %v1585_v55, %s4195_s18 }
 0x1b2   : > { %1539 = vst.msk [vmem:[#allocation2 + $0x70] sm:$0xff] %vm1524_vm11, %v1457_v18 }
 0x1b3   : > { %v1465_v14 = vpop.permute.xlu1 %1464 }
 0x1b4   : > { %1543 = vst.msk [vmem:[#allocation2 + $0x90] sm:$0xff] %vm1524_vm11, %v1465_v14 }
 0x1b6   : > { %1661 = vrot.lane.b32.xlu2 %v1577_v30, %s4195_s18 }
 0x1b7   : > { %1675 = vrot.lane.b32.xlu0 %v1584_v1, %s4195_s18 }
 0x1b8   : > { %v1467_v15 = vpop.permute.xlu2 %1466 }
 0x1b9   : > { %1544 = vst.msk [vmem:[#allocation2 + $0x98] sm:$0xff] %vm1524_vm11, %v1467_v15  ;;  %v1463_v49 = vpop.permute.xlu0 %1462  ;;  %1683 = vrot.lane.b32.xlu1 %v1588_v61, %s4195_s18 }
 0x1ba   : > { %1542 = vst.msk [vmem:[#allocation2 + $0x88] sm:$0xff] %vm1524_vm11, %v1463_v49 }
 0x1bb   : > { %v1471_v21 = vpop.permute.xlu1 %1470 }
 0x1bc   : > { %1546 = vst.msk [vmem:[#allocation2 + $0xa8] sm:$0xff] %vm1524_vm11, %v1471_v21 }
 0x1be   : > { %1667 = vrot.lane.b32.xlu2 %v1580_v4, %s4195_s18 }
 0x1bf   : > { %1681 = vrot.lane.b32.xlu0 %v1587_v60, %s4195_s18 }
 0x1c0   : > { %v1473_v52 = vpop.permute.xlu2 %1472 }
 0x1c1   : > { %1547 = vst.msk [vmem:[#allocation2 + $0xb0] sm:$0xff] %vm1524_vm11, %v1473_v52  ;;  %v1469_v37 = vpop.permute.xlu0 %1468 }
 0x1c2   : > { %1545 = vst.msk [vmem:[#allocation2 + $0xa0] sm:$0xff] %vm1524_vm11, %v1469_v37 }
 0x1c3   : > { %v1477_v20 = vpop.permute.xlu1 %1476 }
 0x1c4   : > { %1549 = vst.msk [vmem:[#allocation2 + $0xc0] sm:$0xff] %vm1524_vm11, %v1477_v20 }
 0x1c6   : > { %1673 = vrot.lane.b32.xlu2 %v1583_v34, %s4195_s18 }
 0x1c8   : > { %v1479_v2 = vpop.permute.xlu2 %1478 }
 0x1c9   : > { %1550 = vst.msk [vmem:[#allocation2 + $0xc8] sm:$0xff] %vm1524_vm11, %v1479_v2  ;;  %v1475_v36 = vpop.permute.xlu0 %1474 }
 0x1ca   : > { %1548 = vst.msk [vmem:[#allocation2 + $0xb8] sm:$0xff] %vm1524_vm11, %v1475_v36 }
 0x1cb   : > { %v1483_v41 = vpop.permute.xlu1 %1482 }
 0x1cc   : > { %1552 = vst.msk [vmem:[#allocation2 + $0xd8] sm:$0xff] %vm1524_vm11, %v1483_v41 }
 0x1ce   : > { %1679 = vrot.lane.b32.xlu2 %v1586_v39, %s4195_s18 }
 0x1d0   : > { %v1485_v3 = vpop.permute.xlu2 %1484 }
 0x1d1   : > { %1553 = vst.msk [vmem:[#allocation2 + $0xe0] sm:$0xff] %vm1524_vm11, %v1485_v3  ;;  %v1481_v23 = vpop.permute.xlu0 %1480 }
 0x1d2   : > { %1551 = vst.msk [vmem:[#allocation2 + $0xd0] sm:$0xff] %vm1524_vm11, %v1481_v23 }
 0x1d3   : > { %v1489_v8 = vpop.permute.xlu1 %1488 }
 0x1d4   : > { %1555 = vst.msk [vmem:[#allocation2 + $0xf0] sm:$0xff] %vm1524_vm11, %v1489_v8 }
 0x1d8   : > { %v1491_v19 = vpop.permute.xlu2 %1490 }
 0x1d9   : > { %1556 = vst.msk [vmem:[#allocation2 + $0xf8] sm:$0xff] %vm1524_vm11, %v1491_v19  ;;  %v1487_v22 = vpop.permute.xlu0 %1486 }
 0x1da   : > { %1554 = vst.msk [vmem:[#allocation2 + $0xe8] sm:$0xff] %vm1524_vm11, %v1487_v22  ;;  %vm1823_vm11 = vcmask 158720  }
 0x1db   : > { %v1624_v26 = vpop.permute.xlu1 %1623 }
 0x1dc   : > { %1719 = vst.msk [vmem:[#allocation2 + $0x8] sm:$0xff] %vm1717_vm8, %v1624_v26 }
 0x1e0   : > { %v1626_v13 = vpop.permute.xlu2 %1625 }
 0x1e1   : > { %1720 = vst.msk [vmem:[#allocation2 + $0x10] sm:$0xff] %vm1717_vm8, %v1626_v13  ;;  %v1622_v24 = vpop.permute.xlu0 %1621 }
 0x1e2   : > { %1718 = vst.msk [vmem:[#allocation2] sm:$0xff] %vm1717_vm8, %v1622_v24 }
 0x1e3   : > { %v1630_v17 = vpop.permute.xlu1 %1629  ;;  %v1854_v9 = vld [vmem:[#allocation2 + $0x9] sm:$0x3f] }
 0x1e4   : > { %1722 = vst.msk [vmem:[#allocation2 + $0x20] sm:$0xff] %vm1717_vm8, %v1630_v17  ;;  %v1882_v38 = vpack.c.bf16 %v1854_v9, %v1854_v9  ;;  %v1768_v32 = vld [vmem:[#allocation2 + $0x8] sm:$0x3f] }
 0x1e5   : > { %v1796_v31 = vpack.c.bf16 %v1768_v32, %v1768_v32 }
 0x1e6   : > { %1939 = vrot.lane.b32.xlu0 %v1882_v38, %s4196_s19 }
 0x1e7   : > { %1826 = vst.msk [vmem:[#allocation3 + $0x8] sm:$0x7] %vm1825_vm3, %v1796_v31 }
 0x1e8   : > { %v1632_v50 = vpop.permute.xlu2 %1631  ;;  %v1769_v45 = vld [vmem:[#allocation2 + $0x10] sm:$0xff] }
 0x1e9   : > { %1723 = vst.msk [vmem:[#allocation2 + $0x28] sm:$0xff] %vm1717_vm8, %v1632_v50  ;;  %v1628_v46 = vpop.permute.xlu0 %1627  ;;  %v1853_v63 = vld [vmem:[#allocation2 + $0x1] sm:$0xff]  ;;  %v6328_v29 = vpack.c.bf16 %v1769_v45, %v1769_v45 }
 0x1ea   : > { %v1767_v7 = vld [vmem:[#allocation2] sm:$0xff]  ;;  %1721 = vst.msk [vmem:[#allocation2 + $0x18] sm:$0xff] %vm1717_vm8, %v1628_v46  ;;  %v1881_v25 = vpack.c.bf16 %v1853_v63, %v1853_v63 }
 0x1eb   : > { %v1636_v28 = vpop.permute.xlu1 %1635  ;;  %v1795_v47 = vpack.c.bf16 %v1767_v7, %v1767_v7  ;;  %v1771_v27 = vld [vmem:[#allocation2 + $0x20] sm:$0xff]  ;;  %1827 = vst.msk [vmem:[#allocation3 + $0x10] sm:$0xf] %vm1823_vm11, %v6328_v29 }
 0x1ec   : > { %1725 = vst.msk [vmem:[#allocation2 + $0x38] sm:$0xff] %vm1717_vm8, %v1636_v28  ;;  %v6332_v58 = vpack.c.bf16 %v1771_v27, %v1771_v27  ;;  %1937 = vrot.lane.b32.xlu2 %v1881_v25, %s4196_s19 }
 0x1ed   : > { %1824 = vst.msk [vmem:[#allocation3] sm:$0xf] %vm1823_vm11, %v1795_v47 }
 0x1ee   : > { %1829 = vst.msk [vmem:[#allocation3 + $0x20] sm:$0xf] %vm1823_vm11, %v6332_v58 }
 0x1f0   : > { %v1638_v62 = vpop.permute.xlu2 %1637  ;;  %v1857_v56 = vld [vmem:[#allocation2 + $0x21] sm:$0xff]  ;;  %v1858_v42 = vld [vmem:[#allocation2 + $0x29] sm:$0x3f] }
 0x1f1   : > { %1726 = vst.msk [vmem:[#allocation2 + $0x40] sm:$0xff] %vm1717_vm8, %v1638_v62  ;;  %v1634_v11 = vpop.permute.xlu0 %1633  ;;  %v6341_v40 = vpack.c.bf16 %v1857_v56, %v1857_v56  ;;  %v1855_v57 = vld [vmem:[#allocation2 + $0x11] sm:$0xff]  ;;  %v1856_v6 = vld [vmem:[#allocation2 + $0x19] sm:$0x3f]  ;;  %v1772_v43 = vld [vmem:[#allocation2 + $0x28] sm:$0x3f]  ;;  %v1886_v15 = vpack.c.bf16 %v1858_v42, %v1858_v42 }
 0x1f2   : > { %1724 = vst.msk [vmem:[#allocation2 + $0x30] sm:$0xff] %vm1717_vm8, %v1634_v11  ;;  %v6344_v51 = vpack.c.bf16 %v1855_v57, %v1855_v57  ;;  %v1884_v10 = vpack.c.bf16 %v1856_v6, %v1856_v6  ;;  %v1770_v59 = vld [vmem:[#allocation2 + $0x18] sm:$0x3f]  ;;  %v1800_v33 = vpack.c.bf16 %v1772_v43, %v1772_v43 }
 0x1f3   : > { %v1642_v35 = vpop.permute.xlu1 %1641  ;;  %1945 = vrot.lane.b32.xlu0 %v6341_v40, %s4196_s19  ;;  %v1860_v44 = vld [vmem:[#allocation2 + $0x39] sm:$0x3f]  ;;  %v1798_v0 = vpack.c.bf16 %v1770_v59, %v1770_v59 }
 0x1f4   : > { %1728 = vst.msk [vmem:[#allocation2 + $0x50] sm:$0xff] %vm1717_vm8, %v1642_v35  ;;  %1941 = vrot.lane.b32.xlu1 %v6344_v51, %s4196_s19  ;;  %1943 = vrot.lane.b32.xlu2 %v1884_v10, %s4196_s19  ;;  %v1774_v53 = vld [vmem:[#allocation2 + $0x38] sm:$0x3f]  ;;  %v1888_v5 = vpack.c.bf16 %v1860_v44, %v1860_v44 }
 0x1f5   : > { %v1802_v54 = vpack.c.bf16 %v1774_v53, %v1774_v53  ;;  %1828 = vst.msk [vmem:[#allocation3 + $0x18] sm:$0x7] %vm1825_vm3, %v1798_v0 }
 0x1f6   : > { %1830 = vst.msk [vmem:[#allocation3 + $0x28] sm:$0x7] %vm1825_vm3, %v1800_v33 }
 0x1f7   : > { %1832 = vst.msk [vmem:[#allocation3 + $0x38] sm:$0x7] %vm1825_vm3, %v1802_v54 }
 0x1f8   : > { %v1644_v12 = vpop.permute.xlu2 %1643  ;;  %v1775_v18 = vld [vmem:[#allocation2 + $0x40] sm:$0xff] }
 0x1f9   : > { %1729 = vst.msk [vmem:[#allocation2 + $0x58] sm:$0xff] %vm1717_vm8, %v1644_v12  ;;  %v1640_v14 = vpop.permute.xlu0 %1639  ;;  %v1859_v48 = vld [vmem:[#allocation2 + $0x31] sm:$0xff]  ;;  %v6356_v1 = vpack.c.bf16 %v1775_v18, %v1775_v18 }
 0x1fa   : > { %v1773_v30 = vld [vmem:[#allocation2 + $0x30] sm:$0xff]  ;;  %1727 = vst.msk [vmem:[#allocation2 + $0x48] sm:$0xff] %vm1717_vm8, %v1640_v14  ;;  %v6359_v49 = vpack.c.bf16 %v1859_v48, %v1859_v48 }
 0x1fb   : > { %v1648_v21 = vpop.permute.xlu1 %1647  ;;  %v6361_v55 = vpack.c.bf16 %v1773_v30, %v1773_v30  ;;  %v1777_v16 = vld [vmem:[#allocation2 + $0x50] sm:$0xff]  ;;  %1951 = vrot.lane.b32.xlu0 %v1888_v5, %s4196_s19  ;;  %1833 = vst.msk [vmem:[#allocation3 + $0x40] sm:$0xf] %vm1823_vm11, %v6356_v1 }
 0x1fc   : > { %1731 = vst.msk [vmem:[#allocation2 + $0x68] sm:$0xff] %vm1717_vm8, %v1648_v21  ;;  %v6365_v4 = vpack.c.bf16 %v1777_v16, %v1777_v16  ;;  %1947 = vrot.lane.b32.xlu1 %v1886_v15, %s4196_s19  ;;  %1949 = vrot.lane.b32.xlu2 %v6359_v49, %s4196_s19 }
 0x1fd   : > { %1831 = vst.msk [vmem:[#allocation3 + $0x30] sm:$0xf] %vm1823_vm11, %v6361_v55 }
 0x1fe   : > { %1835 = vst.msk [vmem:[#allocation3 + $0x50] sm:$0xf] %vm1823_vm11, %v6365_v4 }
 0x200   : > { %v1650_v52 = vpop.permute.xlu2 %1649  ;;  %v1863_v37 = vld [vmem:[#allocation2 + $0x51] sm:$0xff]  ;;  %v1864_v24 = vld [vmem:[#allocation2 + $0x59] sm:$0x3f] }
 0x201   : > { %1732 = vst.msk [vmem:[#allocation2 + $0x70] sm:$0xff] %vm1717_vm8, %v1650_v52  ;;  %v1646_v20 = vpop.permute.xlu0 %1645  ;;  %v6377_v60 = vpack.c.bf16 %v1863_v37, %v1863_v37  ;;  %v1861_v61 = vld [vmem:[#allocation2 + $0x41] sm:$0xff]  ;;  %v1862_v34 = vld [vmem:[#allocation2 + $0x49] sm:$0x3f]  ;;  %v1778_v8 = vld [vmem:[#allocation2 + $0x58] sm:$0x3f]  ;;  %v1892_v45 = vpack.c.bf16 %v1864_v24, %v1864_v24 }
 0x202   : > { %1730 = vst.msk [vmem:[#allocation2 + $0x60] sm:$0xff] %vm1717_vm8, %v1646_v20  ;;  %v6380_v2 = vpack.c.bf16 %v1861_v61, %v1861_v61  ;;  %v1890_v36 = vpack.c.bf16 %v1862_v34, %v1862_v34  ;;  %v1776_v39 = vld [vmem:[#allocation2 + $0x48] sm:$0x3f]  ;;  %v1806_v22 = vpack.c.bf16 %v1778_v8, %v1778_v8 }
 0x203   : > { %v1654_v41 = vpop.permute.xlu1 %1653  ;;  %1957 = vrot.lane.b32.xlu0 %v6377_v60, %s4196_s19  ;;  %v1866_v3 = vld [vmem:[#allocation2 + $0x69] sm:$0x3f]  ;;  %v1804_v23 = vpack.c.bf16 %v1776_v39, %v1776_v39 }
 0x204   : > { %1734 = vst.msk [vmem:[#allocation2 + $0x80] sm:$0xff] %vm1717_vm8, %v1654_v41  ;;  %1953 = vrot.lane.b32.xlu1 %v6380_v2, %s4196_s19  ;;  %1955 = vrot.lane.b32.xlu2 %v1890_v36, %s4196_s19  ;;  %v1780_v19 = vld [vmem:[#allocation2 + $0x68] sm:$0x3f]  ;;  %v1894_v13 = vpack.c.bf16 %v1866_v3, %v1866_v3 }
 0x205   : > { %v1808_v26 = vpack.c.bf16 %v1780_v19, %v1780_v19  ;;  %1834 = vst.msk [vmem:[#allocation3 + $0x48] sm:$0x7] %vm1825_vm3, %v1804_v23 }
 0x206   : > { %1836 = vst.msk [vmem:[#allocation3 + $0x58] sm:$0x7] %vm1825_vm3, %v1806_v22 }
 0x207   : > { %1838 = vst.msk [vmem:[#allocation3 + $0x68] sm:$0x7] %vm1825_vm3, %v1808_v26 }
 0x208   : > { %v1656_v17 = vpop.permute.xlu2 %1655  ;;  %v1781_v9 = vld [vmem:[#allocation2 + $0x70] sm:$0xff] }
 0x209   : > { %1735 = vst.msk [vmem:[#allocation2 + $0x88] sm:$0xff] %vm1717_vm8, %v1656_v17  ;;  %v1652_v38 = vpop.permute.xlu0 %1651  ;;  %v1865_v32 = vld [vmem:[#allocation2 + $0x61] sm:$0xff]  ;;  %v6392_v50 = vpack.c.bf16 %v1781_v9, %v1781_v9 }
 0x20a   : > { %v1779_v31 = vld [vmem:[#allocation2 + $0x60] sm:$0xff]  ;;  %1733 = vst.msk [vmem:[#allocation2 + $0x78] sm:$0xff] %vm1717_vm8, %v1652_v38  ;;  %v6395_v46 = vpack.c.bf16 %v1865_v32, %v1865_v32 }
 0x20b   : > { %v1660_v63 = vpop.permute.xlu1 %1659  ;;  %v6397_v7 = vpack.c.bf16 %v1779_v31, %v1779_v31  ;;  %v1783_v25 = vld [vmem:[#allocation2 + $0x80] sm:$0xff]  ;;  %1963 = vrot.lane.b32.xlu0 %v1894_v13, %s4196_s19  ;;  %1839 = vst.msk [vmem:[#allocation3 + $0x70] sm:$0xf] %vm1823_vm11, %v6392_v50 }
 0x20c   : > { %1737 = vst.msk [vmem:[#allocation2 + $0x98] sm:$0xff] %vm1717_vm8, %v1660_v63  ;;  %v6401_v28 = vpack.c.bf16 %v1783_v25, %v1783_v25  ;;  %1959 = vrot.lane.b32.xlu1 %v1892_v45, %s4196_s19  ;;  %1961 = vrot.lane.b32.xlu2 %v6395_v46, %s4196_s19 }
 0x20d   : > { %1837 = vst.msk [vmem:[#allocation3 + $0x60] sm:$0xf] %vm1823_vm11, %v6397_v7 }
 0x20e   : > { %1841 = vst.msk [vmem:[#allocation3 + $0x80] sm:$0xf] %vm1823_vm11, %v6401_v28 }
 0x210   : > { %v1662_v47 = vpop.permute.xlu2 %1661  ;;  %v1869_v27 = vld [vmem:[#allocation2 + $0x81] sm:$0xff]  ;;  %v1870_v42 = vld [vmem:[#allocation2 + $0x89] sm:$0x3f] }
 0x211   : > { %1738 = vst.msk [vmem:[#allocation2 + $0xa0] sm:$0xff] %vm1717_vm8, %v1662_v47  ;;  %v1658_v62 = vpop.permute.xlu0 %1657  ;;  %v6413_v56 = vpack.c.bf16 %v1869_v27, %v1869_v27  ;;  %v1867_v11 = vld [vmem:[#allocation2 + $0x71] sm:$0xff]  ;;  %v1868_v57 = vld [vmem:[#allocation2 + $0x79] sm:$0x3f]  ;;  %v1784_v43 = vld [vmem:[#allocation2 + $0x88] sm:$0x3f]  ;;  %v1898_v21 = vpack.c.bf16 %v1870_v42, %v1870_v42 }
 0x212   : > { %1736 = vst.msk [vmem:[#allocation2 + $0x90] sm:$0xff] %vm1717_vm8, %v1658_v62  ;;  %v6416_v6 = vpack.c.bf16 %v1867_v11, %v1867_v11  ;;  %v1896_v10 = vpack.c.bf16 %v1868_v57, %v1868_v57  ;;  %v1782_v59 = vld [vmem:[#allocation2 + $0x78] sm:$0x3f]  ;;  %v1812_v33 = vpack.c.bf16 %v1784_v43, %v1784_v43 }
 0x213   : > { %v1666_v35 = vpop.permute.xlu1 %1665  ;;  %1969 = vrot.lane.b32.xlu0 %v6413_v56, %s4196_s19  ;;  %v1872_v44 = vld [vmem:[#allocation2 + $0x99] sm:$0x3f]  ;;  %v1810_v0 = vpack.c.bf16 %v1782_v59, %v1782_v59 }
 0x214   : > { %1740 = vst.msk [vmem:[#allocation2 + $0xb0] sm:$0xff] %vm1717_vm8, %v1666_v35  ;;  %1965 = vrot.lane.b32.xlu1 %v6416_v6, %s4196_s19  ;;  %1967 = vrot.lane.b32.xlu2 %v1896_v10, %s4196_s19  ;;  %v1786_v53 = vld [vmem:[#allocation2 + $0x98] sm:$0x3f]  ;;  %v1900_v5 = vpack.c.bf16 %v1872_v44, %v1872_v44  ;;  %v2051_v35 = vld [vmem:[#allocation2 + $0x2] sm:$0xff] }
 0x215   : > { %v1814_v54 = vpack.c.bf16 %v1786_v53, %v1786_v53  ;;  %1840 = vst.msk [vmem:[#allocation3 + $0x78] sm:$0x7] %vm1825_vm3, %v1810_v0  ;;  %v2079_v0 = vpack.c.bf16 %v2051_v35, %v2051_v35  ;;  %v2064_v35 = vld [vmem:[#allocation2 + $0x6a] sm:$0x3f] }
 0x216   : > { %1842 = vst.msk [vmem:[#allocation3 + $0x88] sm:$0x7] %vm1825_vm3, %v1812_v33 }
 0x217   : > { %1844 = vst.msk [vmem:[#allocation3 + $0x98] sm:$0x7] %vm1825_vm3, %v1814_v54 }
 0x218   : > { %v1668_v12 = vpop.permute.xlu2 %1667  ;;  %v1787_v18 = vld [vmem:[#allocation2 + $0xa0] sm:$0xff] }
 0x219   : > { %1741 = vst.msk [vmem:[#allocation2 + $0xb8] sm:$0xff] %vm1717_vm8, %v1668_v12  ;;  %v1664_v14 = vpop.permute.xlu0 %1663  ;;  %v1871_v48 = vld [vmem:[#allocation2 + $0x91] sm:$0xff]  ;;  %v6428_v15 = vpack.c.bf16 %v1787_v18, %v1787_v18  ;;  %v2054_v12 = vld [vmem:[#allocation2 + $0x1a] sm:$0x3f]  ;;  %v2052_v18 = vld [vmem:[#allocation2 + $0xa] sm:$0x3f] }
 0x21a   : > { %v1785_v30 = vld [vmem:[#allocation2 + $0x90] sm:$0xff]  ;;  %1739 = vst.msk [vmem:[#allocation2 + $0xa8] sm:$0xff] %vm1717_vm8, %v1664_v14  ;;  %v6431_v16 = vpack.c.bf16 %v1871_v48, %v1871_v48 }
 0x21b   : > { %v1672_v52 = vpop.permute.xlu1 %1671  ;;  %v6433_v37 = vpack.c.bf16 %v1785_v30, %v1785_v30  ;;  %v1789_v20 = vld [vmem:[#allocation2 + $0xb0] sm:$0xff]  ;;  %1975 = vrot.lane.b32.xlu0 %v1900_v5, %s4196_s19  ;;  %1845 = vst.msk [vmem:[#allocation3 + $0xa0] sm:$0xf] %vm1823_vm11, %v6428_v15  ;;  %v2082_v30 = vpack.c.bf16 %v2054_v12, %v2054_v12  ;;  %v2068_v12 = vld [vmem:[#allocation2 + $0x8a] sm:$0x3f] }
 0x21c   : > { %1743 = vst.msk [vmem:[#allocation2 + $0xc8] sm:$0xff] %vm1717_vm8, %v1672_v52  ;;  %v6437_v61 = vpack.c.bf16 %v1789_v20, %v1789_v20  ;;  %1971 = vrot.lane.b32.xlu1 %v1898_v21, %s4196_s19  ;;  %1973 = vrot.lane.b32.xlu2 %v6431_v16, %s4196_s19  ;;  %v2053_v14 = vld [vmem:[#allocation2 + $0x12] sm:$0xff]  ;;  %v2080_v21 = vpack.c.bf16 %v2052_v18, %v2052_v18 }
 0x21d   : > { %1843 = vst.msk [vmem:[#allocation3 + $0x90] sm:$0xf] %vm1823_vm11, %v6433_v37  ;;  %v6488_v52 = vpack.c.bf16 %v2053_v14, %v2053_v14  ;;  %v2057_v20 = vld [vmem:[#allocation2 + $0x32] sm:$0xff] }
 0x21e   : > { %1847 = vst.msk [vmem:[#allocation3 + $0xb0] sm:$0xf] %vm1823_vm11, %v6437_v61 }
 0x220   : > { %v1875_v34 = vld [vmem:[#allocation2 + $0xb1] sm:$0xff]  ;;  %v1674_v36 = vpop.permute.xlu2 %1673  ;;  %v1876_v31 = vld [vmem:[#allocation2 + $0xb9] sm:$0x3f] }
 0x221   : > { %v1670_v41 = vpop.permute.xlu0 %1669  ;;  %v6448_v39 = vpack.c.bf16 %v1875_v34, %v1875_v34  ;;  %v1873_v3 = vld [vmem:[#allocation2 + $0xa1] sm:$0xff]  ;;  %v1874_v23 = vld [vmem:[#allocation2 + $0xa9] sm:$0x3f]  ;;  %1744 = vst.msk [vmem:[#allocation2 + $0xd0] sm:$0xff] %vm1717_vm8, %v1674_v36  ;;  %v1790_v26 = vld [vmem:[#allocation2 + $0xb8] sm:$0x3f]  ;;  %v1904_v11 = vpack.c.bf16 %v1876_v31, %v1876_v31 }
 0x222   : > { %1742 = vst.msk [vmem:[#allocation2 + $0xc0] sm:$0xff] %vm1717_vm8, %v1670_v41  ;;  %v6452_v8 = vpack.c.bf16 %v1873_v3, %v1873_v3  ;;  %v1902_v19 = vpack.c.bf16 %v1874_v23, %v1874_v23  ;;  %v1788_v22 = vld [vmem:[#allocation2 + $0xa8] sm:$0x3f]  ;;  %v1818_v17 = vpack.c.bf16 %v1790_v26, %v1790_v26  ;;  %v6494_v41 = vpack.c.bf16 %v2057_v20, %v2057_v20  ;;  %v2058_v26 = vld [vmem:[#allocation2 + $0x3a] sm:$0x3f]  ;;  %v2061_v31 = vld [vmem:[#allocation2 + $0x52] sm:$0xff] }
 0x223   : > { %1981 = vrot.lane.b32.xlu0 %v6448_v39, %s4196_s19  ;;  %v1878_v13 = vld [vmem:[#allocation2 + $0xc9] sm:$0x3f]  ;;  %v1816_v24 = vpack.c.bf16 %v1788_v22, %v1788_v22  ;;  %v1678_v59 = vpop.permute.xlu1 %1677 }
 0x224   : > { %1977 = vrot.lane.b32.xlu1 %v6452_v8, %s4196_s19  ;;  %1979 = vrot.lane.b32.xlu2 %v1902_v19, %s4196_s19  ;;  %v1792_v9 = vld [vmem:[#allocation2 + $0xc8] sm:$0x3f]  ;;  %v1906_v32 = vpack.c.bf16 %v1878_v13, %v1878_v13  ;;  %1848 = vst.msk [vmem:[#allocation3 + $0xb8] sm:$0x7] %vm1825_vm3, %v1818_v17  ;;  %v2086_v17 = vpack.c.bf16 %v2058_v26, %v2058_v26 }
 0x225   : > { %v1820_v38 = vpack.c.bf16 %v1792_v9, %v1792_v9  ;;  %1846 = vst.msk [vmem:[#allocation3 + $0xa8] sm:$0x7] %vm1825_vm3, %v1816_v24  ;;  %v2055_v34 = vld [vmem:[#allocation2 + $0x22] sm:$0xff]  ;;  %v2056_v36 = vld [vmem:[#allocation2 + $0x2a] sm:$0x3f] }
 0x226   : > { %1746 = vst.msk [vmem:[#allocation2 + $0xe0] sm:$0xff] %vm1717_vm8, %v1678_v59  ;;  %v6496_v3 = vpack.c.bf16 %v2055_v34, %v2055_v34  ;;  %v2084_v23 = vpack.c.bf16 %v2056_v36, %v2056_v36  ;;  %v2060_v22 = vld [vmem:[#allocation2 + $0x4a] sm:$0x3f]  ;;  %v2059_v13 = vld [vmem:[#allocation2 + $0x42] sm:$0xff]  ;;  %v2065_v59 = vld [vmem:[#allocation2 + $0x72] sm:$0xff] }
 0x227   : > { %1850 = vst.msk [vmem:[#allocation3 + $0xc8] sm:$0x7] %vm1825_vm3, %v1820_v38  ;;  %v2088_v24 = vpack.c.bf16 %v2060_v22, %v2060_v22  ;;  %v6504_v9 = vpack.c.bf16 %v2059_v13, %v2059_v13  ;;  %v2072_v34 = vld [vmem:[#allocation2 + $0xaa] sm:$0x3f]  ;;  %v2070_v36 = vld [vmem:[#allocation2 + $0x9a] sm:$0x3f] }
 0x228   : > { %v1680_v45 = vpop.permute.xlu2 %1679  ;;  %v1793_v63 = vld [vmem:[#allocation2 + $0xd0] sm:$0xff]  ;;  %v2098_v22 = vpack.c.bf16 %v2070_v36, %v2070_v36 }
 0x229   : > { %v1676_v25 = vpop.permute.xlu0 %1675  ;;  %v1877_v47 = vld [vmem:[#allocation2 + $0xc1] sm:$0xff]  ;;  %1747 = vst.msk [vmem:[#allocation2 + $0xe8] sm:$0xff] %vm1717_vm8, %v1680_v45  ;;  %v6463_v62 = vpack.c.bf16 %v1793_v63, %v1793_v63  ;;  %v2062_v45 = vld [vmem:[#allocation2 + $0x5a] sm:$0x3f] }
 0x22a   : > { %v1791_v27 = vld [vmem:[#allocation2 + $0xc0] sm:$0xff]  ;;  %1745 = vst.msk [vmem:[#allocation2 + $0xd8] sm:$0xff] %vm1717_vm8, %v1676_v25  ;;  %v6466_v57 = vpack.c.bf16 %v1877_v47, %v1877_v47  ;;  %v6513_v25 = vpack.c.bf16 %v2061_v31, %v2061_v31  ;;  %v2090_v47 = vpack.c.bf16 %v2062_v45, %v2062_v45  ;;  %v2074_v31 = vld [vmem:[#allocation2 + $0xba] sm:$0x3f] }
 0x22b   : > { %v6468_v10 = vpack.c.bf16 %v1791_v27, %v1791_v27  ;;  %1987 = vrot.lane.b32.xlu0 %v1906_v32, %s4196_s19  ;;  %1851 = vst.msk [vmem:[#allocation3 + $0xd0] sm:$0xf] %vm1823_vm11, %v6463_v62  ;;  %v1684_v48 = vpop.permute.xlu1 %1683  ;;  %v2063_v32 = vld [vmem:[#allocation2 + $0x62] sm:$0xff] }
 0x22c   : > { %1983 = vrot.lane.b32.xlu1 %v1904_v11, %s4196_s19  ;;  %1985 = vrot.lane.b32.xlu2 %v6466_v57, %s4196_s19  ;;  %1749 = vst.msk [vmem:[#allocation2 + $0xf8] sm:$0xff] %vm1717_vm8, %v1684_v48  ;;  %v6511_v63 = vpack.c.bf16 %v2063_v32, %v2063_v32  ;;  %v2066_v11 = vld [vmem:[#allocation2 + $0x7a] sm:$0x3f]  ;;  %v2096_v48 = vpack.c.bf16 %v2068_v12, %v2068_v12  ;;  %v2073_v32 = vld [vmem:[#allocation2 + $0xb2] sm:$0xff] }
 0x22d   : > { %1849 = vst.msk [vmem:[#allocation3 + $0xc0] sm:$0xf] %vm1823_vm11, %v6468_v10  ;;  %vm1751_vm11 = vcmask 424967  }
 0x231   : > { %v1879_v44 = vld [vmem:[#allocation2 + $0xd1] sm:$0xff]  ;;  %v1880_v43 = vld [vmem:[#allocation2 + $0xd9] sm:$0x3f]  ;;  %v1682_v42 = vpop.permute.xlu0 %1681 }
 0x232   : > { %v6479_v53 = vpack.c.bf16 %v1879_v44, %v1879_v44  ;;  %v1908_v33 = vpack.c.bf16 %v1880_v43, %v1880_v43  ;;  %v1794_v54 = vld [vmem:[#allocation2 + $0xd8] sm:$0x3f]  ;;  %1748 = vst.msk [vmem:[#allocation2 + $0xf0] sm:$0xff] %vm1717_vm8, %v1682_v42  ;;  %v2092_v43 = vpack.c.bf16 %v2064_v35, %v2064_v35  ;;  %v2067_v42 = vld [vmem:[#allocation2 + $0x82] sm:$0xff]  ;;  %vm6863_vm8 = vmor %vm3071_vm2, %vm3070_vm4 }
 0x233   : > { %2135 = vrot.lane.b32.xlu0 %v2079_v0, %s4197_s20  ;;  %v1822_v5 = vpack.c.bf16 %v1794_v54, %v1794_v54  ;;  %v2094_v0 = vpack.c.bf16 %v2066_v11, %v2066_v11  ;;  %v6531_v14 = vpack.c.bf16 %v2067_v42, %v2067_v42 }
 0x234   : > { %1989 = vrot.lane.b32.xlu1 %v6479_v53, %s4196_s19  ;;  %1991 = vrot.lane.b32.xlu2 %v1908_v33, %s4196_s19  ;;  %v6522_v33 = vpack.c.bf16 %v2065_v59, %v2065_v59 }
 0x235   : > { %1852 = vst.msk [vmem:[#allocation3 + $0xd8] sm:$0x7] %vm1825_vm3, %v1822_v5  ;;  %v2069_v5 = vld [vmem:[#allocation2 + $0x92] sm:$0xff]  ;;  %vm1750_vm3 = vcmask 1043459  }
 0x236   : > { %v6529_v18 = vpack.c.bf16 %v2069_v5, %v2069_v5 }
 0x23b   : > { %2141 = vrot.lane.b32.xlu0 %v2082_v30, %s4197_s20 }
 0x23c   : > { %2137 = vrot.lane.b32.xlu1 %v2080_v21, %s4197_s20  ;;  %2139 = vrot.lane.b32.xlu2 %v6488_v52, %s4197_s20 }
 0x243   : > { %2147 = vrot.lane.b32.xlu0 %v6494_v41, %s4197_s20 }
 0x244   : > { %2143 = vrot.lane.b32.xlu1 %v6496_v3, %s4197_s20  ;;  %2145 = vrot.lane.b32.xlu2 %v2084_v23, %s4197_s20  ;;  %v2071_v23 = vld [vmem:[#allocation2 + $0xa2] sm:$0xff] }
 0x245   : > { %v6541_v26 = vpack.c.bf16 %v2071_v23, %v2071_v23 }
 0x246   : > { %v1938_v19 = vpop.permute.xlu2 %1937 }
 0x247   : > { %2022 = vst.msk [vmem:[#allocation3] sm:$0xf] %vm2021_vm1, %v1938_v19  ;;  %v2100_v19 = vpack.c.bf16 %v2072_v34, %v2072_v34 }
 0x24b   : > { %2153 = vrot.lane.b32.xlu0 %v2088_v24, %s4197_s20 }
 0x24c   : > { %2149 = vrot.lane.b32.xlu1 %v2086_v17, %s4197_s20  ;;  %2151 = vrot.lane.b32.xlu2 %v6504_v9, %s4197_s20 }
 0x24e   : > { %v1944_v38 = vpop.permute.xlu2 %1943 }
 0x24f   : > { %2026 = vst.msk [vmem:[#allocation3 + $0x18] sm:$0x7] %vm2023_vm6, %v1944_v38  ;;  %v2075_v38 = vld [vmem:[#allocation2 + $0xc2] sm:$0xff] }
 0x250   : > { %v6550_v45 = vpack.c.bf16 %v2075_v38, %v2075_v38  ;;  %v2257_v38 = vld [vmem:[#allocation2 + $0x48] sm:$0x3f] }
 0x253   : > { %2159 = vrot.lane.b32.xlu0 %v6511_v63, %s4197_s20 }
 0x254   : > { %2155 = vrot.lane.b32.xlu1 %v6513_v25, %s4197_s20  ;;  %2157 = vrot.lane.b32.xlu2 %v2090_v47, %s4197_s20  ;;  %v6552_v47 = vpack.c.bf16 %v2073_v32, %v2073_v32  ;;  %v2285_v32 = vpack.c.bf16 %v2257_v38, %v2257_v38 }
 0x256   : > { %v1950_v27 = vpop.permute.xlu2 %1949 }
 0x257   : > { %2029 = vst.msk [vmem:[#allocation3 + $0x30] sm:$0xf] %vm2021_vm1, %v1950_v27  ;;  %v2102_v27 = vpack.c.bf16 %v2074_v31, %v2074_v31 }
 0x258   : > { %v1940_v44 = vpop.permute.xlu0 %1939 }
 0x259   : > { %2024 = vst.msk [vmem:[#allocation3 + $0x8] sm:$0x7] %vm2023_vm6, %v1940_v44  ;;  %v2078_v44 = vld [vmem:[#allocation2 + $0xda] sm:$0x3f] }
 0x25b   : > { %2165 = vrot.lane.b32.xlu0 %v2094_v0, %s4197_s20  ;;  %v2076_v0 = vld [vmem:[#allocation2 + $0xca] sm:$0x3f] }
 0x25c   : > { %2161 = vrot.lane.b32.xlu1 %v2092_v43, %s4197_s20  ;;  %2163 = vrot.lane.b32.xlu2 %v6522_v33, %s4197_s20  ;;  %v2077_v43 = vld [vmem:[#allocation2 + $0xd2] sm:$0xff]  ;;  %v2104_v5 = vpack.c.bf16 %v2076_v0, %v2076_v0 }
 0x25d   : > { %v6562_v42 = vpack.c.bf16 %v2077_v43, %v2077_v43  ;;  %v2263_v43 = vld [vmem:[#allocation2 + $0x78] sm:$0x3f] }
 0x25e   : > { %v1956_v54 = vpop.permute.xlu2 %1955 }
 0x25f   : > { %2032 = vst.msk [vmem:[#allocation3 + $0x48] sm:$0x7] %vm2023_vm6, %v1956_v54  ;;  %v2106_v54 = vpack.c.bf16 %v2078_v44, %v2078_v44 }
 0x263   : > { %2171 = vrot.lane.b32.xlu0 %v6529_v18, %s4197_s20 }
 0x264   : > { %2167 = vrot.lane.b32.xlu1 %v6531_v14, %s4197_s20  ;;  %2169 = vrot.lane.b32.xlu2 %v2096_v48, %s4197_s20 }
 0x265   : > { %v1946_v30 = vpop.permute.xlu0 %1945 }
 0x266   : > { %v1942_v21 = vpop.permute.xlu1 %1941  ;;  %2027 = vst.msk [vmem:[#allocation3 + $0x20] sm:$0xf] %vm2021_vm1, %v1946_v30  ;;  %v1962_v20 = vpop.permute.xlu2 %1961 }
 0x267   : > { %2025 = vst.msk [vmem:[#allocation3 + $0x10] sm:$0xf] %vm2021_vm1, %v1942_v21  ;;  %v2251_v21 = vld [vmem:[#allocation2 + $0x18] sm:$0x3f] }
 0x268   : > { %2035 = vst.msk [vmem:[#allocation3 + $0x60] sm:$0xf] %vm2021_vm1, %v1962_v20  ;;  %v2279_v20 = vpack.c.bf16 %v2251_v21, %v2251_v21 }
 0x26b   : > { %2177 = vrot.lane.b32.xlu0 %v2100_v19, %s4197_s20  ;;  %v2255_v19 = vld [vmem:[#allocation2 + $0x38] sm:$0x3f] }
 0x26c   : > { %2173 = vrot.lane.b32.xlu1 %v2098_v22, %s4197_s20  ;;  %2175 = vrot.lane.b32.xlu2 %v6541_v26, %s4197_s20  ;;  %v2253_v22 = vld [vmem:[#allocation2 + $0x28] sm:$0x3f] }
 0x26d   : > { %v1952_v13 = vpop.permute.xlu0 %1951 }
 0x26e   : > { %v1948_v24 = vpop.permute.xlu1 %1947  ;;  %2030 = vst.msk [vmem:[#allocation3 + $0x38] sm:$0x7] %vm2023_vm6, %v1952_v13  ;;  %v1968_v17 = vpop.permute.xlu2 %1967  ;;  %v2283_v13 = vpack.c.bf16 %v2255_v19, %v2255_v19 }
 0x26f   : > { %2028 = vst.msk [vmem:[#allocation3 + $0x28] sm:$0x7] %vm2023_vm6, %v1948_v24  ;;  %v2281_v24 = vpack.c.bf16 %v2253_v22, %v2253_v22 }
 0x270   : > { %2038 = vst.msk [vmem:[#allocation3 + $0x78] sm:$0x7] %vm2023_vm6, %v1968_v17 }
 0x273   : > { %2183 = vrot.lane.b32.xlu0 %v6550_v45, %s4197_s20 }
 0x274   : > { %2179 = vrot.lane.b32.xlu1 %v6552_v47, %s4197_s20  ;;  %2181 = vrot.lane.b32.xlu2 %v2102_v27, %s4197_s20 }
 0x275   : > { %v1958_v11 = vpop.permute.xlu0 %1957 }
 0x276   : > { %v1954_v35 = vpop.permute.xlu1 %1953  ;;  %2033 = vst.msk [vmem:[#allocation3 + $0x50] sm:$0xf] %vm2021_vm1, %v1958_v11  ;;  %v1974_v59 = vpop.permute.xlu2 %1973  ;;  %v2261_v11 = vld [vmem:[#allocation2 + $0x68] sm:$0x3f] }
 0x277   : > { %2031 = vst.msk [vmem:[#allocation3 + $0x40] sm:$0xf] %vm2021_vm1, %v1954_v35  ;;  %v2259_v35 = vld [vmem:[#allocation2 + $0x58] sm:$0x3f] }
 0x278   : > { %2041 = vst.msk [vmem:[#allocation3 + $0x90] sm:$0xf] %vm2021_vm1, %v1974_v59  ;;  %v2289_v59 = vpack.c.bf16 %v2261_v11, %v2261_v11  ;;  %v2287_v44 = vpack.c.bf16 %v2259_v35, %v2259_v35 }
 0x27b   : > { %2189 = vrot.lane.b32.xlu0 %v2106_v54, %s4197_s20  ;;  %v2291_v54 = vpack.c.bf16 %v2263_v43, %v2263_v43 }
 0x27c   : > { %2185 = vrot.lane.b32.xlu1 %v2104_v5, %s4197_s20  ;;  %2187 = vrot.lane.b32.xlu2 %v6562_v42, %s4197_s20 }
 0x27d   : > { %v1964_v12 = vpop.permute.xlu0 %1963 }
 0x27e   : > { %v1960_v48 = vpop.permute.xlu1 %1959  ;;  %2036 = vst.msk [vmem:[#allocation3 + $0x68] sm:$0x7] %vm2023_vm6, %v1964_v12  ;;  %v1980_v30 = vpop.permute.xlu2 %1979 }
 0x27f   : > { %2034 = vst.msk [vmem:[#allocation3 + $0x58] sm:$0x7] %vm2023_vm6, %v1960_v48  ;;  %v2267_v48 = vld [vmem:[#allocation2 + $0x98] sm:$0x3f] }
 0x280   : > { %2044 = vst.msk [vmem:[#allocation3 + $0xa8] sm:$0x7] %vm2023_vm6, %v1980_v30  ;;  %v2265_v30 = vld [vmem:[#allocation2 + $0x88] sm:$0x3f]  ;;  %v2295_v21 = vpack.c.bf16 %v2267_v48, %v2267_v48 }
 0x283   : > { %2338 = vrot.lane.b32.xlu0 %v6332_v58, %s4198_s21 }
 0x284   : > { %2334 = vrot.lane.b32.xlu1 %v6328_v29, %s4198_s21  ;;  %2336 = vrot.lane.b32.xlu2 %v2279_v20, %s4198_s21  ;;  %v2293_v20 = vpack.c.bf16 %v2265_v30, %v2265_v30  ;;  %v2455_v30 = vld [vmem:[#allocation2 + $0x49] sm:$0x3f] }
 0x285   : > { %v1970_v34 = vpop.permute.xlu0 %1969 }
 0x286   : > { %v1966_v36 = vpop.permute.xlu1 %1965  ;;  %2039 = vst.msk [vmem:[#allocation3 + $0x80] sm:$0xf] %vm2021_vm1, %v1970_v34  ;;  %v1986_v23 = vpop.permute.xlu2 %1985 }
 0x287   : > { %2037 = vst.msk [vmem:[#allocation3 + $0x70] sm:$0xf] %vm2021_vm1, %v1966_v36 }
 0x288   : > { %2047 = vst.msk [vmem:[#allocation3 + $0xc0] sm:$0xf] %vm2021_vm1, %v1986_v23  ;;  %v2269_v23 = vld [vmem:[#allocation2 + $0xa8] sm:$0x3f] }
 0x289   : > { %v2297_v19 = vpack.c.bf16 %v2269_v23, %v2269_v23 }
 0x28b   : > { %2344 = vrot.lane.b32.xlu0 %v2283_v13, %s4198_s21 }
 0x28c   : > { %2340 = vrot.lane.b32.xlu1 %v2281_v24, %s4198_s21  ;;  %2342 = vrot.lane.b32.xlu2 %v6361_v55, %s4198_s21 }
 0x28d   : > { %v1976_v29 = vpop.permute.xlu0 %1975 }
 0x28e   : > { %v1972_v58 = vpop.permute.xlu1 %1971  ;;  %2042 = vst.msk [vmem:[#allocation3 + $0x98] sm:$0x7] %vm2023_vm6, %v1976_v29  ;;  %v1992_v17 = vpop.permute.xlu2 %1991  ;;  %v2273_v29 = vld [vmem:[#allocation2 + $0xc8] sm:$0x3f] }
 0x28f   : > { %2040 = vst.msk [vmem:[#allocation3 + $0x88] sm:$0x7] %vm2023_vm6, %v1972_v58  ;;  %v2271_v58 = vld [vmem:[#allocation2 + $0xb8] sm:$0x3f] }
 0x290   : > { %2050 = vst.msk [vmem:[#allocation3 + $0xd8] sm:$0x7] %vm2023_vm6, %v1992_v17  ;;  %v2301_v17 = vpack.c.bf16 %v2273_v29, %v2273_v29  ;;  %v2299_v38 = vpack.c.bf16 %v2271_v58, %v2271_v58 }
 0x293   : > { %2350 = vrot.lane.b32.xlu0 %v6365_v4, %s4198_s21 }
 0x294   : > { %2346 = vrot.lane.b32.xlu1 %v6356_v1, %s4198_s21  ;;  %2348 = vrot.lane.b32.xlu2 %v2285_v32, %s4198_s21 }
 0x295   : > { %v1982_v55 = vpop.permute.xlu0 %1981 }
 0x296   : > { %v1978_v31 = vpop.permute.xlu1 %1977  ;;  %2045 = vst.msk [vmem:[#allocation3 + $0xb0] sm:$0xf] %vm2021_vm1, %v1982_v55  ;;  %v2140_v27 = vpop.permute.xlu2 %2139  ;;  %v2276_v55 = vld [vmem:[#allocation2 + $0xe0] sm:$0xff] }
 0x297   : > { %2043 = vst.msk [vmem:[#allocation3 + $0xa0] sm:$0xf] %vm2021_vm1, %v1978_v31  ;;  %v2275_v31 = vld [vmem:[#allocation2 + $0xd8] sm:$0x3f] }
 0x298   : > { %2223 = vst.msk [vmem:[#allocation3 + $0x10] sm:$0xf] %vm2219_vm10, %v2140_v27  ;;  %v6631_v27 = vpack.c.bf16 %v2276_v55, %v2276_v55  ;;  %v2303_v11 = vpack.c.bf16 %v2275_v31, %v2275_v31  ;;  %v2467_v55 = vld [vmem:[#allocation2 + $0xa9] sm:$0x3f]  ;;  %v2465_v31 = vld [vmem:[#allocation2 + $0x99] sm:$0x3f] }
 0x29b   : > { %2356 = vrot.lane.b32.xlu0 %v2289_v59, %s4198_s21 }
 0x29c   : > { %2352 = vrot.lane.b32.xlu1 %v2287_v44, %s4198_s21  ;;  %2354 = vrot.lane.b32.xlu2 %v6397_v7, %s4198_s21  ;;  %v2449_v44 = vld [vmem:[#allocation2 + $0x19] sm:$0x3f] }
 0x29d   : > { %v1988_v1 = vpop.permute.xlu0 %1987 }
 0x29e   : > { %v1984_v4 = vpop.permute.xlu1 %1983  ;;  %2048 = vst.msk [vmem:[#allocation3 + $0xc8] sm:$0x7] %vm2023_vm6, %v1988_v1  ;;  %v2146_v0 = vpop.permute.xlu2 %2145  ;;  %v2277_v1 = vld [vmem:[#allocation2 + $0xe8] sm:$0x3f] }
 0x29f   : > { %2046 = vst.msk [vmem:[#allocation3 + $0xb8] sm:$0x7] %vm2023_vm6, %v1984_v4  ;;  %v2477_v4 = vpack.c.bf16 %v2449_v44, %v2449_v44  ;;  %vm3074_vm6 = vcmask 1043392  }
 0x2a0   : > { %2226 = vst.msk [vmem:[#allocation3 + $0x28] sm:$0x7] %vm2221_vm5, %v2146_v0  ;;  %v2305_v0 = vpack.c.bf16 %v2277_v1, %v2277_v1 }
 0x2a3   : > { %2362 = vrot.lane.b32.xlu0 %v6401_v28, %s4198_s21 }
 0x2a4   : > { %2358 = vrot.lane.b32.xlu1 %v6392_v50, %s4198_s21  ;;  %2360 = vrot.lane.b32.xlu2 %v2291_v54, %s4198_s21 }
 0x2a5   : > { %v2136_v7 = vpop.permute.xlu0 %2135 }
 0x2a6   : > { %v1990_v5 = vpop.permute.xlu1 %1989  ;;  %2220 = vst.msk [vmem:[#allocation3] sm:$0xf] %vm2219_vm10, %v2136_v7  ;;  %v2152_v12 = vpop.permute.xlu2 %2151  ;;  %v2451_v7 = vld [vmem:[#allocation2 + $0x29] sm:$0x3f] }
 0x2a7   : > { %2049 = vst.msk [vmem:[#allocation3 + $0xd0] sm:$0xf] %vm2021_vm1, %v1990_v5  ;;  %v2479_v5 = vpack.c.bf16 %v2451_v7, %v2451_v7  ;;  %vm6873_vm1 = vmor %vm1751_vm11, %vm1750_vm3 }
 0x2a8   : > { %2229 = vst.msk [vmem:[#allocation3 + $0x40] sm:$0xf] %vm2219_vm10, %v2152_v12 }
 0x2ab   : > { %2368 = vrot.lane.b32.xlu0 %v2295_v21, %s4198_s21  ;;  %v2453_v21 = vld [vmem:[#allocation2 + $0x39] sm:$0x3f] }
 0x2ac   : > { %2364 = vrot.lane.b32.xlu1 %v2293_v20, %s4198_s21  ;;  %2366 = vrot.lane.b32.xlu2 %v6433_v37, %s4198_s21  ;;  %v2483_v20 = vpack.c.bf16 %v2455_v30, %v2455_v30 }
 0x2ad   : > { %v2142_v50 = vpop.permute.xlu0 %2141 }
 0x2ae   : > { %v2138_v34 = vpop.permute.xlu1 %2137  ;;  %2224 = vst.msk [vmem:[#allocation3 + $0x18] sm:$0x7] %vm2221_vm5, %v2142_v50  ;;  %v2158_v36 = vpop.permute.xlu2 %2157  ;;  %v2481_v50 = vpack.c.bf16 %v2453_v21, %v2453_v21 }
 0x2af   : > { %2222 = vst.msk [vmem:[#allocation3 + $0x8] sm:$0x7] %vm2221_vm5, %v2138_v34 }
 0x2b0   : > { %2232 = vst.msk [vmem:[#allocation3 + $0x58] sm:$0x7] %vm2221_vm5, %v2158_v36  ;;  %v2457_v36 = vld [vmem:[#allocation2 + $0x59] sm:$0x3f] }
 0x2b1   : > { %v2485_v23 = vpack.c.bf16 %v2457_v36, %v2457_v36 }
 0x2b3   : > { %2374 = vrot.lane.b32.xlu0 %v6437_v61, %s4198_s21 }
 0x2b4   : > { %2370 = vrot.lane.b32.xlu1 %v6428_v15, %s4198_s21  ;;  %2372 = vrot.lane.b32.xlu2 %v2297_v19, %s4198_s21 }
 0x2b5   : > { %v2148_v22 = vpop.permute.xlu0 %2147 }
 0x2b6   : > { %v2144_v13 = vpop.permute.xlu1 %2143  ;;  %2227 = vst.msk [vmem:[#allocation3 + $0x30] sm:$0xf] %vm2219_vm10, %v2148_v22  ;;  %v2164_v24 = vpop.permute.xlu2 %2163 }
 0x2b7   : > { %2225 = vst.msk [vmem:[#allocation3 + $0x20] sm:$0xf] %vm2219_vm10, %v2144_v13  ;;  %v2461_v13 = vld [vmem:[#allocation2 + $0x79] sm:$0x3f] }
 0x2b8   : > { %2235 = vst.msk [vmem:[#allocation3 + $0x70] sm:$0xf] %vm2219_vm10, %v2164_v24  ;;  %v2459_v24 = vld [vmem:[#allocation2 + $0x69] sm:$0x3f]  ;;  %v2489_v29 = vpack.c.bf16 %v2461_v13, %v2461_v13  ;;  %v2655_v13 = vld [vmem:[#allocation2 + $0x5a] sm:$0x3f] }
 0x2b9   : > { %v2487_v58 = vpack.c.bf16 %v2459_v24, %v2459_v24  ;;  %v2653_v24 = vld [vmem:[#allocation2 + $0x4a] sm:$0x3f] }
 0x2bb   : > { %2380 = vrot.lane.b32.xlu0 %v2301_v17, %s4198_s21 }
 0x2bc   : > { %2376 = vrot.lane.b32.xlu1 %v2299_v38, %s4198_s21  ;;  %2378 = vrot.lane.b32.xlu2 %v6468_v10, %s4198_s21  ;;  %v2463_v38 = vld [vmem:[#allocation2 + $0x89] sm:$0x3f] }
 0x2bd   : > { %v2154_v15 = vpop.permute.xlu0 %2153 }
 0x2be   : > { %v2150_v61 = vpop.permute.xlu1 %2149  ;;  %2230 = vst.msk [vmem:[#allocation3 + $0x48] sm:$0x7] %vm2221_vm5, %v2154_v15  ;;  %v2170_v32 = vpop.permute.xlu2 %2169  ;;  %v2491_v15 = vpack.c.bf16 %v2463_v38, %v2463_v38 }
 0x2bf   : > { %2228 = vst.msk [vmem:[#allocation3 + $0x38] sm:$0x7] %vm2221_vm5, %v2150_v61 }
 0x2c0   : > { %2238 = vst.msk [vmem:[#allocation3 + $0x88] sm:$0x7] %vm2221_vm5, %v2170_v32 }
 0x2c3   : > { %2386 = vrot.lane.b32.xlu0 %v6631_v27, %s4198_s21 }
 0x2c4   : > { %2382 = vrot.lane.b32.xlu1 %v6463_v62, %s4198_s21  ;;  %2384 = vrot.lane.b32.xlu2 %v2303_v11, %s4198_s21  ;;  %v2495_v11 = vpack.c.bf16 %v2467_v55, %v2467_v55 }
 0x2c5   : > { %v2160_v10 = vpop.permute.xlu0 %2159 }
 0x2c6   : > { %v2156_v35 = vpop.permute.xlu1 %2155  ;;  %2233 = vst.msk [vmem:[#allocation3 + $0x60] sm:$0xf] %vm2219_vm10, %v2160_v10  ;;  %v2176_v59 = vpop.permute.xlu2 %2175  ;;  %v2493_v10 = vpack.c.bf16 %v2465_v31, %v2465_v31 }
 0x2c7   : > { %2231 = vst.msk [vmem:[#allocation3 + $0x50] sm:$0xf] %vm2219_vm10, %v2156_v35 }
 0x2c8   : > { %2241 = vst.msk [vmem:[#allocation3 + $0xa0] sm:$0xf] %vm2219_vm10, %v2176_v59  ;;  %v2469_v59 = vld [vmem:[#allocation2 + $0xb9] sm:$0x3f] }
 0x2c9   : > { %v2497_v44 = vpack.c.bf16 %v2469_v59, %v2469_v59  ;;  %v2665_v59 = vld [vmem:[#allocation2 + $0xaa] sm:$0x3f] }
 0x2cb   : > { %2534 = vrot.lane.b32.xlu0 %v2477_v4, %s4199_s22 }
 0x2cc   : > { %2388 = vrot.lane.b32.xlu1 %v2305_v0, %s4198_s21  ;;  %2532 = vrot.lane.b32.xlu2 %v6344_v51, %s4199_s22  ;;  %v2473_v0 = vld [vmem:[#allocation2 + $0xd9] sm:$0x3f] }
 0x2cd   : > { %v2166_v62 = vpop.permute.xlu0 %2165 }
 0x2ce   : > { %v2162_v43 = vpop.permute.xlu1 %2161  ;;  %2236 = vst.msk [vmem:[#allocation3 + $0x78] sm:$0x7] %vm2221_vm5, %v2166_v62  ;;  %v2182_v54 = vpop.permute.xlu2 %2181  ;;  %v2471_v62 = vld [vmem:[#allocation2 + $0xc9] sm:$0x3f] }
 0x2cf   : > { %2234 = vst.msk [vmem:[#allocation3 + $0x68] sm:$0x7] %vm2221_vm5, %v2162_v43  ;;  %v2501_v43 = vpack.c.bf16 %v2473_v0, %v2473_v0 }
 0x2d0   : > { %2244 = vst.msk [vmem:[#allocation3 + $0xb8] sm:$0x7] %vm2221_vm5, %v2182_v54  ;;  %v2499_v54 = vpack.c.bf16 %v2471_v62, %v2471_v62 }
 0x2d3   : > { %2540 = vrot.lane.b32.xlu0 %v6359_v49, %s4199_s22 }
 0x2d4   : > { %2536 = vrot.lane.b32.xlu1 %v6341_v40, %s4199_s22  ;;  %2538 = vrot.lane.b32.xlu2 %v2479_v5, %s4199_s22  ;;  %v2474_v5 = vld [vmem:[#allocation2 + $0xe1] sm:$0xff] }
 0x2d5   : > { %v2172_v51 = vpop.permute.xlu0 %2171 }
 0x2d6   : > { %v2168_v12 = vpop.permute.xlu1 %2167  ;;  %2239 = vst.msk [vmem:[#allocation3 + $0x90] sm:$0xf] %vm2219_vm10, %v2172_v51  ;;  %v2188_v48 = vpop.permute.xlu2 %2187  ;;  %v2475_v51 = vld [vmem:[#allocation2 + $0xe9] sm:$0x3f] }
 0x2d7   : > { %2237 = vst.msk [vmem:[#allocation3 + $0x80] sm:$0xf] %vm2219_vm10, %v2168_v12  ;;  %v6708_v12 = vpack.c.bf16 %v2474_v5, %v2474_v5 }
 0x2d8   : > { %2247 = vst.msk [vmem:[#allocation3 + $0xd0] sm:$0xf] %vm2219_vm10, %v2188_v48  ;;  %v2503_v48 = vpack.c.bf16 %v2475_v51, %v2475_v51 }
 0x2db   : > { %2546 = vrot.lane.b32.xlu0 %v2483_v20, %s4199_s22  ;;  %v2649_v20 = vld [vmem:[#allocation2 + $0x2a] sm:$0x3f] }
 0x2dc   : > { %2542 = vrot.lane.b32.xlu1 %v2481_v50, %s4199_s22  ;;  %2544 = vrot.lane.b32.xlu2 %v6380_v2, %s4199_s22  ;;  %v2647_v50 = vld [vmem:[#allocation2 + $0x1a] sm:$0x3f] }
 0x2dd   : > { %v2178_v40 = vpop.permute.xlu0 %2177 }
 0x2de   : > { %v2174_v49 = vpop.permute.xlu1 %2173  ;;  %2242 = vst.msk [vmem:[#allocation3 + $0xa8] sm:$0x7] %vm2221_vm5, %v2178_v40  ;;  %v2337_v34 = vpop.permute.xlu2 %2336  ;;  %v2677_v40 = vpack.c.bf16 %v2649_v20, %v2649_v20 }
 0x2df   : > { %2240 = vst.msk [vmem:[#allocation3 + $0x98] sm:$0x7] %vm2221_vm5, %v2174_v49  ;;  %v2675_v49 = vpack.c.bf16 %v2647_v50, %v2647_v50 }
 0x2e0   : > { %2421 = vst.msk [vmem:[#allocation3 + $0x8] sm:$0x7] %vm2420_vm15, %v2337_v34 }
 0x2e3   : > { %2552 = vrot.lane.b32.xlu0 %v6395_v46, %s4199_s22 }
 0x2e4   : > { %2548 = vrot.lane.b32.xlu1 %v6377_v60, %s4199_s22  ;;  %2550 = vrot.lane.b32.xlu2 %v2485_v23, %s4199_s22  ;;  %v2651_v23 = vld [vmem:[#allocation2 + $0x3a] sm:$0x3f] }
 0x2e5   : > { %v2184_v2 = vpop.permute.xlu0 %2183 }
 0x2e6   : > { %v2180_v19 = vpop.permute.xlu1 %2179  ;;  %2245 = vst.msk [vmem:[#allocation3 + $0xc0] sm:$0xf] %vm2219_vm10, %v2184_v2  ;;  %v2343_v22 = vpop.permute.xlu2 %2342  ;;  %v2679_v2 = vpack.c.bf16 %v2651_v23, %v2651_v23 }
 0x2e7   : > { %2243 = vst.msk [vmem:[#allocation3 + $0xb0] sm:$0xf] %vm2219_vm10, %v2180_v19  ;;  %vm3075_vm10 = vcmask 96260  }
 0x2e8   : > { %2424 = vst.msk [vmem:[#allocation3 + $0x20] sm:$0xf] %vm2418_vm7, %v2343_v22 }
 0x2eb   : > { %2558 = vrot.lane.b32.xlu0 %v2489_v29, %s4199_s22  ;;  %v2683_v29 = vpack.c.bf16 %v2655_v13, %v2655_v13  ;;  %v2858_v13 = vld [vmem:[#allocation2 + $0x88] sm:$0x3f] }
 0x2ec   : > { %2554 = vrot.lane.b32.xlu1 %v2487_v58, %s4199_s22  ;;  %2556 = vrot.lane.b32.xlu2 %v6416_v6, %s4199_s22  ;;  %v2681_v58 = vpack.c.bf16 %v2653_v24, %v2653_v24  ;;  %v3317_v24 = vld [vmem:[#allocation2 + $0x9a] sm:$0x3f] }
 0x2ed   : > { %v2190_v60 = vpop.permute.xlu0 %2189 }
 0x2ee   : > { %v2186_v46 = vpop.permute.xlu1 %2185  ;;  %2248 = vst.msk [vmem:[#allocation3 + $0xd8] sm:$0x7] %vm2221_vm5, %v2190_v60  ;;  %v2349_v17 = vpop.permute.xlu2 %2348 }
 0x2ef   : > { %2246 = vst.msk [vmem:[#allocation3 + $0xc8] sm:$0x7] %vm2221_vm5, %v2186_v46  ;;  %v2657_v46 = vld [vmem:[#allocation2 + $0x6a] sm:$0x3f]  ;;  %vm6914_vm5 = vmor %vm3075_vm10, %vm3074_vm6 }
 0x2f0   : > { %2427 = vst.msk [vmem:[#allocation3 + $0x38] sm:$0x7] %vm2420_vm15, %v2349_v17  ;;  %v2685_v17 = vpack.c.bf16 %v2657_v46, %v2657_v46  ;;  %v3116_v46 = vld [vmem:[#allocation2 + $0x81] sm:$0xff] }
 0x2f3   : > { %2564 = vrot.lane.b32.xlu0 %v6431_v16, %s4199_s22 }
 0x2f4   : > { %2560 = vrot.lane.b32.xlu1 %v6413_v56, %s4199_s22  ;;  %2562 = vrot.lane.b32.xlu2 %v2491_v15, %s4199_s22 }
 0x2f5   : > { %v2339_v6 = vpop.permute.xlu0 %2338 }
 0x2f6   : > { %v2335_v61 = vpop.permute.xlu1 %2334  ;;  %2422 = vst.msk [vmem:[#allocation3 + $0x10] sm:$0xf] %vm2418_vm7, %v2339_v6  ;;  %v2355_v32 = vpop.permute.xlu2 %2354  ;;  %v2661_v6 = vld [vmem:[#allocation2 + $0x8a] sm:$0x3f] }
 0x2f7   : > { %2419 = vst.msk [vmem:[#allocation3] sm:$0xf] %vm2418_vm7, %v2335_v61  ;;  %v2659_v61 = vld [vmem:[#allocation2 + $0x7a] sm:$0x3f] }
 0x2f8   : > { %2430 = vst.msk [vmem:[#allocation3 + $0x50] sm:$0xf] %vm2418_vm7, %v2355_v32  ;;  %v2689_v32 = vpack.c.bf16 %v2661_v6, %v2661_v6  ;;  %v2687_v55 = vpack.c.bf16 %v2659_v61, %v2659_v61 }
 0x2fb   : > { %2570 = vrot.lane.b32.xlu0 %v2495_v11, %s4199_s22  ;;  %v2663_v11 = vld [vmem:[#allocation2 + $0x9a] sm:$0x3f] }
 0x2fc   : > { %2566 = vrot.lane.b32.xlu1 %v2493_v10, %s4199_s22  ;;  %2568 = vrot.lane.b32.xlu2 %v6452_v8, %s4199_s22  ;;  %v2691_v10 = vpack.c.bf16 %v2663_v11, %v2663_v11 }
 0x2fd   : > { %v2345_v56 = vpop.permute.xlu0 %2344 }
 0x2fe   : > { %v2341_v16 = vpop.permute.xlu1 %2340  ;;  %2425 = vst.msk [vmem:[#allocation3 + $0x28] sm:$0x7] %vm2420_vm15, %v2345_v56  ;;  %v2361_v35 = vpop.permute.xlu2 %2360 }
 0x2ff   : > { %2423 = vst.msk [vmem:[#allocation3 + $0x18] sm:$0x7] %vm2420_vm15, %v2341_v16 }
 0x300   : > { %2433 = vst.msk [vmem:[#allocation3 + $0x68] sm:$0x7] %vm2420_vm15, %v2361_v35  ;;  %v2667_v35 = vld [vmem:[#allocation2 + $0xba] sm:$0x3f] }
 0x303   : > { %2576 = vrot.lane.b32.xlu0 %v6466_v57, %s4199_s22 }
 0x304   : > { %2572 = vrot.lane.b32.xlu1 %v6448_v39, %s4199_s22  ;;  %2574 = vrot.lane.b32.xlu2 %v2497_v44, %s4199_s22  ;;  %v2695_v44 = vpack.c.bf16 %v2667_v35, %v2667_v35  ;;  %v3328_v35 = vld [vmem:[#allocation2 + $0xf2] sm:$0xff] }
 0x305   : > { %v2351_v8 = vpop.permute.xlu0 %2350 }
 0x306   : > { %v2347_v1 = vpop.permute.xlu1 %2346  ;;  %2428 = vst.msk [vmem:[#allocation3 + $0x40] sm:$0xf] %vm2418_vm7, %v2351_v8  ;;  %v2367_v4 = vpop.permute.xlu2 %2366  ;;  %v2693_v8 = vpack.c.bf16 %v2665_v59, %v2665_v59  ;;  %v3130_v59 = vld [vmem:[#allocation2 + $0xf1] sm:$0xff] }
 0x307   : > { %2426 = vst.msk [vmem:[#allocation3 + $0x30] sm:$0xf] %vm2418_vm7, %v2347_v1 }
 0x308   : > { %2436 = vst.msk [vmem:[#allocation3 + $0x80] sm:$0xf] %vm2418_vm7, %v2367_v4  ;;  %v2669_v4 = vld [vmem:[#allocation2 + $0xca] sm:$0x3f] }
 0x309   : > { %v2697_v0 = vpack.c.bf16 %v2669_v4, %v2669_v4 }
 0x30b   : > { %2582 = vrot.lane.b32.xlu0 %v2501_v43, %s4199_s22 }
 0x30c   : > { %2578 = vrot.lane.b32.xlu1 %v2499_v54, %s4199_s22  ;;  %2580 = vrot.lane.b32.xlu2 %v6479_v53, %s4199_s22  ;;  %v2673_v54 = vld [vmem:[#allocation2 + $0xea] sm:$0x3f] }
 0x30d   : > { %v2357_v39 = vpop.permute.xlu0 %2356 }
 0x30e   : > { %v2353_v57 = vpop.permute.xlu1 %2352  ;;  %2431 = vst.msk [vmem:[#allocation3 + $0x58] sm:$0x7] %vm2420_vm15, %v2357_v39  ;;  %v2373_v7 = vpop.permute.xlu2 %2372  ;;  %v2671_v39 = vld [vmem:[#allocation2 + $0xda] sm:$0x3f] }
 0x30f   : > { %2429 = vst.msk [vmem:[#allocation3 + $0x48] sm:$0x7] %vm2420_vm15, %v2353_v57  ;;  %v2672_v57 = vld [vmem:[#allocation2 + $0xe2] sm:$0xff]  ;;  %v2699_v5 = vpack.c.bf16 %v2671_v39, %v2671_v39 }
 0x310   : > { %2439 = vst.msk [vmem:[#allocation3 + $0x98] sm:$0x7] %vm2420_vm15, %v2373_v7  ;;  %v2701_v7 = vpack.c.bf16 %v2673_v54, %v2673_v54 }
 0x313   : > { %2730 = vrot.lane.b32.xlu0 %v6488_v52, %s4200_s23 }
 0x314   : > { %2584 = vrot.lane.b32.xlu1 %v6708_v12, %s4199_s22  ;;  %2586 = vrot.lane.b32.xlu2 %v2503_v48, %s4199_s22 }
 0x315   : > { %v2363_v53 = vpop.permute.xlu0 %2362 }
 0x316   : > { %v2359_v30 = vpop.permute.xlu1 %2358  ;;  %2434 = vst.msk [vmem:[#allocation3 + $0x70] sm:$0xf] %vm2418_vm7, %v2363_v53  ;;  %v2379_v21 = vpop.permute.xlu2 %2378  ;;  %v2860_v53 = vld [vmem:[#allocation2 + $0x98] sm:$0x3f] }
 0x317   : > { %2432 = vst.msk [vmem:[#allocation3 + $0x60] sm:$0xf] %vm2418_vm7, %v2359_v30  ;;  %v2845_v30 = vld [vmem:[#allocation2 + $0x20] sm:$0xff] }
 0x318   : > { %2442 = vst.msk [vmem:[#allocation3 + $0xb0] sm:$0xf] %vm2418_vm7, %v2379_v21  ;;  %v2888_v21 = vpack.c.bf16 %v2860_v53, %v2860_v53  ;;  %v2873_v20 = vpack.c.bf16 %v2845_v30, %v2845_v30 }
 0x31b   : > { %2736 = vrot.lane.b32.xlu0 %v2677_v40, %s4200_s23 }
 0x31c   : > { %2732 = vrot.lane.b32.xlu1 %v2675_v49, %s4200_s23  ;;  %2734 = vrot.lane.b32.xlu2 %v6496_v3, %s4200_s23 }
 0x31d   : > { %v2369_v52 = vpop.permute.xlu0 %2368 }
 0x31e   : > { %v2365_v34 = vpop.permute.xlu1 %2364  ;;  %2437 = vst.msk [vmem:[#allocation3 + $0x88] sm:$0x7] %vm2420_vm15, %v2369_v52  ;;  %v2385_v36 = vpop.permute.xlu2 %2384  ;;  %v3316_v52 = vld [vmem:[#allocation2 + $0x92] sm:$0xff] }
 0x31f   : > { %2435 = vst.msk [vmem:[#allocation3 + $0x78] sm:$0x7] %vm2420_vm15, %v2365_v34  ;;  %v3118_v34 = vld [vmem:[#allocation2 + $0x91] sm:$0xff]  ;;  %v3344_v23 = vpack.c.bf16 %v3316_v52, %v3316_v52 }
 0x320   : > { %2445 = vst.msk [vmem:[#allocation3 + $0xc8] sm:$0x7] %vm2420_vm15, %v2385_v36  ;;  %v3119_v36 = vld [vmem:[#allocation2 + $0x99] sm:$0x3f] }
 0x321   : > { %v3312_v52 = vld [vmem:[#allocation2 + $0x72] sm:$0xff] }
 0x323   : > { %2742 = vrot.lane.b32.xlu0 %v6504_v9, %s4200_s23 }
 0x324   : > { %2738 = vrot.lane.b32.xlu1 %v6494_v41, %s4200_s23  ;;  %2740 = vrot.lane.b32.xlu2 %v2679_v2, %s4200_s23  ;;  %v3146_v2 = vpack.c.bf16 %v3118_v34, %v3118_v34 }
 0x325   : > { %v2375_v3 = vpop.permute.xlu0 %2374 }
 0x326   : > { %v2371_v19 = vpop.permute.xlu1 %2370  ;;  %2440 = vst.msk [vmem:[#allocation3 + $0xa0] sm:$0xf] %vm2418_vm7, %v2375_v3  ;;  %v2533_v22 = vpop.permute.xlu2 %2532  ;;  %v3147_v3 = vpack.c.bf16 %v3119_v36, %v3119_v36 }
 0x327   : > { %2438 = vst.msk [vmem:[#allocation3 + $0x90] sm:$0xf] %vm2418_vm7, %v2371_v19 }
 0x328   : > { %2617 = vst.msk [vmem:[#allocation3] sm:$0xf] %vm2616_vm12, %v2533_v22 }
 0x32b   : > { %2748 = vrot.lane.b32.xlu0 %v2683_v29, %s4200_s23  ;;  %v2886_v29 = vpack.c.bf16 %v2858_v13, %v2858_v13 }
 0x32c   : > { %2744 = vrot.lane.b32.xlu1 %v2681_v58, %s4200_s23  ;;  %2746 = vrot.lane.b32.xlu2 %v6513_v25, %s4200_s23  ;;  %v3345_v58 = vpack.c.bf16 %v3317_v24, %v3317_v24 }
 0x32d   : > { %v2381_v41 = vpop.permute.xlu0 %2380 }
 0x32e   : > { %v2377_v9 = vpop.permute.xlu1 %2376  ;;  %2443 = vst.msk [vmem:[#allocation3 + $0xb8] sm:$0x7] %vm2420_vm15, %v2381_v41  ;;  %v2539_v60 = vpop.permute.xlu2 %2538 }
 0x32f   : > { %2441 = vst.msk [vmem:[#allocation3 + $0xa8] sm:$0x7] %vm2420_vm15, %v2377_v9 }
 0x330   : > { %2621 = vst.msk [vmem:[#allocation3 + $0x18] sm:$0x7] %vm2618_vm14, %v2539_v60 }
 0x333   : > { %2754 = vrot.lane.b32.xlu0 %v6522_v33, %s4200_s23 }
 0x334   : > { %2750 = vrot.lane.b32.xlu1 %v6511_v63, %s4200_s23  ;;  %2752 = vrot.lane.b32.xlu2 %v2685_v17, %s4200_s23  ;;  %v2871_v17 = vld [vmem:[#allocation2 + $0xf0] sm:$0xff] }
 0x335   : > { %v2387_v25 = vpop.permute.xlu0 %2386 }
 0x336   : > { %v2383_v38 = vpop.permute.xlu1 %2382  ;;  %2446 = vst.msk [vmem:[#allocation3 + $0xd0] sm:$0xf] %vm2418_vm7, %v2387_v25  ;;  %v2545_v15 = vpop.permute.xlu2 %2544  ;;  %v2872_v25 = vld [vmem:[#allocation2 + $0xf8] sm:$0x3f] }
 0x337   : > { %2444 = vst.msk [vmem:[#allocation3 + $0xc0] sm:$0xf] %vm2418_vm7, %v2383_v38  ;;  %v3144_v38 = vpack.c.bf16 %v3116_v46, %v3116_v46  ;;  %v2900_v6 = vpack.c.bf16 %v2872_v25, %v2872_v25  ;;  %v3112_v25 = vld [vmem:[#allocation2 + $0x61] sm:$0xff]  ;;  %vm3272_vm7 = vcmask 257120  }
 0x338   : > { %2624 = vst.msk [vmem:[#allocation3 + $0x30] sm:$0xf] %vm2616_vm12, %v2545_v15  ;;  %v2899_v15 = vpack.c.bf16 %v2871_v17, %v2871_v17 }
 0x33b   : > { %2760 = vrot.lane.b32.xlu0 %v2689_v32, %s4200_s23 }
 0x33c   : > { %2756 = vrot.lane.b32.xlu1 %v2687_v55, %s4200_s23  ;;  %2758 = vrot.lane.b32.xlu2 %v6531_v14, %s4200_s23  ;;  %v3315_v55 = vld [vmem:[#allocation2 + $0x8a] sm:$0x3f] }
 0x33d   : > { %v2535_v63 = vpop.permute.xlu0 %2534 }
 0x33e   : > { %v2389_v33 = vpop.permute.xlu1 %2388  ;;  %2619 = vst.msk [vmem:[#allocation3 + $0x8] sm:$0x7] %vm2618_vm14, %v2535_v63  ;;  %v2551_v31 = vpop.permute.xlu2 %2550  ;;  %v3117_v63 = vld [vmem:[#allocation2 + $0x89] sm:$0x3f] }
 0x33f   : > { %2447 = vst.msk [vmem:[#allocation3 + $0xd8] sm:$0x7] %vm2420_vm15, %v2389_v33  ;;  %v3314_v33 = vld [vmem:[#allocation2 + $0x82] sm:$0xff]  ;;  %v3145_v11 = vpack.c.bf16 %v3117_v63, %v3117_v63  ;;  %vm3274_vm15 = vcmask 256096  }
 0x340   : > { %2627 = vst.msk [vmem:[#allocation3 + $0x48] sm:$0x7] %vm2618_vm14, %v2551_v31  ;;  %v3343_v31 = vpack.c.bf16 %v3315_v55, %v3315_v55 }
 0x343   : > { %2766 = vrot.lane.b32.xlu0 %v6541_v26, %s4200_s23 }
 0x344   : > { %2762 = vrot.lane.b32.xlu1 %v6529_v18, %s4200_s23  ;;  %2764 = vrot.lane.b32.xlu2 %v2691_v10, %s4200_s23  ;;  %v3342_v10 = vpack.c.bf16 %v3314_v33, %v3314_v33  ;;  %v3311_v33 = vld [vmem:[#allocation2 + $0x6a] sm:$0x3f] }
 0x345   : > { %v2541_v14 = vpop.permute.xlu0 %2540 }
 0x346   : > { %v2537_v56 = vpop.permute.xlu1 %2536  ;;  %2622 = vst.msk [vmem:[#allocation3 + $0x20] sm:$0xf] %vm2616_vm12, %v2541_v14  ;;  %v2557_v16 = vpop.permute.xlu2 %2556 }
 0x347   : > { %2620 = vst.msk [vmem:[#allocation3 + $0x10] sm:$0xf] %vm2616_vm12, %v2537_v56 }
 0x348   : > { %2630 = vst.msk [vmem:[#allocation3 + $0x60] sm:$0xf] %vm2616_vm12, %v2557_v16 }
 0x34b   : > { %2772 = vrot.lane.b32.xlu0 %v2695_v44, %s4200_s23  ;;  %v3131_v44 = vld [vmem:[#allocation2 + $0xf9] sm:$0x3f] }
 0x34c   : > { %2768 = vrot.lane.b32.xlu1 %v2693_v8, %s4200_s23  ;;  %2770 = vrot.lane.b32.xlu2 %v6552_v47, %s4200_s23  ;;  %v3356_v8 = vpack.c.bf16 %v3328_v35, %v3328_v35 }
 0x34d   : > { %v2547_v18 = vpop.permute.xlu0 %2546 }
 0x34e   : > { %v2543_v26 = vpop.permute.xlu1 %2542  ;;  %2625 = vst.msk [vmem:[#allocation3 + $0x38] sm:$0x7] %vm2618_vm14, %v2547_v18  ;;  %v2563_v1 = vpop.permute.xlu2 %2562  ;;  %v3158_v18 = vpack.c.bf16 %v3130_v59, %v3130_v59 }
 0x34f   : > { %2623 = vst.msk [vmem:[#allocation3 + $0x28] sm:$0x7] %vm2618_vm14, %v2543_v26  ;;  %v3159_v26 = vpack.c.bf16 %v3131_v44, %v3131_v44 }
 0x350   : > { %2633 = vst.msk [vmem:[#allocation3 + $0x78] sm:$0x7] %vm2618_vm14, %v2563_v1 }
 0x353   : > { %2778 = vrot.lane.b32.xlu0 %v6562_v42, %s4200_s23  ;;  %v6778_v42 = vpack.c.bf16 %v2672_v57, %v2672_v57 }
 0x354   : > { %2774 = vrot.lane.b32.xlu1 %v6550_v45, %s4200_s23  ;;  %2776 = vrot.lane.b32.xlu2 %v2697_v0, %s4200_s23 }
 0x355   : > { %v2553_v47 = vpop.permute.xlu0 %2552 }
 0x356   : > { %v2549_v62 = vpop.permute.xlu1 %2548  ;;  %2628 = vst.msk [vmem:[#allocation3 + $0x50] sm:$0xf] %vm2616_vm12, %v2553_v47  ;;  %v2569_v43 = vpop.permute.xlu2 %2568  ;;  %v2856_v47 = vld [vmem:[#allocation2 + $0x78] sm:$0x3f] }
 0x357   : > { %2626 = vst.msk [vmem:[#allocation3 + $0x40] sm:$0xf] %vm2616_vm12, %v2549_v62  ;;  %v3329_v62 = vld [vmem:[#allocation2 + $0xfa] sm:$0x3f]  ;;  %v2884_v54 = vpack.c.bf16 %v2856_v47, %v2856_v47  ;;  %v4203_v47 = vmov 0  }
 0x358   : > { %2636 = vst.msk [vmem:[#allocation3 + $0x90] sm:$0xf] %vm2616_vm12, %v2569_v43  ;;  %v2855_v43 = vld [vmem:[#allocation2 + $0x70] sm:$0xff]  ;;  %v3357_v39 = vpack.c.bf16 %v3329_v62, %v3329_v62 }
 0x359   : > { %v2883_v57 = vpack.c.bf16 %v2855_v43, %v2855_v43  ;;  %1760 = vst.msk [vmem:[#allocation3 + $0x78] sm:$0x88] %vm6873_vm1, %v4203_v47 }
 0x35a   : > { %1753 = vst.msk [vmem:[#allocation3 + $0x8] sm:$0x88] %vm6873_vm1, %v4203_v47 }
 0x35b   : > { %2784 = vrot.lane.b32.xlu0 %v2701_v7, %s4200_s23  ;;  %1754 = vst.msk [vmem:[#allocation3 + $0x18] sm:$0x88] %vm6873_vm1, %v4203_v47 }
 0x35c   : > { %2780 = vrot.lane.b32.xlu1 %v2699_v5, %s4200_s23  ;;  %2782 = vrot.lane.b32.xlu2 %v6778_v42, %s4200_s23  ;;  %1755 = vst.msk [vmem:[#allocation3 + $0x28] sm:$0x88] %vm6873_vm1, %v4203_v47 }
 0x35d   : > { %v2559_v45 = vpop.permute.xlu0 %2558  ;;  %1756 = vst.msk [vmem:[#allocation3 + $0x38] sm:$0x88] %vm6873_vm1, %v4203_v47 }
 0x35e   : > { %v2555_v51 = vpop.permute.xlu1 %2554  ;;  %2631 = vst.msk [vmem:[#allocation3 + $0x68] sm:$0x7] %vm2618_vm14, %v2559_v45  ;;  %v2575_v48 = vpop.permute.xlu2 %2574 }
 0x35f   : > { %2629 = vst.msk [vmem:[#allocation3 + $0x58] sm:$0x7] %vm2618_vm14, %v2555_v51  ;;  %v3114_v51 = vld [vmem:[#allocation2 + $0x71] sm:$0xff] }
 0x360   : > { %2639 = vst.msk [vmem:[#allocation3 + $0xa8] sm:$0x7] %vm2618_vm14, %v2575_v48  ;;  %v2870_v48 = vld [vmem:[#allocation2 + $0xe8] sm:$0x3f]  ;;  %v3142_v53 = vpack.c.bf16 %v3114_v51, %v3114_v51  ;;  %v3325_v51 = vld [vmem:[#allocation2 + $0xda] sm:$0x3f] }
 0x361   : > { %v2898_v30 = vpack.c.bf16 %v2870_v48, %v2870_v48  ;;  %1757 = vst.msk [vmem:[#allocation3 + $0x48] sm:$0x88] %vm6873_vm1, %v4203_v47  ;;  %v2851_v48 = vld [vmem:[#allocation2 + $0x50] sm:$0xff] }
 0x362   : > { %1758 = vst.msk [vmem:[#allocation3 + $0x58] sm:$0x88] %vm6873_vm1, %v4203_v47 }
 0x363   : > { %2959 = vrot.lane.b32.xlu0 %v2888_v21, %s4201_s24  ;;  %1759 = vst.msk [vmem:[#allocation3 + $0x68] sm:$0x88] %vm6873_vm1, %v4203_v47 }
 0x364   : > { %2929 = vrot.lane.b32.xlu1 %v2873_v20, %s4201_s24  ;;  %2957 = vrot.lane.b32.xlu2 %v6433_v37, %s4201_s24  ;;  %1761 = vst.msk [vmem:[#allocation3 + $0x88] sm:$0x88] %vm6873_vm1, %v4203_v47 }
 0x365   : > { %v2565_v50 = vpop.permute.xlu0 %2564  ;;  %1762 = vst.msk [vmem:[#allocation3 + $0x98] sm:$0x88] %vm6873_vm1, %v4203_v47 }
 0x366   : > { %v2561_v40 = vpop.permute.xlu1 %2560  ;;  %2634 = vst.msk [vmem:[#allocation3 + $0x80] sm:$0xf] %vm2616_vm12, %v2565_v50  ;;  %v2581_v49 = vpop.permute.xlu2 %2580 }
 0x367   : > { %2632 = vst.msk [vmem:[#allocation3 + $0x70] sm:$0xf] %vm2616_vm12, %v2561_v40  ;;  %v3313_v40 = vld [vmem:[#allocation2 + $0x7a] sm:$0x3f] }
 0x368   : > { %2642 = vst.msk [vmem:[#allocation3 + $0xc0] sm:$0xf] %vm2616_vm12, %v2581_v49  ;;  %v3115_v49 = vld [vmem:[#allocation2 + $0x79] sm:$0x3f]  ;;  %v3341_v34 = vpack.c.bf16 %v3313_v40, %v3313_v40 }
 0x369   : > { %v3143_v36 = vpack.c.bf16 %v3115_v49, %v3115_v49  ;;  %1763 = vst.msk [vmem:[#allocation3 + $0xa8] sm:$0x88] %vm6873_vm1, %v4203_v47 }
 0x36a   : > { %1764 = vst.msk [vmem:[#allocation3 + $0xb8] sm:$0x88] %vm6873_vm1, %v4203_v47 }
 0x36b   : > { %3414 = vrot.lane.b32.xlu0 %v3344_v23, %s4202_s25  ;;  %v3340_v23 = vpack.c.bf16 %v3312_v52, %v3312_v52  ;;  %1765 = vst.msk [vmem:[#allocation3 + $0xc8] sm:$0x88] %vm6873_vm1, %v4203_v47 }
 0x36c   : > { %3216 = vrot.lane.b32.xlu1 %v3146_v2, %s4194_s17  ;;  %3218 = vrot.lane.b32.xlu2 %v3147_v3, %s4194_s17  ;;  %1766 = vst.msk [vmem:[#allocation3 + $0xd8] sm:$0x88] %vm6873_vm1, %v4203_v47 }
 0x36d   : > { %v2571_v37 = vpop.permute.xlu0 %2570 }
 0x36e   : > { %v2567_v19 = vpop.permute.xlu1 %2566  ;;  %2637 = vst.msk [vmem:[#allocation3 + $0x98] sm:$0x7] %vm2618_vm14, %v2571_v37  ;;  %v2587_v22 = vpop.permute.xlu2 %2586  ;;  %v3129_v37 = vld [vmem:[#allocation2 + $0xe9] sm:$0x3f] }
 0x36f   : > { %2635 = vst.msk [vmem:[#allocation3 + $0x88] sm:$0x7] %vm2618_vm14, %v2567_v19  ;;  %v3157_v19 = vpack.c.bf16 %v3129_v37, %v3129_v37 }
 0x370   : > { %2645 = vst.msk [vmem:[#allocation3 + $0xd8] sm:$0x7] %vm2618_vm14, %v2587_v22 }
 0x373   : > { %2955 = vrot.lane.b32.xlu0 %v2886_v29, %s4201_s24  ;;  %v2854_v29 = vld [vmem:[#allocation2 + $0x68] sm:$0x3f] }
 0x374   : > { %3416 = vrot.lane.b32.xlu1 %v3345_v58, %s4202_s25  ;;  %2953 = vrot.lane.b32.xlu2 %v6401_v28, %s4201_s24  ;;  %v3327_v58 = vld [vmem:[#allocation2 + $0xea] sm:$0x3f] }
 0x375   : > { %v2577_v41 = vpop.permute.xlu0 %2576 }
 0x376   : > { %v2573_v9 = vpop.permute.xlu1 %2572  ;;  %2640 = vst.msk [vmem:[#allocation3 + $0xb0] sm:$0xf] %vm2616_vm12, %v2577_v41  ;;  %v2735_v60 = vpop.permute.xlu2 %2734  ;;  %v2853_v41 = vld [vmem:[#allocation2 + $0x60] sm:$0xff] }
 0x377   : > { %2638 = vst.msk [vmem:[#allocation3 + $0xa0] sm:$0xf] %vm2616_vm12, %v2573_v9  ;;  %v2882_v9 = vpack.c.bf16 %v2854_v29, %v2854_v29 }
 0x378   : > { %2818 = vst.msk [vmem:[#allocation3 + $0x10] sm:$0xf] %vm2814_vm9, %v2735_v60  ;;  %v3355_v60 = vpack.c.bf16 %v3327_v58, %v3327_v58 }
 0x37b   : > { %3212 = vrot.lane.b32.xlu0 %v3144_v38, %s4194_s17  ;;  %v2867_v38 = vld [vmem:[#allocation2 + $0xd0] sm:$0xff] }
 0x37c   : > { %2981 = vrot.lane.b32.xlu1 %v2899_v15, %s4201_s24  ;;  %2983 = vrot.lane.b32.xlu2 %v2900_v6, %s4201_s24  ;;  %v2868_v15 = vld [vmem:[#allocation2 + $0xd8] sm:$0x3f]  ;;  %v3140_v6 = vpack.c.bf16 %v3112_v25, %v3112_v25 }
 0x37d   : > { %v2583_v28 = vpop.permute.xlu0 %2582 }
 0x37e   : > { %v2579_v61 = vpop.permute.xlu1 %2578  ;;  %2643 = vst.msk [vmem:[#allocation3 + $0xc8] sm:$0x7] %vm2618_vm14, %v2583_v28  ;;  %v2741_v32 = vpop.permute.xlu2 %2740  ;;  %v2895_v28 = vpack.c.bf16 %v2867_v38, %v2867_v38 }
 0x37f   : > { %2641 = vst.msk [vmem:[#allocation3 + $0xb8] sm:$0x7] %vm2618_vm14, %v2579_v61  ;;  %v2896_v61 = vpack.c.bf16 %v2868_v15, %v2868_v15  ;;  %vm3472_vm14 = vcmask 420096  }
 0x380   : > { %2821 = vst.msk [vmem:[#allocation3 + $0x28] sm:$0x7] %vm2816_vm0, %v2741_v32 }
 0x383   : > { %3412 = vrot.lane.b32.xlu0 %v3343_v31, %s4202_s25 }
 0x384   : > { %3214 = vrot.lane.b32.xlu1 %v3145_v11, %s4194_s17  ;;  %3410 = vrot.lane.b32.xlu2 %v3342_v10, %s4202_s25  ;;  %v3113_v11 = vld [vmem:[#allocation2 + $0x69] sm:$0x3f] }
 0x385   : > { %v2731_v14 = vpop.permute.xlu0 %2730  ;;  %v3310_v10 = vld [vmem:[#allocation2 + $0x62] sm:$0xff]  ;;  %v3141_v35 = vpack.c.bf16 %v3113_v11, %v3113_v11 }
 0x386   : > { %v2585_v56 = vpop.permute.xlu1 %2584  ;;  %2815 = vst.msk [vmem:[#allocation3] sm:$0xf] %vm2814_vm9, %v2731_v14  ;;  %v2747_v16 = vpop.permute.xlu2 %2746  ;;  %v3338_v59 = vpack.c.bf16 %v3310_v10, %v3310_v10 }
 0x387   : > { %2644 = vst.msk [vmem:[#allocation3 + $0xd0] sm:$0xf] %vm2616_vm12, %v2585_v56  ;;  %vm3470_vm12 = vcmask 421120  }
 0x388   : > { %2824 = vst.msk [vmem:[#allocation3 + $0x40] sm:$0xf] %vm2814_vm9, %v2747_v16  ;;  %v3339_v16 = vpack.c.bf16 %v3311_v33, %v3311_v33  ;;  %v3124_v33 = vld [vmem:[#allocation2 + $0xc1] sm:$0xff] }
 0x38b   : > { %3438 = vrot.lane.b32.xlu0 %v3356_v8, %s4202_s25 }
 0x38c   : > { %3240 = vrot.lane.b32.xlu1 %v3158_v18, %s4194_s17  ;;  %3242 = vrot.lane.b32.xlu2 %v3159_v26, %s4194_s17 }
 0x38d   : > { %v2737_v1 = vpop.permute.xlu0 %2736 }
 0x38e   : > { %v2733_v4 = vpop.permute.xlu1 %2732  ;;  %2819 = vst.msk [vmem:[#allocation3 + $0x18] sm:$0x7] %vm2816_vm0, %v2737_v1  ;;  %v2753_v0 = vpop.permute.xlu2 %2752  ;;  %v3324_v1 = vld [vmem:[#allocation2 + $0xd2] sm:$0xff] }
 0x38f   : > { %2817 = vst.msk [vmem:[#allocation3 + $0x8] sm:$0x7] %vm2816_vm0, %v2733_v4  ;;  %v3126_v4 = vld [vmem:[#allocation2 + $0xd1] sm:$0xff]  ;;  %v3352_v62 = vpack.c.bf16 %v3324_v1, %v3324_v1 }
 0x390   : > { %2827 = vst.msk [vmem:[#allocation3 + $0x58] sm:$0x7] %vm2816_vm0, %v2753_v0  ;;  %v3127_v0 = vld [vmem:[#allocation2 + $0xd9] sm:$0x3f]  ;;  %v3154_v43 = vpack.c.bf16 %v3126_v4, %v3126_v4 }
 0x393   : > { %2951 = vrot.lane.b32.xlu0 %v2884_v54, %s4201_s24  ;;  %v3155_v54 = vpack.c.bf16 %v3127_v0, %v3127_v0 }
 0x394   : > { %3440 = vrot.lane.b32.xlu1 %v3357_v39, %s4202_s25  ;;  %2949 = vrot.lane.b32.xlu2 %v2883_v57, %s4201_s24 }
 0x395   : > { %v2743_v7 = vpop.permute.xlu0 %2742 }
 0x396   : > { %v2739_v5 = vpop.permute.xlu1 %2738  ;;  %2822 = vst.msk [vmem:[#allocation3 + $0x30] sm:$0xf] %vm2814_vm9, %v2743_v7  ;;  %v2759_v45 = vpop.permute.xlu2 %2758 }
 0x397   : > { %2820 = vst.msk [vmem:[#allocation3 + $0x20] sm:$0xf] %vm2814_vm9, %v2739_v5  ;;  %v2852_v5 = vld [vmem:[#allocation2 + $0x58] sm:$0x3f] }
 0x398   : > { %2830 = vst.msk [vmem:[#allocation3 + $0x70] sm:$0xf] %vm2814_vm9, %v2759_v45 }
 0x39b   : > { %3208 = vrot.lane.b32.xlu0 %v3142_v53, %s4194_s17 }
 0x39c   : > { %2977 = vrot.lane.b32.xlu1 %v6631_v27, %s4201_s24  ;;  %2979 = vrot.lane.b32.xlu2 %v2898_v30, %s4201_s24  ;;  %v2880_v30 = vpack.c.bf16 %v2852_v5, %v2852_v5 }
 0x39d   : > { %v2749_v21 = vpop.permute.xlu0 %2748 }
 0x39e   : > { %v2745_v20 = vpop.permute.xlu1 %2744  ;;  %2825 = vst.msk [vmem:[#allocation3 + $0x48] sm:$0x7] %vm2816_vm0, %v2749_v21  ;;  %v2765_v50 = vpop.permute.xlu2 %2764  ;;  %v3353_v21 = vpack.c.bf16 %v3325_v51, %v3325_v51 }
 0x39f   : > { %2823 = vst.msk [vmem:[#allocation3 + $0x38] sm:$0x7] %vm2816_vm0, %v2745_v20  ;;  %v2879_v20 = vpack.c.bf16 %v2851_v48, %v2851_v48 }
 0x3a0   : > { %2833 = vst.msk [vmem:[#allocation3 + $0x88] sm:$0x7] %vm2816_vm0, %v2765_v50 }
 0x3a3   : > { %3408 = vrot.lane.b32.xlu0 %v3341_v34, %s4202_s25 }
 0x3a4   : > { %3210 = vrot.lane.b32.xlu1 %v3143_v36, %s4194_s17  ;;  %3406 = vrot.lane.b32.xlu2 %v3340_v23, %s4202_s25  ;;  %v2865_v36 = vld [vmem:[#allocation2 + $0xc0] sm:$0xff]  ;;  %v3110_v23 = vld [vmem:[#allocation2 + $0x51] sm:$0xff] }
 0x3a5   : > { %v2755_v27 = vpop.permute.xlu0 %2754 }
 0x3a6   : > { %v2751_v2 = vpop.permute.xlu1 %2750  ;;  %2828 = vst.msk [vmem:[#allocation3 + $0x60] sm:$0xf] %vm2814_vm9, %v2755_v27  ;;  %v2771_v3 = vpop.permute.xlu2 %2770 }
 0x3a7   : > { %2826 = vst.msk [vmem:[#allocation3 + $0x50] sm:$0xf] %vm2814_vm9, %v2751_v2 }
 0x3a8   : > { %2836 = vst.msk [vmem:[#allocation3 + $0xa0] sm:$0xf] %vm2814_vm9, %v2771_v3  ;;  %v2866_v3 = vld [vmem:[#allocation2 + $0xc8] sm:$0x3f] }
 0x3a9   : > { %v2894_v29 = vpack.c.bf16 %v2866_v3, %v2866_v3 }
 0x3ab   : > { %3434 = vrot.lane.b32.xlu0 %v6778_v42, %s4202_s25  ;;  %v2881_v42 = vpack.c.bf16 %v2853_v41, %v2853_v41 }
 0x3ac   : > { %3236 = vrot.lane.b32.xlu1 %v6708_v12, %s4194_s17  ;;  %3238 = vrot.lane.b32.xlu2 %v3157_v19, %s4194_s17 }
 0x3ad   : > { %v2761_v22 = vpop.permute.xlu0 %2760 }
 0x3ae   : > { %v2757_v13 = vpop.permute.xlu1 %2756  ;;  %2831 = vst.msk [vmem:[#allocation3 + $0x78] sm:$0x7] %vm2816_vm0, %v2761_v22  ;;  %v2777_v24 = vpop.permute.xlu2 %2776 }
 0x3af   : > { %2829 = vst.msk [vmem:[#allocation3 + $0x68] sm:$0x7] %vm2816_vm0, %v2757_v13  ;;  %v3138_v13 = vpack.c.bf16 %v3110_v23, %v3110_v23 }
 0x3b0   : > { %2839 = vst.msk [vmem:[#allocation3 + $0xb8] sm:$0x7] %vm2816_vm0, %v2777_v24  ;;  %v2893_v24 = vpack.c.bf16 %v2865_v36, %v2865_v36 }
 0x3b3   : > { %2947 = vrot.lane.b32.xlu0 %v2882_v9, %s4201_s24 }
 0x3b4   : > { %3436 = vrot.lane.b32.xlu1 %v3355_v60, %s4202_s25  ;;  %2945 = vrot.lane.b32.xlu2 %v2881_v42, %s4201_s24  ;;  %v3309_v60 = vld [vmem:[#allocation2 + $0x5a] sm:$0x3f] }
 0x3b5   : > { %v2767_v12 = vpop.permute.xlu0 %2766  ;;  %v3111_v42 = vld [vmem:[#allocation2 + $0x59] sm:$0x3f]  ;;  %v3337_v25 = vpack.c.bf16 %v3309_v60, %v3309_v60 }
 0x3b6   : > { %v2763_v46 = vpop.permute.xlu1 %2762  ;;  %2834 = vst.msk [vmem:[#allocation3 + $0x90] sm:$0xf] %vm2814_vm9, %v2767_v12  ;;  %v2783_v17 = vpop.permute.xlu2 %2782  ;;  %v3308_v12 = vld [vmem:[#allocation2 + $0x52] sm:$0xff]  ;;  %v3139_v15 = vpack.c.bf16 %v3111_v42, %v3111_v42 }
 0x3b7   : > { %2832 = vst.msk [vmem:[#allocation3 + $0x80] sm:$0xf] %vm2814_vm9, %v2763_v46 }
 0x3b8   : > { %2842 = vst.msk [vmem:[#allocation3 + $0xd0] sm:$0xf] %vm2814_vm9, %v2783_v17 }
 0x3bb   : > { %3204 = vrot.lane.b32.xlu0 %v3140_v6, %s4194_s17  ;;  %v3336_v6 = vpack.c.bf16 %v3308_v12, %v3308_v12 }
 0x3bc   : > { %2973 = vrot.lane.b32.xlu1 %v2895_v28, %s4201_s24  ;;  %2975 = vrot.lane.b32.xlu2 %v2896_v61, %s4201_s24 }
 0x3bd   : > { %v2773_v32 = vpop.permute.xlu0 %2772 }
 0x3be   : > { %v2769_v55 = vpop.permute.xlu1 %2768  ;;  %2837 = vst.msk [vmem:[#allocation3 + $0xa8] sm:$0x7] %vm2816_vm0, %v2773_v32  ;;  %v2958_v63 = vpop.permute.xlu2 %2957 }
 0x3bf   : > { %2835 = vst.msk [vmem:[#allocation3 + $0x98] sm:$0x7] %vm2816_vm0, %v2769_v55  ;;  %v2999_v31 = vrot.slane %v2958_v63, 4 }
 0x3c1   : > { %v3028_v56 = vsel %vm3013_vm13, %v2999_v31, %v2958_v63  ;;  %v3322_v63 = vld [vmem:[#allocation2 + $0xc2] sm:$0xff] }
 0x3c2   : > { %3090 = vst.msk [vmem:[#allocation3 + $0x70] sm:$0xff] %vm6863_vm8, %v3028_v56  ;;  %v3125_v31 = vld [vmem:[#allocation2 + $0xc9] sm:$0x3f]  ;;  %v3350_v10 = vpack.c.bf16 %v3322_v63, %v3322_v63  ;;  %v3152_v56 = vpack.c.bf16 %v3124_v33, %v3124_v33 }
 0x3c3   : > { %3404 = vrot.lane.b32.xlu0 %v3339_v16, %s4202_s25  ;;  %v3153_v16 = vpack.c.bf16 %v3125_v31, %v3125_v31 }
 0x3c4   : > { %3206 = vrot.lane.b32.xlu1 %v3141_v35, %s4194_s17  ;;  %3402 = vrot.lane.b32.xlu2 %v3338_v59, %s4202_s25  ;;  %v2850_v59 = vld [vmem:[#allocation2 + $0x48] sm:$0x3f] }
 0x3c5   : > { %v2779_v44 = vpop.permute.xlu0 %2778 }
 0x3c6   : > { %v2775_v18 = vpop.permute.xlu1 %2774  ;;  %2840 = vst.msk [vmem:[#allocation3 + $0xc0] sm:$0xf] %vm2814_vm9, %v2779_v44  ;;  %v6878_v26 = vpop.permute.xlu2 %3218  ;;  %v2849_v44 = vld [vmem:[#allocation2 + $0x40] sm:$0xff] }
 0x3c7   : > { %2838 = vst.msk [vmem:[#allocation3 + $0xb0] sm:$0xf] %vm2814_vm9, %v2775_v18  ;;  %vm3661_vm9 = vcmask 424960   ;;  %v2877_v48 = vpack.c.bf16 %v2849_v44, %v2849_v44 }
 0x3c9   : > { %v4012_v46 = vld [vmem:[#allocation3 + $0x70] sm:$0xf] }
 0x3cb   : > { %3430 = vrot.lane.b32.xlu0 %v3352_v62, %s4202_s25  ;;  %v3323_v62 = vld [vmem:[#allocation2 + $0xca] sm:$0x3f] }
 0x3cc   : > { %3232 = vrot.lane.b32.xlu1 %v3154_v43, %s4194_s17  ;;  %3234 = vrot.lane.b32.xlu2 %v3155_v54, %s4194_s17  ;;  %v2878_v43 = vpack.c.bf16 %v2850_v59, %v2850_v59  ;;  %v3351_v51 = vpack.c.bf16 %v3323_v62, %v3323_v62 }
 0x3cd   : > { %v2785_v39 = vpop.permute.xlu0 %2784 }
 0x3ce   : > { %v2781_v57 = vpop.permute.xlu1 %2780  ;;  %2843 = vst.msk [vmem:[#allocation3 + $0xd8] sm:$0x7] %vm2816_vm0, %v2785_v39  ;;  %v2954_v7 = vpop.permute.xlu2 %2953 }
 0x3cf   : > { %2841 = vst.msk [vmem:[#allocation3 + $0xc8] sm:$0x7] %vm2816_vm0, %v2781_v57  ;;  %v2997_v45 = vrot.slane %v2954_v7, 4  ;;  %vm3760_vm0 = vcmask 785408  }
 0x3d1   : > { %v3026_v53 = vsel %vm3013_vm13, %v2997_v45, %v2954_v7 }
 0x3d2   : > { %3088 = vst.msk [vmem:[#allocation3 + $0x60] sm:$0xff] %vm6863_vm8, %v3026_v53 }
 0x3d3   : > { %2943 = vrot.lane.b32.xlu0 %v2880_v30, %s4201_s24 }
 0x3d4   : > { %3432 = vrot.lane.b32.xlu1 %v3353_v21, %s4202_s25  ;;  %2941 = vrot.lane.b32.xlu2 %v2879_v20, %s4201_s24  ;;  %v3108_v20 = vld [vmem:[#allocation2 + $0x41] sm:$0xff] }
 0x3d5   : > { %v2960_v50 = vpop.permute.xlu0 %2959  ;;  %v3136_v36 = vpack.c.bf16 %v3108_v20, %v3108_v20 }
 0x3d6   : > { %v2930_v40 = vpop.permute.xlu1 %2929  ;;  %v3000_v52 = vrot.slane %v2960_v50, 4  ;;  %v2984_v34 = vpop.permute.xlu2 %2983 }
 0x3d7   : > { %v2985_v27 = vrot.slane %v2930_v40, 4  ;;  %v3012_v2 = vrot.slane %v2984_v34, 4 }
 0x3d8   : > { %v3029_v37 = vsel %vm3013_vm13, %v3000_v52, %v2960_v50  ;;  %v2864_v52 = vld [vmem:[#allocation2 + $0xb8] sm:$0x3f] }
 0x3d9   : > { %v3014_v19 = vsel %vm3013_vm13, %v2985_v27, %v2930_v40  ;;  %3091 = vst.msk [vmem:[#allocation3 + $0x78] sm:$0x77] %vm6914_vm5, %v3029_v37  ;;  %v3041_v22 = vsel %vm3013_vm13, %v3012_v2, %v2984_v34  ;;  %v4004_v54 = vld [vmem:[#allocation3 + $0x60] sm:$0xf]  ;;  %v2863_v40 = vld [vmem:[#allocation2 + $0xb0] sm:$0xff]  ;;  %v2892_v3 = vpack.c.bf16 %v2864_v52, %v2864_v52 }
 0x3da   : > { %3073 = vst.msk [vmem:[#allocation3] sm:$0xff] %vm6863_vm8, %v3014_v19  ;;  %v2891_v2 = vpack.c.bf16 %v2863_v40, %v2863_v40 }
 0x3db   : > { %3103 = vst.msk [vmem:[#allocation3 + $0xd8] sm:$0x77] %vm6914_vm5, %v3041_v22  ;;  %3200 = vrot.lane.b32.xlu0 %v3138_v13, %s4194_s17 }
 0x3dc   : > { %2969 = vrot.lane.b32.xlu1 %v2893_v24, %s4201_s24  ;;  %2971 = vrot.lane.b32.xlu2 %v2894_v29, %s4201_s24  ;;  %3289 = vst.msk [vmem:[#allocation3 + $0x7c] sm:$0x7] %vm3274_vm15, %v6878_v26  ;;  %v3109_v24 = vld [vmem:[#allocation2 + $0x49] sm:$0x3f] }
 0x3dd   : > { %v3415_v58 = vpop.permute.xlu0 %3414  ;;  %v3307_v29 = vld [vmem:[#allocation2 + $0x4a] sm:$0x3f] }
 0x3de   : > { %v3217_v41 = vpop.permute.xlu1 %3216  ;;  %v3411_v9 = vpop.permute.xlu2 %3410  ;;  %v3335_v42 = vpack.c.bf16 %v3307_v29, %v3307_v29 }
 0x3df   : > { %3288 = vst.msk [vmem:[#allocation3 + $0x74] sm:$0xf] %vm3272_vm7, %v3217_v41 }
 0x3e0   : > { %3486 = vst.msk [vmem:[#allocation3 + $0x74] sm:$0xf] %vm3470_vm12, %v3415_v58  ;;  %v4087_v17 = vld [vmem:[#allocation3 + $0x74] sm:$0xf0]  ;;  %v3306_v58 = vld [vmem:[#allocation2 + $0x42] sm:$0xff] }
 0x3e1   : > { %v4013_v38 = vor.u32 %v4087_v17, %v4012_v46  ;;  %v3137_v46 = vpack.c.bf16 %v3109_v24, %v3109_v24  ;;  %v3334_v17 = vpack.c.bf16 %v3306_v58, %v3306_v58 }
 0x3e2   : > { %v4099_v27 = vld [vmem:[#allocation3 + $0xd4] sm:$0xf0] }
 0x3e3   : > { %3400 = vrot.lane.b32.xlu0 %v3337_v25, %s4202_s25  ;;  %3707 = vmatpush.bf16.xpose.msra.mxu0 %v4013_v38 }
 0x3e4   : > { %3202 = vrot.lane.b32.xlu1 %v3139_v15, %s4194_s17  ;;  %3398 = vrot.lane.b32.xlu2 %v3336_v6, %s4202_s25 }
 0x3e5   : > { %v2956_v28 = vpop.permute.xlu0 %2955 }
 0x3e6   : > { %v3417_v61 = vpop.permute.xlu1 %3416  ;;  %v2998_v32 = vrot.slane %v2956_v28, 4  ;;  %v3243_v55 = vpop.permute.xlu2 %3242 }
 0x3e7   : > { %3487 = vst.msk [vmem:[#allocation3 + $0x7c] sm:$0x7] %vm3472_vm14, %v3417_v61  ;;  %v4086_v26 = vld [vmem:[#allocation3 + $0x74] sm:$0xf] }
 0x3e8   : > { %v3027_v11 = vsel %vm3013_vm13, %v2998_v32, %v2956_v28  ;;  %3301 = vst.msk [vmem:[#allocation3 + $0xdc] sm:$0x7] %vm3274_vm15, %v3243_v55  ;;  %v3320_v28 = vld [vmem:[#allocation2 + $0xb2] sm:$0xff] }
 0x3e9   : > { %3089 = vst.msk [vmem:[#allocation3 + $0x68] sm:$0x77] %vm6914_vm5, %v3027_v11  ;;  %v3122_v61 = vld [vmem:[#allocation2 + $0xb1] sm:$0xff]  ;;  %v3123_v32 = vld [vmem:[#allocation2 + $0xb9] sm:$0x3f]  ;;  %v3348_v63 = vpack.c.bf16 %v3320_v28, %v3320_v28 }
 0x3ea   : > { %v3150_v33 = vpack.c.bf16 %v3122_v61, %v3122_v61  ;;  %v3151_v31 = vpack.c.bf16 %v3123_v32, %v3123_v32 }
 0x3eb   : > { %3426 = vrot.lane.b32.xlu0 %v3350_v10, %s4202_s25  ;;  %v2848_v10 = vld [vmem:[#allocation2 + $0x38] sm:$0x3f] }
 0x3ec   : > { %3228 = vrot.lane.b32.xlu1 %v3152_v56, %s4194_s17  ;;  %3230 = vrot.lane.b32.xlu2 %v3153_v16, %s4194_s17  ;;  %v2847_v56 = vld [vmem:[#allocation2 + $0x30] sm:$0xff] }
 0x3ed   : > { %v3213_v35 = vpop.permute.xlu0 %3212 }
 0x3ee   : > { %v2982_v8 = vpop.permute.xlu1 %2981  ;;  %3286 = vst.msk [vmem:[#allocation3 + $0x64] sm:$0xf] %vm3272_vm7, %v3213_v35  ;;  %v2950_v18 = vpop.permute.xlu2 %2949  ;;  %v4014_v1 = vld [vmem:[#allocation3 + $0x78] sm:$0xf0] }
 0x3ef   : > { %v3011_v4 = vrot.slane %v2982_v8, 4  ;;  %3484 = vst.msk [vmem:[#allocation3 + $0x64] sm:$0xf] %vm3470_vm12, %v3411_v9  ;;  %v2995_v0 = vrot.slane %v2950_v18, 4  ;;  %v4017_v47 = vor.u32 %v4086_v26, %v4014_v1  ;;  %v3321_v1 = vld [vmem:[#allocation2 + $0xba] sm:$0x3f] }
 0x3f0   : > { %v4085_v39 = vld [vmem:[#allocation3 + $0x64] sm:$0xf0] }
 0x3f1   : > { %v3040_v57 = vsel %vm3013_vm13, %v3011_v4, %v2982_v8  ;;  %v3024_v7 = vsel %vm3013_vm13, %v2995_v0, %v2950_v18  ;;  %v3687_v5 = vsel %vm3661_vm9, %v4017_v47, 0  ;;  %v4005_v45 = vor.u32 %v4085_v39, %v4004_v54 }
 0x3f2   : > { %3102 = vst.msk [vmem:[#allocation3 + $0xd0] sm:$0xff] %vm6863_vm8, %v3040_v57  ;;  %3720 = vmatpush.bf16.xpose.msra.mxu1 %v3687_v5  ;;  %v2876_v4 = vpack.c.bf16 %v2848_v10, %v2848_v10  ;;  %v3349_v57 = vpack.c.bf16 %v3321_v1, %v3321_v1 }
 0x3f3   : > { %3086 = vst.msk [vmem:[#allocation3 + $0x50] sm:$0xff] %vm6863_vm8, %v3024_v7  ;;  %2939 = vrot.lane.b32.xlu0 %v2878_v43, %s4201_s24  ;;  %3708 = vmatpush.bf16.xpose.msra.mxu0 %v4005_v45  ;;  %v2875_v7 = vpack.c.bf16 %v2847_v56, %v2847_v56 }
 0x3f4   : > { %3428 = vrot.lane.b32.xlu1 %v3351_v51, %s4202_s25  ;;  %2937 = vrot.lane.b32.xlu2 %v2877_v48, %s4201_s24  ;;  %v3106_v48 = vld [vmem:[#allocation2 + $0x31] sm:$0xff] }
 0x3f5   : > { %v3413_v53 = vpop.permute.xlu0 %3412 }
 0x3f6   : > { %v3215_v30 = vpop.permute.xlu1 %3214  ;;  %v2980_v21 = vpop.permute.xlu2 %2979  ;;  %v4084_v41 = vld [vmem:[#allocation3 + $0x64] sm:$0xf] }
 0x3f7   : > { %3287 = vst.msk [vmem:[#allocation3 + $0x6c] sm:$0x7] %vm3274_vm15, %v3215_v30  ;;  %v3010_v50 = vrot.slane %v2980_v21, 4  ;;  %v2861_v30 = vld [vmem:[#allocation2 + $0xa0] sm:$0xff] }
 0x3f8   : > { %3485 = vst.msk [vmem:[#allocation3 + $0x6c] sm:$0x7] %vm3472_vm14, %v3413_v53 }
 0x3f9   : > { %v3039_v34 = vsel %vm3013_vm13, %v3010_v50, %v2980_v21  ;;  %v4060_v23 = vld [vmem:[#allocation3 + $0xd0] sm:$0xf]  ;;  %v2862_v21 = vld [vmem:[#allocation2 + $0xa8] sm:$0x3f]  ;;  %v3134_v50 = vpack.c.bf16 %v3106_v48, %v3106_v48 }
 0x3fa   : > { %3101 = vst.msk [vmem:[#allocation3 + $0xc8] sm:$0x77] %vm6914_vm5, %v3039_v34  ;;  %v4061_v37 = vor.u32 %v4099_v27, %v4060_v23  ;;  %v3996_v0 = vld [vmem:[#allocation3 + $0x50] sm:$0xf]  ;;  %v2889_v34 = vpack.c.bf16 %v2861_v30, %v2861_v30 }
 0x3fb   : > { %3196 = vrot.lane.b32.xlu0 %v3136_v36, %s4194_s17  ;;  %v2890_v36 = vpack.c.bf16 %v2862_v21, %v2862_v21 }
 0x3fc   : > { %2965 = vrot.lane.b32.xlu1 %v2891_v2, %s4201_s24  ;;  %2967 = vrot.lane.b32.xlu2 %v2892_v3, %s4201_s24 }
 0x3fd   : > { %3735 = vmatpush.bf16.xpose.msra.mxu2 %v4061_v37  ;;  %v3439_v19 = vpop.permute.xlu0 %3438  ;;  %v3107_v37 = vld [vmem:[#allocation2 + $0x39] sm:$0x3f] }
 0x3fe   : > { %v3241_v22 = vpop.permute.xlu1 %3240  ;;  %v3407_v13 = vpop.permute.xlu2 %3406 }
 0x3ff   : > { %3300 = vst.msk [vmem:[#allocation3 + $0xd4] sm:$0xf] %vm3272_vm7, %v3241_v22  ;;  %v4006_v9 = vld [vmem:[#allocation3 + $0x68] sm:$0xf0]  ;;  %v3304_v22 = vld [vmem:[#allocation2 + $0x32] sm:$0xff] }
 0x400   : > { %3498 = vst.msk [vmem:[#allocation3 + $0xd4] sm:$0xf] %vm3470_vm12, %v3439_v19  ;;  %v4009_v60 = vor.u32 %v4084_v41, %v4006_v9  ;;  %v3305_v19 = vld [vmem:[#allocation2 + $0x3a] sm:$0x3f]  ;;  %v3135_v9 = vpack.c.bf16 %v3107_v37, %v3107_v37 }
 0x401   : > { %v4097_v52 = vld [vmem:[#allocation3 + $0xc4] sm:$0xf0]  ;;  %v3333_v58 = vpack.c.bf16 %v3305_v19, %v3305_v19 }
 0x402   : > { %v3684_v12 = vsel %vm3661_vm9, %v4009_v60, 0  ;;  %v3332_v60 = vpack.c.bf16 %v3304_v22, %v3304_v22 }
 0x403   : > { %3721 = vmatpush.bf16.xpose.msra.mxu1 %v3684_v12  ;;  %3396 = vrot.lane.b32.xlu0 %v3335_v42, %s4202_s25 }
 0x404   : > { %3198 = vrot.lane.b32.xlu1 %v3137_v46, %s4194_s17  ;;  %3394 = vrot.lane.b32.xlu2 %v3334_v17, %s4202_s25 }
 0x405   : > { %v2952_v25 = vpop.permute.xlu0 %2951 }
 0x406   : > { %v3441_v38 = vpop.permute.xlu1 %3440  ;;  %v2996_v15 = vrot.slane %v2952_v25, 4  ;;  %v3239_v6 = vpop.permute.xlu2 %3238 }
 0x407   : > { %3499 = vst.msk [vmem:[#allocation3 + $0xdc] sm:$0x7] %vm3472_vm14, %v3441_v38  ;;  %v4098_v59 = vld [vmem:[#allocation3 + $0xd4] sm:$0xf]  ;;  %v3120_v38 = vld [vmem:[#allocation2 + $0xa1] sm:$0xff] }
 0x408   : > { %v3025_v55 = vsel %vm3013_vm13, %v2996_v15, %v2952_v25  ;;  %3299 = vst.msk [vmem:[#allocation3 + $0xcc] sm:$0x7] %vm3274_vm15, %v3239_v6  ;;  %v3318_v25 = vld [vmem:[#allocation2 + $0xa2] sm:$0xff]  ;;  %v3148_v61 = vpack.c.bf16 %v3120_v38, %v3120_v38 }
 0x409   : > { %3087 = vst.msk [vmem:[#allocation3 + $0x58] sm:$0x77] %vm6914_vm5, %v3025_v55  ;;  %v3121_v15 = vld [vmem:[#allocation2 + $0xa9] sm:$0x3f]  ;;  %v3346_v28 = vpack.c.bf16 %v3318_v25, %v3318_v25 }
 0x40a   : > { %v3149_v32 = vpack.c.bf16 %v3121_v15, %v3121_v15 }
 0x40b   : > { %3422 = vrot.lane.b32.xlu0 %v3348_v63, %s4202_s25  ;;  %v3104_v63 = vld [vmem:[#allocation2 + $0x21] sm:$0xff] }
 0x40c   : > { %3224 = vrot.lane.b32.xlu1 %v3150_v33, %s4194_s17  ;;  %3226 = vrot.lane.b32.xlu2 %v3151_v31, %s4194_s17  ;;  %v2846_v33 = vld [vmem:[#allocation2 + $0x28] sm:$0x3f] }
 0x40d   : > { %v3209_v11 = vpop.permute.xlu0 %3208 }
 0x40e   : > { %v2978_v16 = vpop.permute.xlu1 %2977  ;;  %3284 = vst.msk [vmem:[#allocation3 + $0x54] sm:$0xf] %vm3272_vm7, %v3209_v11  ;;  %v2946_v35 = vpop.permute.xlu2 %2945  ;;  %v4062_v44 = vld [vmem:[#allocation3 + $0xd8] sm:$0xf0] }
 0x40f   : > { %v3009_v8 = vrot.slane %v2978_v16, 4  ;;  %3482 = vst.msk [vmem:[#allocation3 + $0x54] sm:$0xf] %vm3470_vm12, %v3407_v13  ;;  %v2993_v18 = vrot.slane %v2946_v35, 4  ;;  %v4065_v26 = vor.u32 %v4098_v59, %v4062_v44  ;;  %v3319_v44 = vld [vmem:[#allocation2 + $0xaa] sm:$0x3f] }
 0x410   : > { %v4083_v47 = vld [vmem:[#allocation3 + $0x54] sm:$0xf0] }
 0x411   : > { %v3038_v62 = vsel %vm3013_vm13, %v3009_v8, %v2978_v16  ;;  %v3022_v43 = vsel %vm3013_vm13, %v2993_v18, %v2946_v35  ;;  %v3705_v54 = vsel %vm3661_vm9, %v4065_v26, 0  ;;  %v3997_v39 = vor.u32 %v4083_v47, %v3996_v0 }
 0x412   : > { %3100 = vst.msk [vmem:[#allocation3 + $0xc0] sm:$0xff] %vm6863_vm8, %v3038_v62  ;;  %3748 = vmatpush.bf16.xpose.msra.mxu3 %v3705_v54  ;;  %v3132_v8 = vpack.c.bf16 %v3104_v63, %v3104_v63  ;;  %v3347_v62 = vpack.c.bf16 %v3319_v44, %v3319_v44 }
 0x413   : > { %3084 = vst.msk [vmem:[#allocation3 + $0x40] sm:$0xff] %vm6863_vm8, %v3022_v43  ;;  %2935 = vrot.lane.b32.xlu0 %v2876_v4, %s4201_s24  ;;  %3709 = vmatpush.bf16.xpose.msra.mxu0 %v3997_v39  ;;  %v2874_v43 = vpack.c.bf16 %v2846_v33, %v2846_v33 }
 0x414   : > { %3424 = vrot.lane.b32.xlu1 %v3349_v57, %s4202_s25  ;;  %2933 = vrot.lane.b32.xlu2 %v2875_v7, %s4201_s24  ;;  %v3303_v7 = vld [vmem:[#allocation2 + $0x2a] sm:$0x3f] }
 0x415   : > { %v3409_v5 = vpop.permute.xlu0 %3408 }
 0x416   : > { %v3211_v45 = vpop.permute.xlu1 %3210  ;;  %v2976_v51 = vpop.permute.xlu2 %2975  ;;  %v4082_v13 = vld [vmem:[#allocation3 + $0x54] sm:$0xf] }
 0x417   : > { %3285 = vst.msk [vmem:[#allocation3 + $0x5c] sm:$0x7] %vm3274_vm15, %v3211_v45  ;;  %v3008_v53 = vrot.slane %v2976_v51, 4  ;;  %v3105_v45 = vld [vmem:[#allocation2 + $0x29] sm:$0x3f] }
 0x418   : > { %3483 = vst.msk [vmem:[#allocation3 + $0x5c] sm:$0x7] %vm3472_vm14, %v3409_v5 }
 0x419   : > { %v3037_v20 = vsel %vm3013_vm13, %v3008_v53, %v2976_v51  ;;  %v4052_v40 = vld [vmem:[#allocation3 + $0xc0] sm:$0xf]  ;;  %v3331_v53 = vpack.c.bf16 %v3303_v7, %v3303_v7 }
 0x41a   : > { %3099 = vst.msk [vmem:[#allocation3 + $0xb8] sm:$0x77] %vm6914_vm5, %v3037_v20  ;;  %v4053_v23 = vor.u32 %v4097_v52, %v4052_v40  ;;  %v3988_v18 = vld [vmem:[#allocation3 + $0x40] sm:$0xf]  ;;  %v3133_v20 = vpack.c.bf16 %v3105_v45, %v3105_v45 }
 0x41b   : > { %3192 = vrot.lane.b32.xlu0 %v3134_v50, %s4194_s17  ;;  %v3302_v51 = vld [vmem:[#allocation2 + $0x22] sm:$0xff] }
 0x41c   : > { %2961 = vrot.lane.b32.xlu1 %v2889_v34, %s4201_s24  ;;  %2963 = vrot.lane.b32.xlu2 %v2890_v36, %s4201_s24  ;;  %v3330_v50 = vpack.c.bf16 %v3302_v51, %v3302_v51 }
 0x41d   : > { %3736 = vmatpush.bf16.xpose.msra.mxu2 %v4053_v23  ;;  %v3435_v27 = vpop.permute.xlu0 %3434 }
 0x41e   : > { %v3237_v2 = vpop.permute.xlu1 %3236  ;;  %v3403_v3 = vpop.permute.xlu2 %3402 }
 0x41f   : > { %3298 = vst.msk [vmem:[#allocation3 + $0xc4] sm:$0xf] %vm3272_vm7, %v3237_v2  ;;  %v3998_v24 = vld [vmem:[#allocation3 + $0x58] sm:$0xf0] }
 0x420   : > { %3496 = vst.msk [vmem:[#allocation3 + $0xc4] sm:$0xf] %vm3470_vm12, %v3435_v27  ;;  %v4001_v29 = vor.u32 %v4082_v13, %v3998_v24 }
 0x421   : > { %v4095_v21 = vld [vmem:[#allocation3 + $0xb4] sm:$0xf0] }
 0x422   : > { %v3681_v41 = vsel %vm3661_vm9, %v4001_v29, 0 }
 0x423   : > { %3722 = vmatpush.bf16.xpose.msra.mxu1 %v3681_v41  ;;  %3392 = vrot.lane.b32.xlu0 %v3333_v58, %s4202_s25 }
 0x424   : > { %3194 = vrot.lane.b32.xlu1 %v3135_v9, %s4194_s17  ;;  %3390 = vrot.lane.b32.xlu2 %v3332_v60, %s4202_s25 }
 0x425   : > { %v2948_v42 = vpop.permute.xlu0 %2947 }
 0x426   : > { %v3437_v12 = vpop.permute.xlu1 %3436  ;;  %v2994_v46 = vrot.slane %v2948_v42, 4  ;;  %v3235_v17 = vpop.permute.xlu2 %3234 }
 0x427   : > { %3497 = vst.msk [vmem:[#allocation3 + $0xcc] sm:$0x7] %vm3472_vm14, %v3437_v12  ;;  %v4096_v10 = vld [vmem:[#allocation3 + $0xc4] sm:$0xf] }
 0x428   : > { %v3023_v6 = vsel %vm3013_vm13, %v2994_v46, %v2948_v42  ;;  %3297 = vst.msk [vmem:[#allocation3 + $0xbc] sm:$0x7] %vm3274_vm15, %v3235_v17 }
 0x429   : > { %3085 = vst.msk [vmem:[#allocation3 + $0x48] sm:$0x77] %vm6914_vm5, %v3023_v6 }
 0x42b   : > { %3418 = vrot.lane.b32.xlu0 %v3346_v28, %s4202_s25 }
 0x42c   : > { %3220 = vrot.lane.b32.xlu1 %v3148_v61, %s4194_s17  ;;  %3222 = vrot.lane.b32.xlu2 %v3149_v32, %s4194_s17 }
 0x42d   : > { %v3205_v55 = vpop.permute.xlu0 %3204 }
 0x42e   : > { %v2974_v31 = vpop.permute.xlu1 %2973  ;;  %3282 = vst.msk [vmem:[#allocation3 + $0x44] sm:$0xf] %vm3272_vm7, %v3205_v55  ;;  %v2942_v11 = vpop.permute.xlu2 %2941  ;;  %v4054_v56 = vld [vmem:[#allocation3 + $0xc8] sm:$0xf0] }
 0x42f   : > { %v3007_v16 = vrot.slane %v2974_v31, 4  ;;  %3480 = vst.msk [vmem:[#allocation3 + $0x44] sm:$0xf] %vm3470_vm12, %v3403_v3  ;;  %v2991_v35 = vrot.slane %v2942_v11, 4  ;;  %v4057_v59 = vor.u32 %v4096_v10, %v4054_v56 }
 0x430   : > { %v4081_v26 = vld [vmem:[#allocation3 + $0x44] sm:$0xf0] }
 0x431   : > { %v3036_v1 = vsel %vm3013_vm13, %v3007_v16, %v2974_v31  ;;  %v3020_v4 = vsel %vm3013_vm13, %v2991_v35, %v2942_v11  ;;  %v3702_v0 = vsel %vm3661_vm9, %v4057_v59, 0  ;;  %v3989_v47 = vor.u32 %v4081_v26, %v3988_v18 }
 0x432   : > { %3098 = vst.msk [vmem:[#allocation3 + $0xb0] sm:$0xff] %vm6863_vm8, %v3036_v1  ;;  %3749 = vmatpush.bf16.xpose.msra.mxu3 %v3702_v0 }
 0x433   : > { %3082 = vst.msk [vmem:[#allocation3 + $0x30] sm:$0xff] %vm6863_vm8, %v3020_v4  ;;  %3188 = vrot.lane.b32.xlu0 %v3132_v8, %s4194_s17  ;;  %3710 = vmatpush.bf16.xpose.msra.mxu0 %v3989_v47 }
 0x434   : > { %3420 = vrot.lane.b32.xlu1 %v3347_v62, %s4202_s25  ;;  %2931 = vrot.lane.b32.xlu2 %v2874_v43, %s4201_s24 }
 0x435   : > { %v3405_v54 = vpop.permute.xlu0 %3404 }
 0x436   : > { %v3207_v39 = vpop.permute.xlu1 %3206  ;;  %v2972_v57 = vpop.permute.xlu2 %2971  ;;  %v4080_v23 = vld [vmem:[#allocation3 + $0x44] sm:$0xf] }
 0x437   : > { %3283 = vst.msk [vmem:[#allocation3 + $0x4c] sm:$0x7] %vm3274_vm15, %v3207_v39  ;;  %v3006_v5 = vrot.slane %v2972_v57, 4 }
 0x438   : > { %3481 = vst.msk [vmem:[#allocation3 + $0x4c] sm:$0x7] %vm3472_vm14, %v3405_v54 }
 0x439   : > { %v3035_v48 = vsel %vm3013_vm13, %v3006_v5, %v2972_v57  ;;  %v4044_v30 = vld [vmem:[#allocation3 + $0xb0] sm:$0xf] }
 0x43a   : > { %3097 = vst.msk [vmem:[#allocation3 + $0xa8] sm:$0x77] %vm6914_vm5, %v3035_v48  ;;  %v4045_v40 = vor.u32 %v4095_v21, %v4044_v30  ;;  %v3980_v17 = vld [vmem:[#allocation3 + $0x30] sm:$0xf] }
 0x43b   : > { %3388 = vrot.lane.b32.xlu0 %v3331_v53, %s4202_s25 }
 0x43c   : > { %3190 = vrot.lane.b32.xlu1 %v3133_v20, %s4194_s17  ;;  %3386 = vrot.lane.b32.xlu2 %v3330_v50, %s4202_s25 }
 0x43d   : > { %3737 = vmatpush.bf16.xpose.msra.mxu2 %v4045_v40  ;;  %v3431_v52 = vpop.permute.xlu0 %3430 }
 0x43e   : > { %v3233_v34 = vpop.permute.xlu1 %3232  ;;  %v3399_v36 = vpop.permute.xlu2 %3398 }
 0x43f   : > { %3296 = vst.msk [vmem:[#allocation3 + $0xb4] sm:$0xf] %vm3272_vm7, %v3233_v34  ;;  %v3990_v27 = vld [vmem:[#allocation3 + $0x48] sm:$0xf0] }
 0x440   : > { %3494 = vst.msk [vmem:[#allocation3 + $0xb4] sm:$0xf] %vm3470_vm12, %v3431_v52  ;;  %v3993_v2 = vor.u32 %v4080_v23, %v3990_v27 }
 0x441   : > { %v4093_v11 = vld [vmem:[#allocation3 + $0xa4] sm:$0xf0] }
 0x442   : > { %v3678_v3 = vsel %vm3661_vm9, %v3993_v2, 0 }
 0x443   : > { %3723 = vmatpush.bf16.xpose.msra.mxu1 %v3678_v3 }
 0x445   : > { %v2944_v37 = vpop.permute.xlu0 %2943 }
 0x446   : > { %v3433_v19 = vpop.permute.xlu1 %3432  ;;  %v2992_v22 = vrot.slane %v2944_v37, 4  ;;  %v3231_v13 = vpop.permute.xlu2 %3230 }
 0x447   : > { %3495 = vst.msk [vmem:[#allocation3 + $0xbc] sm:$0x7] %vm3472_vm14, %v3433_v19  ;;  %v4094_v9 = vld [vmem:[#allocation3 + $0xb4] sm:$0xf] }
 0x448   : > { %v3021_v24 = vsel %vm3013_vm13, %v2992_v22, %v2944_v37  ;;  %3295 = vst.msk [vmem:[#allocation3 + $0xac] sm:$0x7] %vm3274_vm15, %v3231_v13 }
 0x449   : > { %3083 = vst.msk [vmem:[#allocation3 + $0x38] sm:$0x77] %vm6914_vm5, %v3021_v24 }
 0x44d   : > { %v3201_v29 = vpop.permute.xlu0 %3200 }
 0x44e   : > { %v2970_v58 = vpop.permute.xlu1 %2969  ;;  %3280 = vst.msk [vmem:[#allocation3 + $0x34] sm:$0xf] %vm3272_vm7, %v3201_v29  ;;  %v2938_v41 = vpop.permute.xlu2 %2937  ;;  %v4046_v60 = vld [vmem:[#allocation3 + $0xb8] sm:$0xf0] }
 0x44f   : > { %v3005_v42 = vrot.slane %v2970_v58, 4  ;;  %3478 = vst.msk [vmem:[#allocation3 + $0x34] sm:$0xf] %vm3470_vm12, %v3399_v36  ;;  %v2989_v12 = vrot.slane %v2938_v41, 4  ;;  %v4049_v46 = vor.u32 %v4094_v9, %v4046_v60 }
 0x450   : > { %v4079_v25 = vld [vmem:[#allocation3 + $0x34] sm:$0xf0] }
 0x451   : > { %v3034_v38 = vsel %vm3013_vm13, %v3005_v42, %v2970_v58  ;;  %v3018_v15 = vsel %vm3013_vm13, %v2989_v12, %v2938_v41  ;;  %v3699_v6 = vsel %vm3661_vm9, %v4049_v46, 0  ;;  %v3981_v28 = vor.u32 %v4079_v25, %v3980_v17 }
 0x452   : > { %3096 = vst.msk [vmem:[#allocation3 + $0xa0] sm:$0xff] %vm6863_vm8, %v3034_v38  ;;  %3750 = vmatpush.bf16.xpose.msra.mxu3 %v3699_v6 }
 0x453   : > { %3080 = vst.msk [vmem:[#allocation3 + $0x20] sm:$0xff] %vm6863_vm8, %v3018_v15  ;;  %3711 = vmatpush.bf16.xpose.msra.mxu0 %v3981_v28 }
 0x455   : > { %v3401_v61 = vpop.permute.xlu0 %3400 }
 0x456   : > { %v3203_v32 = vpop.permute.xlu1 %3202  ;;  %v2968_v55 = vpop.permute.xlu2 %2967  ;;  %v4078_v59 = vld [vmem:[#allocation3 + $0x34] sm:$0xf] }
 0x457   : > { %3281 = vst.msk [vmem:[#allocation3 + $0x3c] sm:$0x7] %vm3274_vm15, %v3203_v32  ;;  %v3004_v63 = vrot.slane %v2968_v55, 4 }
 0x458   : > { %3479 = vst.msk [vmem:[#allocation3 + $0x3c] sm:$0x7] %vm3472_vm14, %v3401_v61 }
 0x459   : > { %v3033_v33 = vsel %vm3013_vm13, %v3004_v63, %v2968_v55  ;;  %v4036_v31 = vld [vmem:[#allocation3 + $0xa0] sm:$0xf] }
 0x45a   : > { %3095 = vst.msk [vmem:[#allocation3 + $0x98] sm:$0x77] %vm6914_vm5, %v3033_v33  ;;  %v4037_v10 = vor.u32 %v4093_v11, %v4036_v31  ;;  %v3972_v51 = vld [vmem:[#allocation3 + $0x20] sm:$0xf] }
 0x45c   : > { %3738 = vmatpush.bf16.xpose.msra.mxu2 %v4037_v10 }
 0x45d   : > { %v3427_v56 = vpop.permute.xlu0 %3426 }
 0x45e   : > { %v3229_v16 = vpop.permute.xlu1 %3228  ;;  %v3395_v35 = vpop.permute.xlu2 %3394 }
 0x45f   : > { %3294 = vst.msk [vmem:[#allocation3 + $0xa4] sm:$0xf] %vm3272_vm7, %v3229_v16  ;;  %v3982_v44 = vld [vmem:[#allocation3 + $0x38] sm:$0xf0] }
 0x460   : > { %3492 = vst.msk [vmem:[#allocation3 + $0xa4] sm:$0xf] %vm3470_vm12, %v3427_v56  ;;  %v3985_v8 = vor.u32 %v4078_v59, %v3982_v44  ;;  %v3500_v56 = vld [vmem:[%s7125_s1] sm:$0xff] }
 0x461   : > { %v4091_v27 = vld [vmem:[#allocation3 + $0x94] sm:$0xf0]  ;;  %v3956_v59 = vld [vmem:[#allocation3] sm:$0xf] }
 0x462   : > { %v3675_v18 = vsel %vm3661_vm9, %v3985_v8, 0 }
 0x463   : > { %3724 = vmatpush.bf16.xpose.msra.mxu1 %v3675_v18  ;;  %v3530_v18 = vunpack.c.l.b16 %v3500_v56 }
 0x465   : > { %v2940_v26 = vpop.permute.xlu0 %2939 }
 0x466   : > { %v3429_v1 = vpop.permute.xlu1 %3428  ;;  %v2990_v4 = vrot.slane %v2940_v26, 4  ;;  %v3227_v0 = vpop.permute.xlu2 %3226 }
 0x467   : > { %3493 = vst.msk [vmem:[#allocation3 + $0xac] sm:$0x7] %vm3472_vm14, %v3429_v1  ;;  %v4092_v39 = vld [vmem:[#allocation3 + $0xa4] sm:$0xf] }
 0x468   : > { %v3019_v47 = vsel %vm3013_vm13, %v2990_v4, %v2940_v26  ;;  %3293 = vst.msk [vmem:[#allocation3 + $0x9c] sm:$0x7] %vm3274_vm15, %v3227_v0  ;;  %v3532_v0 = vpack.c.b16 %v3530_v18, %v3530_v18 }
 0x469   : > { %3081 = vst.msk [vmem:[#allocation3 + $0x28] sm:$0x77] %vm6914_vm5, %v3019_v47 }
 0x46d   : > { %v3197_v62 = vpop.permute.xlu0 %3196 }
 0x46e   : > { %v2966_v43 = vpop.permute.xlu1 %2965  ;;  %3278 = vst.msk [vmem:[#allocation3 + $0x24] sm:$0xf] %vm3272_vm7, %v3197_v62  ;;  %v2934_v54 = vpop.permute.xlu2 %2933  ;;  %v4038_v57 = vld [vmem:[#allocation3 + $0xa8] sm:$0xf0] }
 0x46f   : > { %v3003_v7 = vrot.slane %v2966_v43, 4  ;;  %3476 = vst.msk [vmem:[#allocation3 + $0x24] sm:$0xf] %vm3470_vm12, %v3395_v35  ;;  %v2987_v5 = vrot.slane %v2934_v54, 4  ;;  %v4041_v45 = vor.u32 %v4092_v39, %v4038_v57 }
 0x470   : > { %v4077_v48 = vld [vmem:[#allocation3 + $0x24] sm:$0xf0] }
 0x471   : > { %v3032_v53 = vsel %vm3013_vm13, %v3003_v7, %v2966_v43  ;;  %v3016_v30 = vsel %vm3013_vm13, %v2987_v5, %v2934_v54  ;;  %v3696_v21 = vsel %vm3661_vm9, %v4041_v45, 0  ;;  %v3973_v20 = vor.u32 %v4077_v48, %v3972_v51 }
 0x472   : > { %3094 = vst.msk [vmem:[#allocation3 + $0x90] sm:$0xff] %vm6863_vm8, %v3032_v53  ;;  %3751 = vmatpush.bf16.xpose.msra.mxu3 %v3696_v21  ;;  %v3531_v53 = vunpack.c.h.b16 %v3500_v56 }
 0x473   : > { %3078 = vst.msk [vmem:[#allocation3 + $0x10] sm:$0xff] %vm6863_vm8, %v3016_v30  ;;  %3712 = vmatpush.bf16.xpose.msra.mxu0 %v3973_v20 }
 0x474   : > { %v3533_v30 = vpack.c.b16 %v3531_v53, %v3531_v53 }
 0x475   : > { %v3397_v50 = vpop.permute.xlu0 %3396 }
 0x476   : > { %v3199_v40 = vpop.permute.xlu1 %3198  ;;  %v2964_v52 = vpop.permute.xlu2 %2963  ;;  %v4076_v22 = vld [vmem:[#allocation3 + $0x24] sm:$0xf] }
 0x477   : > { %3279 = vst.msk [vmem:[#allocation3 + $0x2c] sm:$0x7] %vm3274_vm15, %v3199_v40  ;;  %v3002_v34 = vrot.slane %v2964_v52, 4 }
 0x478   : > { %3477 = vst.msk [vmem:[#allocation3 + $0x2c] sm:$0x7] %vm3472_vm14, %v3397_v50 }
 0x479   : > { %v3031_v36 = vsel %vm3013_vm13, %v3002_v34, %v2964_v52  ;;  %v4028_v23 = vld [vmem:[#allocation3 + $0x90] sm:$0xf] }
 0x47a   : > { %3093 = vst.msk [vmem:[#allocation3 + $0x88] sm:$0x77] %vm6914_vm5, %v3031_v36  ;;  %v4029_v2 = vor.u32 %v4091_v27, %v4028_v23  ;;  %v3964_v61 = vld [vmem:[#allocation3 + $0x10] sm:$0xf] }
 0x47c   : > { %3739 = vmatpush.bf16.xpose.msra.mxu2 %v4029_v2 }
 0x47d   : > { %v3423_v3 = vpop.permute.xlu0 %3422 }
 0x47e   : > { %v3225_v37 = vpop.permute.xlu1 %3224  ;;  %v3391_v19 = vpop.permute.xlu2 %3390 }
 0x47f   : > { %3292 = vst.msk [vmem:[#allocation3 + $0x94] sm:$0xf] %vm3272_vm7, %v3225_v37  ;;  %v3974_v13 = vld [vmem:[#allocation3 + $0x28] sm:$0xf0] }
 0x480   : > { %3490 = vst.msk [vmem:[#allocation3 + $0x94] sm:$0xf] %vm3470_vm12, %v3423_v3  ;;  %v3977_v24 = vor.u32 %v4076_v22, %v3974_v13 }
 0x481   : > { %v4089_v35 = vld [vmem:[#allocation3 + $0x84] sm:$0xf0] }
 0x482   : > { %v3672_v29 = vsel %vm3661_vm9, %v3977_v24, 0 }
 0x483   : > { %3725 = vmatpush.bf16.xpose.msra.mxu1 %v3672_v29 }
 0x485   : > { %v2936_v58 = vpop.permute.xlu0 %2935 }
 0x486   : > { %v3425_v41 = vpop.permute.xlu1 %3424  ;;  %v2988_v9 = vrot.slane %v2936_v58, 4  ;;  %v3223_v60 = vpop.permute.xlu2 %3222 }
 0x487   : > { %3491 = vst.msk [vmem:[#allocation3 + $0x9c] sm:$0x7] %vm3472_vm14, %v3425_v41  ;;  %v4090_v25 = vld [vmem:[#allocation3 + $0x94] sm:$0xf] }
 0x488   : > { %v3017_v42 = vsel %vm3013_vm13, %v2988_v9, %v2936_v58  ;;  %3291 = vst.msk [vmem:[#allocation3 + $0x8c] sm:$0x7] %vm3274_vm15, %v3223_v60 }
 0x489   : > { %3079 = vst.msk [vmem:[#allocation3 + $0x18] sm:$0x77] %vm6914_vm5, %v3017_v42 }
 0x48d   : > { %v3193_v12 = vpop.permute.xlu0 %3192 }
 0x48e   : > { %v2962_v46 = vpop.permute.xlu1 %2961  ;;  %3276 = vst.msk [vmem:[#allocation3 + $0x14] sm:$0xf] %vm3272_vm7, %v3193_v12  ;;  %v2932_v17 = vpop.permute.xlu2 %2931  ;;  %v4030_v38 = vld [vmem:[#allocation3 + $0x98] sm:$0xf0] }
 0x48f   : > { %v3001_v15 = vrot.slane %v2962_v46, 4  ;;  %3474 = vst.msk [vmem:[#allocation3 + $0x14] sm:$0xf] %vm3470_vm12, %v3391_v19  ;;  %v2986_v6 = vrot.slane %v2932_v17, 4  ;;  %v4033_v28 = vor.u32 %v4090_v25, %v4030_v38 }
 0x490   : > { %v4075_v32 = vld [vmem:[#allocation3 + $0x14] sm:$0xf0] }
 0x491   : > { %v3030_v55 = vsel %vm3013_vm13, %v3001_v15, %v2962_v46  ;;  %v3015_v63 = vsel %vm3013_vm13, %v2986_v6, %v2932_v17  ;;  %v3693_v33 = vsel %vm3661_vm9, %v4033_v28, 0  ;;  %v3965_v31 = vor.u32 %v4075_v32, %v3964_v61 }
 0x492   : > { %3092 = vst.msk [vmem:[#allocation3 + $0x80] sm:$0xff] %vm6863_vm8, %v3030_v55  ;;  %3752 = vmatpush.bf16.xpose.msra.mxu3 %v3693_v33 }
 0x493   : > { %3077 = vst.msk [vmem:[#allocation3 + $0x8] sm:$0x77] %vm6914_vm5, %v3015_v63  ;;  %3713 = vmatpush.bf16.xpose.msra.mxu0 %v3965_v31 }
 0x495   : > { %v3393_v11 = vpop.permute.xlu0 %3392 }
 0x496   : > { %v3195_v10 = vpop.permute.xlu1 %3194  ;;  %v4074_v1 = vld [vmem:[#allocation3 + $0x14] sm:$0xf]  ;;  %v3387_v39 = vpop.permute.xlu2 %3386 }
 0x497   : > { %3277 = vst.msk [vmem:[#allocation3 + $0x1c] sm:$0x7] %vm3274_vm15, %v3195_v10 }
 0x498   : > { %3475 = vst.msk [vmem:[#allocation3 + $0x1c] sm:$0x7] %vm3472_vm14, %v3393_v11 }
 0x499   : > { %v4020_v16 = vld [vmem:[#allocation3 + $0x80] sm:$0xf] }
 0x49a   : > { %v4073_v14 = vld [vmem:[#allocation3 + $0x4] sm:$0xf0]  ;;  %v4021_v44 = vor.u32 %v4089_v35, %v4020_v16 }
 0x49b   : > { %v3957_v8 = vor.u32 %v4073_v14, %v3956_v59 }
 0x49c   : > { %3740 = vmatpush.bf16.xpose.msra.mxu2 %v4021_v44 }
 0x49d   : > { %3714 = vmatpush.bf16.xpose.msra.mxu0 %v3957_v8  ;;  %v3419_v49 = vpop.permute.xlu0 %3418 }
 0x49e   : > { %v3221_v26 = vpop.permute.xlu1 %3220 }
 0x49f   : > { %3290 = vst.msk [vmem:[#allocation3 + $0x84] sm:$0xf] %vm3272_vm7, %v3221_v26  ;;  %v3966_v4 = vld [vmem:[#allocation3 + $0x18] sm:$0xf0] }
 0x4a0   : > { %3488 = vst.msk [vmem:[#allocation3 + $0x84] sm:$0xf] %vm3470_vm12, %v3419_v49  ;;  %v3969_v47 = vor.u32 %v4074_v1, %v3966_v4 }
 0x4a2   : > { %v3669_v62 = vsel %vm3661_vm9, %v3969_v47, 0 }
 0x4a3   : > { %3726 = vmatpush.bf16.xpose.msra.mxu1 %v3669_v62  ;;  %3741 = vmatmul.bf16.vlgmr.msra.gmra.mxu2 %v3532_v0 }
 0x4a4   : > { %3715 = vmatmul.bf16.vlgmr.msra.gmra.mxu0 %v3532_v0 }
 0x4a5   : > { %v3189_v43 = vpop.permute.xlu0 %3188 }
 0x4a6   : > { %v3421_v54 = vpop.permute.xlu1 %3420  ;;  %3273 = vst.msk [vmem:[#allocation3 + $0x4] sm:$0xf] %vm3272_vm7, %v3189_v43 }
 0x4a7   : > { %3489 = vst.msk [vmem:[#allocation3 + $0x8c] sm:$0x7] %vm3472_vm14, %v3421_v54  ;;  %v4088_v5 = vld [vmem:[#allocation3 + $0x84] sm:$0xf] }
 0x4a8   : > { %3471 = vst.msk [vmem:[#allocation3 + $0x4] sm:$0xf] %vm3470_vm12, %v3387_v39 }
 0x4ad   : > { %v3389_v57 = vpop.permute.xlu0 %3388 }
 0x4ae   : > { %v3191_v7 = vpop.permute.xlu1 %3190  ;;  %v4022_v45 = vld [vmem:[#allocation3 + $0x88] sm:$0xf0] }
 0x4af   : > { %3275 = vst.msk [vmem:[#allocation3 + $0xc] sm:$0x7] %vm3274_vm15, %v3191_v7  ;;  %v4025_v51 = vor.u32 %v4088_v5, %v4022_v45  ;;  %v4072_v21 = vld [vmem:[#allocation3 + $0x4] sm:$0xf] }
 0x4b0   : > { %3473 = vst.msk [vmem:[#allocation3 + $0xc] sm:$0x7] %vm3472_vm14, %v3389_v57 }
 0x4b1   : > { %v3690_v48 = vsel %vm3661_vm9, %v4025_v51, 0 }
 0x4b2   : > { %3753 = vmatpush.bf16.xpose.msra.mxu3 %v3690_v48 }
 0x4b7   : > { %v3958_v20 = vld [vmem:[#allocation3 + $0x8] sm:$0xf0] }
 0x4b8   : > { %v3961_v50 = vor.u32 %v4072_v21, %v3958_v20 }
 0x4b9   : > { %4067 = vmatmul.msk.bf16.vlgmr.msra.gmra.mxu3 %vm3661_vm9, %v3533_v30 }
 0x4ba   : > { %v3666_v40 = vsel %vm3661_vm9, %v3961_v50, 0 }
 0x4bb   : > { %3727 = vmatpush.bf16.xpose.msra.mxu1 %v3666_v40 }
 0x4c2   : > { %4066 = vmatmul.msk.bf16.vlgmr.msra.gmra.mxu1 %vm3661_vm9, %v3533_v30 }
 0x521   : > { %v3716_v52 = vpop.f32.mrf.mxu0 }
 0x526   : > { %v3742_v34 = vpop.f32.mrf.mxu2 }
 0x529   : > { %v3718_v36 = vpop.f32.mrf.mxu0 }
 0x52e   : > { %v3744_v23 = vpop.f32.mrf.mxu2 }
 0x53c   : > { %v3755_v27 = vpop.f32.mrf.mxu3 }
 0x53d   : > { %v3756_v2 = vadd.f32 %v3755_v27, %v3742_v34 }
 0x53f   : > { %v3729_v3 = vpop.f32.mrf.mxu1  ;;  %3761 = vst.msk [vmem:[%s143_s3 + $0x8] sm:$0xff] %vm3760_vm0, %v3756_v2 }
 0x540   : > { %v3730_v37 = vadd.f32 %v3729_v3, %v3716_v52 }
 0x542   : > { %3759 = vst [vmem:[%s143_s3] sm:$0xff] %v3730_v37 }
 0x544   : > { %v3757_v19 = vpop.f32.mrf.mxu3 }
 0x547   : > { %v3731_v22 = vpop.f32.mrf.mxu1 }
 0x548 PF: > { %s12_s9 = sadd.s32 1, %s4190_s9  }
 0x549   : > { %p9_p4 = scmp.ge.s32.totalorder %s12_s9, 4  }
 0x54b   :  { %11 = sbr.rel (!%p9_p4) target bundleno = 1 (0x1), region = 60 }

</bundles_post_ra>
